<compile_context>
chip_gen: v5e
topology: v5e:2x2
jax: 0.10.0
libtpu: 0.0.40
codegen_flags: <defaults>
</compile_context>

<pallas_src>
import functools

import jax
import jax.numpy as jnp
from jax.experimental import pallas as pl
from jax.experimental.pallas import tpu as pltpu

_TM_MAX = 256  # rows per grid step (full MXU feed on v6e/v7x; 128 also fine on v5e)


def _round_up(x, m):
    return ((x + m - 1) // m) * m


def _fused_diffusion_kernel(x_ref, noise_ref, t_ref, temb_tab_ref, sched_ref,
                            w_ref, b_ref, partial_ref, *, n_valid, timesteps):
    # x_ref, noise_ref : (TM, D) bf16   flattened x_start / noise (storage bf16)
    # t_ref            : (TM, 1) int32  sampled timesteps
    # temb_tab_ref     : (T, D)  f32    time-embedding table (VMEM-resident)
    # sched_ref        : (2, T)  f32    [sqrt_acp ; sqrt_1m_acp] (VMEM-resident)
    # w_ref            : (D, D)  bf16   synthetic linear noise predictor (resident)
    # b_ref            : (1, D)  f32    bias (resident)
    # partial_ref      : (1, 1, D) f32  per-tile column sums of the huber loss
    tm = x_ref.shape[0]

    x = x_ref[...].astype(jnp.float32)
    noise = noise_ref[...].astype(jnp.float32)
    t = t_ref[...]                                             # (TM, 1) int32

    # ---- in-kernel gathers via one-hot(t) -------------------------------
    steps_iota = jax.lax.broadcasted_iota(jnp.int32, (tm, timesteps), 1)
    onehot = (t == steps_iota).astype(jnp.float32)             # (TM, T)
    # time embedding: one-hot @ table on the MXU
    temb = jnp.dot(onehot, temb_tab_ref[...],
                   preferred_element_type=jnp.float32)         # (TM, D)
    # diffusion-schedule coefficients at t (VPU mul + tiny lane reduce)
    sched = sched_ref[...]                                     # (2, T)
    sa = jnp.sum(onehot * sched[0:1, :], axis=-1, keepdims=True)    # (TM, 1)
    soma = jnp.sum(onehot * sched[1:2, :], axis=-1, keepdims=True)  # (TM, 1)

    # ---- q_sample: forward diffusion (f32 on the VPU) --------------------
    x_noisy = sa * x + soma * noise

    # ---- synthetic noise-prediction model: (x_noisy + temb) @ W + b ------
    h = (x_noisy + temb).astype(jnp.bfloat16)                  # bf16 MXU operands
    pred = jnp.dot(h, w_ref[...],
                   preferred_element_type=jnp.float32) + b_ref[...]

    # ---- huber / smooth-L1, beta = 1.0 (PyTorch semantics), f32 ----------
    d = noise - pred
    ad = jnp.abs(d)
    per_elem = jnp.where(ad < 1.0, 0.5 * d * d, ad - 0.5)

    # ---- row mask for the ragged (padded) last tile ----------------------
    if n_valid is not None:   # static: only emitted when padding exists
        row = pl.program_id(0) * tm + jax.lax.broadcasted_iota(
            jnp.int32, (tm, 1), 0)
        per_elem = per_elem * (row < n_valid).astype(jnp.float32)

    # lane-dense partial reduction (sum over this tile's rows only)
    partial_ref[...] = jnp.sum(per_elem, axis=0, keepdims=True)[None]


@jax.jit
def fused_diffusion_epoch_loss(x_all, t_all, noise_all,
                               sqrt_acp, sqrt_1m_acp, t_emb_table, w_bf16, b):
    """All simulated trainer steps fused into one pallas_call.

    Returns the trainer's loss_total = sum(per-step huber means) / n_steps,
    which (all steps sharing the same B*D) equals the global mean.
    """
    n_steps, B = x_all.shape[0], x_all.shape[1]
    D = x_all.shape[2] * x_all.shape[3] * x_all.shape[4]
    timesteps = t_emb_table.shape[0]

    M = n_steps * B
    tm = min(_TM_MAX, _round_up(M, 8))
    M_pad = _round_up(M, tm)
    pad = M_pad - M
    num_tiles = M_pad // tm

    # bf16 storage for the two dominant streams; math stays f32 in the kernel.
    x_flat = x_all.reshape(M, D).astype(jnp.bfloat16)
    noise_flat = noise_all.reshape(M, D).astype(jnp.bfloat16)
    t_flat = t_all.reshape(M, 1).astype(jnp.int32)
    if pad:
        x_flat = jnp.pad(x_flat, ((0, pad), (0, 0)))
        noise_flat = jnp.pad(noise_flat, ((0, pad), (0, 0)))
        t_flat = jnp.pad(t_flat, ((0, pad), (0, 0)))

    sched = jnp.stack([sqrt_acp, sqrt_1m_acp], axis=0).astype(jnp.float32)  # (2,T)
    temb_tab = t_emb_table.astype(jnp.float32)                              # (T,D)
    b2d = b.reshape(1, D).astype(jnp.float32)

    kernel = functools.partial(_fused_diffusion_kernel,
                               n_valid=(M if pad else None),
                               timesteps=timesteps)

    flops = 2 * M_pad * D * D + 2 * M_pad * timesteps * D
    bytes_accessed = (x_flat.size * 2 + noise_flat.size * 2 + t_flat.size * 4
                      + temb_tab.size * 4 + sched.size * 4
                      + w_bf16.size * 2 + b2d.size * 4 + num_tiles * D * 4)

    partials = pl.pallas_call(
        kernel,
        out_shape=jax.ShapeDtypeStruct((num_tiles, 1, D), jnp.float32),
        grid=(num_tiles,),
        in_specs=[
            pl.BlockSpec((tm, D), lambda i: (i, 0)),            # x_start (bf16)
            pl.BlockSpec((tm, D), lambda i: (i, 0)),            # noise   (bf16)
            pl.BlockSpec((tm, 1), lambda i: (i, 0)),            # t ids   (int32)
            pl.BlockSpec((timesteps, D), lambda i: (0, 0)),     # temb table (resident)
            pl.BlockSpec((2, timesteps), lambda i: (0, 0)),     # schedule   (resident)
            pl.BlockSpec((D, D), lambda i: (0, 0)),             # W bf16     (resident)
            pl.BlockSpec((1, D), lambda i: (0, 0)),             # b          (resident)
        ],
        out_specs=pl.BlockSpec((1, 1, D), lambda i: (i, 0, 0)),
        compiler_params=pltpu.CompilerParams(
            dimension_semantics=("parallel",),                  # shard tiles across TCs (v7x)
            vmem_limit_bytes=32 * 1024 * 1024),
        cost_estimate=pl.CostEstimate(flops=flops, transcendentals=0,
                                      bytes_accessed=bytes_accessed),
    )(x_flat, noise_flat, t_flat, temb_tab, sched, w_bf16, b2d)

    return jnp.sum(partials) / (M * D)


if __name__ == "__main__":
    # Small shapes consistent with the trainer's image-diffusion use case.
    B, C, H, Wd = 2, 4, 16, 16
    D = C * H * Wd                      # 1024
    timesteps = 8                       # self.timesteps
    n_steps = 9                         # simulated len(train_loader); M=18 -> ragged tile

    key = jax.random.PRNGKey(0)
    k_w, k_emb, k_x, k_t, k_n = jax.random.split(key, 5)

    # Deterministic synthetic model parameters (bf16 weights for the MXU).
    w_f32 = jax.random.normal(k_w, (D, D), dtype=jnp.float32) / jnp.sqrt(D)
    w_bf16 = w_f32.astype(jnp.bfloat16)
    b = jnp.zeros((D,), dtype=jnp.float32)
    t_emb_table = 0.1 * jax.random.normal(k_emb, (timesteps, D), dtype=jnp.float32)

    # Linear beta schedule (DDPM convention).
    betas = jnp.linspace(1e-4, 0.02, timesteps, dtype=jnp.float32)
    alphas_cumprod = jnp.cumprod(1.0 - betas)
    sqrt_acp = jnp.sqrt(alphas_cumprod)
    sqrt_1m_acp = jnp.sqrt(1.0 - alphas_cumprod)

    # Whole simulated "epoch" of trainer steps drawn up-front:
    #   per step: t ~ randint(0, timesteps, (B,)), noise ~ N(0, 1).
    gt_all = jax.random.normal(k_x, (n_steps, B, C, H, Wd), dtype=jnp.float32)
    t_all = jax.random.randint(k_t, (n_steps, B), 0, timesteps)
    noise_all = jax.random.normal(k_n, (n_steps, B, C, H, Wd), dtype=jnp.float32)

    loss_total = fused_diffusion_epoch_loss(
        gt_all, t_all, noise_all, sqrt_acp, sqrt_1m_acp, t_emb_table, w_bf16, b)
    loss_total = jax.block_until_ready(loss_total)

    # Pure-JAX reference using the same storage / matmul precisions
    # (bf16-aware tolerance, per the review's correctness note).
    def _ref():
        M = n_steps * B
        x = gt_all.reshape(M, D).astype(jnp.bfloat16).astype(jnp.float32)
        nz = noise_all.reshape(M, D).astype(jnp.bfloat16).astype(jnp.float32)
        t = t_all.reshape(M)
        sa = sqrt_acp[t].reshape(M, 1)
        soma = sqrt_1m_acp[t].reshape(M, 1)
        temb = t_emb_table[t]
        x_noisy = sa * x + soma * nz
        h = (x_noisy + temb).astype(jnp.bfloat16)
        pred = jnp.dot(h, w_bf16, preferred_element_type=jnp.float32) + b[None, :]
        d = nz - pred
        ad = jnp.abs(d)
        per = jnp.where(ad < 1.0, 0.5 * d * d, ad - 0.5)
        # trainer semantics: mean per step, averaged over steps
        return jnp.mean(per.reshape(n_steps, B * D), axis=1).mean()

    ref = jax.block_until_ready(_ref())
    assert jnp.isfinite(loss_total)
    assert jnp.allclose(loss_total, ref, rtol=2e-2, atol=1e-3), (loss_total, ref)
    print("KERNEL_OK")
</pallas_src>

<mosaic_0001>
module attributes {stable_mosaic.version = 11 : i64} {
  func.func @_fused_diffusion_kernel(%arg0: i32, %arg1: memref<24x1024xbf16, #tpu.memory_space<vmem>>, %arg2: memref<24x1024xbf16, #tpu.memory_space<vmem>>, %arg3: memref<24x1xi32, #tpu.memory_space<vmem>>, %arg4: memref<8x1024xf32, #tpu.memory_space<vmem>>, %arg5: memref<2x8xf32, #tpu.memory_space<vmem>>, %arg6: memref<1024x1024xbf16, #tpu.memory_space<vmem>>, %arg7: memref<1x1024xf32, #tpu.memory_space<vmem>>, %arg8: memref<1x1x1024xf32, #tpu.memory_space<vmem>>) attributes {dimension_semantics = [#tpu.dimension_semantics<parallel>], iteration_bounds = array<i64: 1>, scalar_prefetch = 0 : i64, scratch_operands = 0 : i64, tpu.core_type = #tpu.core_type<tc>, window_params = [{transform_indices = @transform_0, window_bounds = array<i64: 24, 1024>}, {transform_indices = @transform_1, window_bounds = array<i64: 24, 1024>}, {transform_indices = @transform_2, window_bounds = array<i64: 24, 1>}, {pipeline_mode = #tpu.pipeline_mode<synchronous>, transform_indices = @transform_3, window_bounds = array<i64: 8, 1024>}, {pipeline_mode = #tpu.pipeline_mode<synchronous>, transform_indices = @transform_4, window_bounds = array<i64: 2, 8>}, {pipeline_mode = #tpu.pipeline_mode<synchronous>, transform_indices = @transform_5, window_bounds = array<i64: 1024, 1024>}, {pipeline_mode = #tpu.pipeline_mode<synchronous>, transform_indices = @transform_6, window_bounds = array<i64: 1, 1024>}, {transform_indices = @transform_7, window_bounds = array<i64: 1, 1, 1024>}]} {
    %c0 = arith.constant 0 : index
    %c0_0 = arith.constant 0 : index
    %0 = vector.load %arg1[%c0, %c0_0] : memref<24x1024xbf16, #tpu.memory_space<vmem>>, vector<24x1024xbf16>
    %1 = arith.extf %0 : vector<24x1024xbf16> to vector<24x1024xf32>
    %c0_1 = arith.constant 0 : index
    %c0_2 = arith.constant 0 : index
    %2 = vector.load %arg2[%c0_1, %c0_2] : memref<24x1024xbf16, #tpu.memory_space<vmem>>, vector<24x1024xbf16>
    %3 = arith.extf %2 : vector<24x1024xbf16> to vector<24x1024xf32>
    %c0_3 = arith.constant 0 : index
    %c0_4 = arith.constant 0 : index
    %4 = vector.load %arg3[%c0_3, %c0_4] : memref<24x1xi32, #tpu.memory_space<vmem>>, vector<24x1xi32>
    %5 = tpu.iota {dimensions = array<i32: 1>} : vector<24x8xi32>
    %6 = vector.broadcast %4 : vector<24x1xi32> to vector<24x8xi32>
    %7 = arith.cmpi eq, %6, %5 : vector<24x8xi32>
    %8 = arith.extui %7 : vector<24x8xi1> to vector<24x8xi32>
    %9 = arith.sitofp %8 : vector<24x8xi32> to vector<24x8xf32>
    %c0_5 = arith.constant 0 : index
    %c0_6 = arith.constant 0 : index
    %10 = vector.load %arg4[%c0_5, %c0_6] : memref<8x1024xf32, #tpu.memory_space<vmem>>, vector<8x1024xf32>
    %cst = arith.constant dense<0.000000e+00> : vector<24x1024xf32>
    %11 = tpu.matmul %9, %10, %cst {dimension_numbers = #tpu.dot_dimension_numbers<[1], [0], [0], [1], [0, 0, 1, 1], [], []>} : vector<24x8xf32>, vector<8x1024xf32>, vector<24x1024xf32> -> vector<24x1024xf32>
    %c0_7 = arith.constant 0 : index
    %c0_8 = arith.constant 0 : index
    %12 = vector.load %arg5[%c0_7, %c0_8] : memref<2x8xf32, #tpu.memory_space<vmem>>, vector<2x8xf32>
    %13 = vector.extract_strided_slice %12 {offsets = [0, 0], sizes = [1, 8], strides = [1, 1]} : vector<2x8xf32> to vector<1x8xf32>
    %14 = vector.broadcast %13 : vector<1x8xf32> to vector<24x8xf32>
    %15 = arith.mulf %9, %14 : vector<24x8xf32>
    %cst_9 = arith.constant dense<0.000000e+00> : vector<24xf32>
    %16 = vector.multi_reduction <add>, %15, %cst_9 [1] : vector<24x8xf32> to vector<24xf32>
    %17 = vector.shape_cast %16 : vector<24xf32> to vector<24x1xf32>
    %18 = vector.extract_strided_slice %12 {offsets = [1, 0], sizes = [1, 8], strides = [1, 1]} : vector<2x8xf32> to vector<1x8xf32>
    %19 = vector.broadcast %18 : vector<1x8xf32> to vector<24x8xf32>
    %20 = arith.mulf %9, %19 : vector<24x8xf32>
    %cst_10 = arith.constant dense<0.000000e+00> : vector<24xf32>
    %21 = vector.multi_reduction <add>, %20, %cst_10 [1] : vector<24x8xf32> to vector<24xf32>
    %22 = vector.shape_cast %21 : vector<24xf32> to vector<24x1xf32>
    %23 = vector.broadcast %17 : vector<24x1xf32> to vector<24x1024xf32>
    %24 = arith.mulf %23, %1 : vector<24x1024xf32>
    %25 = vector.broadcast %22 : vector<24x1xf32> to vector<24x1024xf32>
    %26 = arith.mulf %25, %3 : vector<24x1024xf32>
    %27 = arith.addf %24, %26 : vector<24x1024xf32>
    %28 = arith.addf %27, %11 : vector<24x1024xf32>
    %29 = arith.truncf %28 : vector<24x1024xf32> to vector<24x1024xbf16>
    %c0_11 = arith.constant 0 : index
    %c0_12 = arith.constant 0 : index
    %30 = vector.load %arg6[%c0_11, %c0_12] : memref<1024x1024xbf16, #tpu.memory_space<vmem>>, vector<1024x1024xbf16>
    %cst_13 = arith.constant dense<0.000000e+00> : vector<24x1024xf32>
    %31 = tpu.matmul %29, %30, %cst_13 {dimension_numbers = #tpu.dot_dimension_numbers<[1], [0], [0], [1], [0, 0, 1, 1], [], []>} : vector<24x1024xbf16>, vector<1024x1024xbf16>, vector<24x1024xf32> -> vector<24x1024xf32>
    %c0_14 = arith.constant 0 : index
    %c0_15 = arith.constant 0 : index
    %32 = vector.load %arg7[%c0_14, %c0_15] : memref<1x1024xf32, #tpu.memory_space<vmem>>, vector<1x1024xf32>
    %33 = vector.broadcast %32 : vector<1x1024xf32> to vector<24x1024xf32>
    %34 = arith.addf %31, %33 : vector<24x1024xf32>
    %35 = arith.subf %3, %34 : vector<24x1024xf32>
    %36 = math.absf %35 : vector<24x1024xf32>
    %cst_16 = arith.constant 1.000000e+00 : f32
    %37 = vector.broadcast %cst_16 : f32 to vector<24x1024xf32>
    %38 = arith.cmpf olt, %36, %37 : vector<24x1024xf32>
    %cst_17 = arith.constant 5.000000e-01 : f32
    %39 = vector.broadcast %cst_17 : f32 to vector<24x1024xf32>
    %40 = arith.mulf %39, %35 : vector<24x1024xf32>
    %41 = arith.mulf %40, %35 : vector<24x1024xf32>
    %cst_18 = arith.constant 5.000000e-01 : f32
    %42 = vector.broadcast %cst_18 : f32 to vector<24x1024xf32>
    %43 = arith.subf %36, %42 : vector<24x1024xf32>
    %44 = arith.select %38, %41, %43 : vector<24x1024xi1>, vector<24x1024xf32>
    %c24_i32 = arith.constant 24 : i32
    %45 = arith.muli %arg0, %c24_i32 : i32
    %46 = tpu.iota {dimensions = array<i32: 0>} : vector<24x1xi32>
    %47 = vector.broadcast %45 : i32 to vector<24x1xi32>
    %48 = arith.addi %47, %46 : vector<24x1xi32>
    %c18_i32 = arith.constant 18 : i32
    %49 = vector.broadcast %c18_i32 : i32 to vector<24x1xi32>
    %50 = arith.cmpi slt, %48, %49 : vector<24x1xi32>
    %51 = arith.extui %50 : vector<24x1xi1> to vector<24x1xi32>
    %52 = arith.sitofp %51 : vector<24x1xi32> to vector<24x1xf32>
    %53 = vector.broadcast %52 : vector<24x1xf32> to vector<24x1024xf32>
    %54 = arith.mulf %44, %53 : vector<24x1024xf32>
    %cst_19 = arith.constant dense<0.000000e+00> : vector<1024xf32>
    %55 = vector.multi_reduction <add>, %54, %cst_19 [0] : vector<24x1024xf32> to vector<1024xf32>
    %56 = vector.shape_cast %55 : vector<1024xf32> to vector<1x1024xf32>
    %57 = vector.shape_cast %56 : vector<1x1024xf32> to vector<1x1x1024xf32>
    %c0_20 = arith.constant 0 : index
    %c0_21 = arith.constant 0 : index
    %c0_22 = arith.constant 0 : index
    %58 = vector.load %arg8[%c0_20, %c0_21, %c0_22] : memref<1x1x1024xf32, #tpu.memory_space<vmem>>, vector<1x1x1024xf32>
    tpu.vector_store %arg8[%c0_20, %c0_21, %c0_22], %57 {strides = array<i32>} : memref<1x1x1024xf32, #tpu.memory_space<vmem>>, vector<1x1x1024xf32>,
    return
  }
  func.func @transform_0(%arg0: i32) -> (i32, i32) {
    %c0_i32 = arith.constant 0 : i32
    %c0_i32_0 = arith.constant 0 : i32
    return %arg0, %c0_i32 : i32, i32
  }
  func.func @transform_1(%arg0: i32) -> (i32, i32) {
    %c0_i32 = arith.constant 0 : i32
    %c0_i32_0 = arith.constant 0 : i32
    return %arg0, %c0_i32 : i32, i32
  }
  func.func @transform_2(%arg0: i32) -> (i32, i32) {
    %c0_i32 = arith.constant 0 : i32
    %c0_i32_0 = arith.constant 0 : i32
    return %arg0, %c0_i32 : i32, i32
  }
  func.func @transform_3(%arg0: i32) -> (i32, i32) {
    %c0_i32 = arith.constant 0 : i32
    %c0_i32_0 = arith.constant 0 : i32
    %c0_i32_1 = arith.constant 0 : i32
    return %c0_i32, %c0_i32_0 : i32, i32
  }
  func.func @transform_4(%arg0: i32) -> (i32, i32) {
    %c0_i32 = arith.constant 0 : i32
    %c0_i32_0 = arith.constant 0 : i32
    %c0_i32_1 = arith.constant 0 : i32
    return %c0_i32, %c0_i32_0 : i32, i32
  }
  func.func @transform_5(%arg0: i32) -> (i32, i32) {
    %c0_i32 = arith.constant 0 : i32
    %c0_i32_0 = arith.constant 0 : i32
    %c0_i32_1 = arith.constant 0 : i32
    return %c0_i32, %c0_i32_0 : i32, i32
  }
  func.func @transform_6(%arg0: i32) -> (i32, i32) {
    %c0_i32 = arith.constant 0 : i32
    %c0_i32_0 = arith.constant 0 : i32
    %c0_i32_1 = arith.constant 0 : i32
    return %c0_i32, %c0_i32_0 : i32, i32
  }
  func.func @transform_7(%arg0: i32) -> (i32, i32, i32) {
    %c0_i32 = arith.constant 0 : i32
    %c0_i32_0 = arith.constant 0 : i32
    %c0_i32_1 = arith.constant 0 : i32
    return %arg0, %c0_i32, %c0_i32_0 : i32, i32, i32
  }
}

</mosaic_0001>

<bundles_post_ra>
// kernel: fused_diffusion_epoch_loss.1
= control target key start
LH: loop header
LB: loop body
LE: loop exit
PB: predicated region body
PF: predicated region fallthrough
CT: control target
= control target key end

     0   :  { %v7656_v0 = vmov 0   ;;  %v11675_v12 = vlaneseq  ;;  %vm129_vm0 = vcmask 64512   ;;  %v11670_v17 = vmov 0.0   ;;  %s11653_s2 = inlined_call_operand.vmem [shape: s32[24,1], index: 2, kind: input, shape index: {}]   ;;  %s11654_s3 = inlined_call_operand.vmem [shape: f32[8,1024], index: 3, kind: input, shape index: {}]   ;;  %s11655_s4 = inlined_call_operand.vmem [shape: f32[2,8], index: 4, kind: input, shape index: {}]   ;;  %s11656_s5 = inlined_call_operand.vmem [shape: bf16[1024,1024], index: 5, kind: input, shape index: {}]   ;;  %s11657_s0 = inlined_call_operand.vmem [shape: bf16[24,1024], index: 0, kind: input, shape index: {}]   ;;  %s11658_s1 = inlined_call_operand.vmem [shape: bf16[24,1024], index: 1, kind: input, shape index: {}]   ;;  %s11659_s6 = inlined_call_operand.vmem [shape: f32[1,1024], index: 6, kind: input, shape index: {}]   ;;  %s11660_s7 = inlined_call_operand.vmem [shape: f32[1,1,1024], index: 7, kind: output, shape index: {}]  }
   0x1   :  { %7651 = vset.pattern.permute.xlu0 %v7656_v0  ;;  %v98_v1 = vld [vmem:[%s11653_s2] sm:$0xff]  ;;  %7652 = vset.pattern.permute.xlu1 %v7656_v0  ;;  %v100_v2 = vld [vmem:[%s11653_s2 + $0x10] sm:$0xff]  ;;  %v99_v3 = vld [vmem:[%s11653_s2 + $0x8] sm:$0xff]  ;;  %vm5017_vm11 = vcmask 1040384  }
   0x2   :  { %104 = vperm.xlu0 %7651, %v98_v1   ;;  %110 = vperm.xlu1 %7652, %v100_v2   ;;  %v121_v4 = vld [vmem:[%s11654_s3] sm:$0xff]  ;;  %v122_v5 = vld [vmem:[%s11654_s3 + $0x8] sm:$0xff]  ;;  %v123_v6 = vld [vmem:[%s11654_s3 + $0x10] sm:$0xff]  ;;  %v102_v14 = vand.u32 127, %v11675_v12 }
   0x3   :  { %154 = vmatpush.msra.mxu0 %v121_v4  ;;  %180 = vmatpush.msra.mxu1 %v122_v5  ;;  %v124_v7 = vld [vmem:[%s11654_s3 + $0x18] sm:$0xff]  ;;  %v127_v8 = vld [vmem:[%s11654_s3 + $0x30] sm:$0xff]  ;;  %v125_v10 = vld [vmem:[%s11654_s3 + $0x20] sm:$0xff] }
   0x4   :  { %206 = vmatpush.msra.mxu2 %v123_v6  ;;  %232 = vmatpush.msra.mxu3 %v124_v7  ;;  %v128_v9 = vld [vmem:[%s11654_s3 + $0x38] sm:$0xff]  ;;  %v126_v11 = vld [vmem:[%s11654_s3 + $0x28] sm:$0xff]  ;;  %v347_v13 = vld [vmem:[%s11655_s4] sm:$0x3] }
   0x5   :  { %258 = vmatpush.msrb.mxu0 %v125_v10  ;;  %284 = vmatpush.msrb.mxu1 %v126_v11  ;;  %v7735_v15 = vperm.slane %v347_v13, 0  ;;  %v361_v23 = vperm.slane %v347_v13, 1  ;;  %v5290_v28 = vld [vmem:[%s11656_s5 + $0x1c0] sm:$0xf] }
   0x6   :  { %310 = vmatpush.msrb.mxu2 %v127_v8  ;;  %336 = vmatpush.msrb.mxu3 %v128_v9  ;;  %v7197_v29 = vld [vmem:[%s11656_s5 + $0x1dc] sm:$0xf0] }
   0x7   :  { %v5546_v30 = vld [vmem:[%s11656_s5 + $0x3c0] sm:$0xf]  ;;  %v5291_v33 = vor.u32 %v7197_v29, %v5290_v28 }
   0x8   :  { %v7261_v34 = vld [vmem:[%s11656_s5 + $0x3dc] sm:$0xf0] }
   0x9   :  { %v5802_v35 = vld [vmem:[%s11656_s5 + $0x5c0] sm:$0xf]  ;;  %v5547_v36 = vor.u32 %v7261_v34, %v5546_v30 }
   0xa   :  { %107 = vperm.xlu0 %7651, %v99_v3   ;;  %v7325_v37 = vld [vmem:[%s11656_s5 + $0x5dc] sm:$0xf0] }
   0xb   :  { %v6058_v38 = vld [vmem:[%s11656_s5 + $0x7c0] sm:$0xf]  ;;  %v5803_v40 = vor.u32 %v7325_v37, %v5802_v35 }
   0xc   :  { %v7389_v39 = vld [vmem:[%s11656_s5 + $0x7dc] sm:$0xf0] }
   0xd   :  { %v6059_v41 = vor.u32 %v7389_v39, %v6058_v38  ;;  %v5258_v42 = vld [vmem:[%s11656_s5 + $0x180] sm:$0xf] }
   0xe   :  { %v7189_v43 = vld [vmem:[%s11656_s5 + $0x19c] sm:$0xf0] }
   0xf   :  { %v5514_v44 = vld [vmem:[%s11656_s5 + $0x380] sm:$0xf]  ;;  %v5259_v49 = vor.u32 %v7189_v43, %v5258_v42 }
  0x10   :  { %v7253_v45 = vld [vmem:[%s11656_s5 + $0x39c] sm:$0xf0] }
  0x11   :  { %v5770_v46 = vld [vmem:[%s11656_s5 + $0x580] sm:$0xf]  ;;  %v5515_v50 = vor.u32 %v7253_v45, %v5514_v44 }
  0x12   :  { %v7317_v47 = vld [vmem:[%s11656_s5 + $0x59c] sm:$0xf0] }
  0x13   :  { %v6026_v51 = vld [vmem:[%s11656_s5 + $0x780] sm:$0xf]  ;;  %v5771_v53 = vor.u32 %v7317_v47, %v5770_v46 }
  0x14   :  { %v7381_v52 = vld [vmem:[%s11656_s5 + $0x79c] sm:$0xf0] }
  0x15   :  { %v6027_v54 = vor.u32 %v7381_v52, %v6026_v51  ;;  %v5226_v60 = vld [vmem:[%s11656_s5 + $0x140] sm:$0xf] }
  0x16   :  { %v7181_v61 = vld [vmem:[%s11656_s5 + $0x15c] sm:$0xf0] }
  0x17   :  { %v5482_v62 = vld [vmem:[%s11656_s5 + $0x340] sm:$0xf]  ;;  %v5227_v63 = vor.u32 %v7181_v61, %v5226_v60 }
  0x18   :  { %v7245_v0 = vld [vmem:[%s11656_s5 + $0x35c] sm:$0xf0] }
  0x19   :  { %v5738_v1 = vld [vmem:[%s11656_s5 + $0x540] sm:$0xf]  ;;  %v5483_v3 = vor.u32 %v7245_v0, %v5482_v62 }
  0x1a   :  { %v7309_v2 = vld [vmem:[%s11656_s5 + $0x55c] sm:$0xf0] }
  0x1b   :  { %v5739_v4 = vor.u32 %v7309_v2, %v5738_v1  ;;  %v5994_v5 = vld [vmem:[%s11656_s5 + $0x740] sm:$0xf] }
  0x1c   :  { %v7373_v6 = vld [vmem:[%s11656_s5 + $0x75c] sm:$0xf0] }
  0x1d   :  { %v5194_v7 = vld [vmem:[%s11656_s5 + $0x100] sm:$0xf]  ;;  %v5995_v8 = vor.u32 %v7373_v6, %v5994_v5 }
  0x1e   :  { %v7173_v9 = vld [vmem:[%s11656_s5 + $0x11c] sm:$0xf0] }
  0x1f   :  { %v5450_v10 = vld [vmem:[%s11656_s5 + $0x300] sm:$0xf]  ;;  %v5195_v13 = vor.u32 %v7173_v9, %v5194_v7 }
  0x20   :  { %v7237_v11 = vld [vmem:[%s11656_s5 + $0x31c] sm:$0xf0] }
  0x21   :  { %v7293_v28 = vld [vmem:[%s11656_s5 + $0x4dc] sm:$0xf0] }
  0x22   :  { %v5130_v34 = vld [vmem:[%s11656_s5 + $0x80] sm:$0xf] }
  0x23   :  { %v7157_v35 = vld [vmem:[%s11656_s5 + $0x9c] sm:$0xf0] }
  0x24   :  { %v5131_v37 = vor.u32 %v7157_v35, %v5130_v34  ;;  %v7221_v38 = vld [vmem:[%s11656_s5 + $0x29c] sm:$0xf0] }
  0x25   :  { %v5642_v39 = vld [vmem:[%s11656_s5 + $0x480] sm:$0xf] }
  0x26   :  { %v5898_v43 = vld [vmem:[%s11656_s5 + $0x680] sm:$0xf] }
  0x27   :  { %v7349_v44 = vld [vmem:[%s11656_s5 + $0x69c] sm:$0xf0] }
  0x28   :  { %v5899_v45 = vor.u32 %v7349_v44, %v5898_v43  ;;  %v5098_v46 = vld [vmem:[%s11656_s5 + $0x40] sm:$0xf] }
  0x29   :  { %v7149_v47 = vld [vmem:[%s11656_s5 + $0x5c] sm:$0xf0] }
  0x2a   :  { %v5610_v51 = vld [vmem:[%s11656_s5 + $0x440] sm:$0xf] }
  0x2b   :  { %v7277_v52 = vld [vmem:[%s11656_s5 + $0x45c] sm:$0xf0] }
  0x2c   :  { %v5322_v60 = vld [vmem:[%s11656_s5 + $0x200] sm:$0xf] }
  0x2d   :  { %v7205_v62 = vld [vmem:[%s11656_s5 + $0x21c] sm:$0xf0] }
  0x2e   :  { %v7269_v0 = vld [vmem:[%s11656_s5 + $0x41c] sm:$0xf0]  ;;  %v5323_v1 = vor.u32 %v7205_v62, %v5322_v60 }
  0x2f   :  { %v6314_v6 = vld [vmem:[%s11656_s5 + $0x9c0] sm:$0xf] }
  0x30   :  { %v7453_v7 = vld [vmem:[%s11656_s5 + $0x9dc] sm:$0xf0] }
  0x31   :  { %v6315_v9 = vor.u32 %v7453_v7, %v6314_v6  ;;  %v6506_v34 = vld [vmem:[%s11656_s5 + $0xb40] sm:$0xf] }
  0x32   :  { %v7501_v35 = vld [vmem:[%s11656_s5 + $0xb5c] sm:$0xf0] }
  0x33   :  { %v6986_v60 = vld [vmem:[%s11656_s5 + $0xf00] sm:$0xf] }
  0x74   :  { %v105_v16 = vpop.permute.xlu0 %104  ;;  %v111_v21 = vpop.permute.xlu1 %110 }
  0x75   :  { %vm112_vm1 = vcmp.eq.s32.totalorder %v105_v16, %v102_v14  ;;  %vm114_vm2 = vcmp.eq.s32.totalorder %v111_v21, %v102_v14  ;;  %v7301_v16 = vld [vmem:[%s11656_s5 + $0x51c] sm:$0xf0] }
  0x76   :  { %v7738_v18 = vsel %vm112_vm1, 1.0, %v11670_v17  ;;  %v7756_v27 = vsel %vm114_vm2, 1.0, %v11670_v17  ;;  %vm5019_vm2 = vcmask 1042434  }
  0x77   :  { %5040 = vmatmul.msk.f32.vlgmr.msra.gmra.mxu0 %vm129_vm0, %v7738_v18  ;;  %5043 = vmatmul.msk.f32.vlgmr.msra.gmra.mxu1 %vm129_vm0, %v7738_v18  ;;  %v349_v19 = vmul.f32 %v7738_v18, %v7735_v15  ;;  %v362_v48 = vmul.f32 %v7738_v18, %v361_v23  ;;  %v351_v56 = vmul.f32 %v7756_v27, %v7735_v15 }
  0x78   :  { %5046 = vmatmul.msk.f32.vlgmr.msra.gmra.mxu2 %vm129_vm0, %v7738_v18  ;;  %5049 = vmatmul.msk.f32.vlgmr.msra.gmra.mxu3 %vm129_vm0, %v7738_v18  ;;  %v364_v58 = vmul.f32 %v7756_v27, %v361_v23 }
  0x79   :  { %v352_v20 = vsel %vm129_vm0, %v349_v19, 0.0  ;;  %3576 = vmatpush.bf16.msra.mxu0 %v5291_v33  ;;  %3594 = vmatpush.bf16.msra.mxu1 %v5547_v36  ;;  %v365_v55 = vsel %vm129_vm0, %v362_v48, 0.0  ;;  %v358_v57 = vsel %vm129_vm0, %v351_v56, 0.0  ;;  %v5386_v36 = vld [vmem:[%s11656_s5 + $0x280] sm:$0xf] }
  0x7a   :  { %353 = vadd.xlane.f32.xlu1 %v352_v20  ;;  %3612 = vmatpush.bf16.msra.mxu2 %v5803_v40  ;;  %v371_v59 = vsel %vm129_vm0, %v364_v58, 0.0  ;;  %v7365_v20 = vld [vmem:[%s11656_s5 + $0x71c] sm:$0xf0] }
  0x7b   :  { %3630 = vmatpush.bf16.msra.mxu3 %v6059_v41  ;;  %v7285_v40 = vld [vmem:[%s11656_s5 + $0x49c] sm:$0xf0]  ;;  %v5387_v41 = vor.u32 %v7221_v38, %v5386_v36 }
  0x7c   :  { %v108_v22 = vpop.permute.xlu0 %107  ;;  %v5643_v42 = vor.u32 %v7285_v40, %v5642_v39  ;;  %v5354_v48 = vld [vmem:[%s11656_s5 + $0x240] sm:$0xf]  ;;  %v6507_v39 = vor.u32 %v7501_v35, %v6506_v34 }
  0x7d   :  { %vm113_vm3 = vcmp.eq.s32.totalorder %v108_v22, %v102_v14  ;;  %3577 = vmatpush.bf16.msra.mxu0 %v5259_v49  ;;  %3595 = vmatpush.bf16.msra.mxu1 %v5515_v50  ;;  %v5451_v14 = vor.u32 %v7237_v11, %v5450_v10  ;;  %v5162_v22 = vld [vmem:[%s11656_s5 + $0xc0] sm:$0xf]  ;;  %v5099_v49 = vor.u32 %v7149_v47, %v5098_v46  ;;  %v8077_v47 = vld [vmem:[%s11657_s0 + $0x8] sm:$0xff] }
  0x7e   :  { %v5038_v24 = vsel %vm113_vm3, 1.0, %v11670_v17  ;;  %3613 = vmatpush.bf16.msra.mxu2 %v5771_v53  ;;  %v7213_v50 = vld [vmem:[%s11656_s5 + $0x25c] sm:$0xf0]  ;;  %v40_v7 = vunpack.c.l.bf16 %v8077_v47  ;;  %v7233_v17 = vld [vmem:[%s11656_s5 + $0x304] sm:$0xf]  ;;  %vm5021_vm3 = vcmask 1041408  }
  0x7f   :  { %5041 = vmatmul.msk.f32.gmra.mxu0 %vm129_vm0, %v5038_v24  ;;  %5044 = vmatmul.msk.f32.gmra.mxu1 %vm129_vm0, %v5038_v24  ;;  %v363_v25 = vmul.f32 %v5038_v24, %v361_v23  ;;  %v350_v26 = vmul.f32 %v5038_v24, %v7735_v15  ;;  %v5706_v15 = vld [vmem:[%s11656_s5 + $0x500] sm:$0xf]  ;;  %v5355_v53 = vor.u32 %v7213_v50, %v5354_v48 }
  0x80   :  { %5047 = vmatmul.msk.f32.gmra.mxu2 %vm129_vm0, %v5038_v24  ;;  %5050 = vmatmul.msk.f32.gmra.mxu3 %vm129_vm0, %v5038_v24  ;;  %v5707_v19 = vor.u32 %v7301_v16, %v5706_v15  ;;  %v7165_v23 = vld [vmem:[%s11656_s5 + $0xdc] sm:$0xf0] }
  0x81   :  { %v368_v31 = vsel %vm129_vm0, %v363_v25, 0.0  ;;  %v355_v32 = vsel %vm129_vm0, %v350_v26, 0.0  ;;  %3631 = vmatpush.bf16.msra.mxu3 %v6027_v54  ;;  %3578 = vmatpush.bf16.msra.mxu0 %v5227_v63  ;;  %v5163_v25 = vor.u32 %v7165_v23, %v5162_v22  ;;  %v7229_v26 = vld [vmem:[%s11656_s5 + $0x2dc] sm:$0xf0]  ;;  %v5611_v54 = vor.u32 %v7277_v52, %v5610_v51 }
  0x82   :  { %369 = vadd.xlane.f32.xlu0 %v368_v31  ;;  %356 = vadd.xlane.f32.xlu2 %v355_v32  ;;  %v5930_v31 = vld [vmem:[%s11656_s5 + $0x6c0] sm:$0xf] }
  0x83   :  { %3596 = vmatpush.bf16.msra.mxu1 %v5483_v3  ;;  %3614 = vmatpush.bf16.msra.mxu2 %v5739_v4  ;;  %v7357_v32 = vld [vmem:[%s11656_s5 + $0x6dc] sm:$0xf0] }
  0x84   :  { %v5931_v33 = vor.u32 %v7357_v32, %v5930_v31  ;;  %v7341_v56 = vld [vmem:[%s11656_s5 + $0x65c] sm:$0xf0] }
  0x85   :  { %3632 = vmatpush.bf16.msra.mxu3 %v5995_v8  ;;  %3579 = vmatpush.bf16.msra.mxu0 %v5195_v13  ;;  %v5066_v58 = vld [vmem:[%s11656_s5] sm:$0xf] }
  0x86   :  { %v5578_v63 = vld [vmem:[%s11656_s5 + $0x400] sm:$0xf] }
  0x87   :  { %5042 = vmatmul.msk.f32.gmra.mxu0 %vm129_vm0, %v7756_v27  ;;  %5045 = vmatmul.msk.f32.gmra.mxu1 %vm129_vm0, %v7756_v27  ;;  %v5579_v2 = vor.u32 %v7269_v0, %v5578_v63  ;;  %v5834_v3 = vld [vmem:[%s11656_s5 + $0x600] sm:$0xf] }
  0x88   :  { %5048 = vmatmul.msk.f32.gmra.mxu2 %vm129_vm0, %v7756_v27  ;;  %5051 = vmatmul.msk.f32.gmra.mxu3 %vm129_vm0, %v7756_v27  ;;  %v7333_v4 = vld [vmem:[%s11656_s5 + $0x61c] sm:$0xf0] }
  0x89   :  { %3597 = vmatpush.bf16.msra.mxu1 %v5451_v14  ;;  %3615 = vmatpush.bf16.msra.mxu2 %v5707_v19  ;;  %v5835_v5 = vor.u32 %v7333_v4, %v5834_v3  ;;  %v6570_v8 = vld [vmem:[%s11656_s5 + $0xbc0] sm:$0xf] }
  0x8a   :  { %366 = vadd.xlane.f32.xlu2 %v365_v55  ;;  %3580 = vmatpush.bf16.msra.mxu0 %v5163_v25  ;;  %v5866_v55 = vld [vmem:[%s11656_s5 + $0x640] sm:$0xf] }
  0x8b   :  { %v7517_v10 = vld [vmem:[%s11656_s5 + $0xbdc] sm:$0xf0] }
  0x8c   :  { %v6826_v11 = vld [vmem:[%s11656_s5 + $0xdc0] sm:$0xf]  ;;  %v6571_v14 = vor.u32 %v7517_v10, %v6570_v8  ;;  %v8130_v8 = vld [vmem:[%s11658_s1 + $0x8] sm:$0xff] }
  0x8d   :  { %v7581_v13 = vld [vmem:[%s11656_s5 + $0xddc] sm:$0xf0] }
  0x8e   :  { %3581 = vmatpush.bf16.msra.mxu0 %v5131_v37  ;;  %v6827_v15 = vor.u32 %v7581_v13, %v6826_v11  ;;  %v7082_v16 = vld [vmem:[%s11656_s5 + $0xfc0] sm:$0xf] }
  0x8f   :  { %5052 = vmatmul.msk.f32.vlgmr.msrb.gmra.mxu0 %vm129_vm0, %v7738_v18  ;;  %5055 = vmatmul.msk.f32.vlgmr.msrb.gmra.mxu1 %vm129_vm0, %v7738_v18  ;;  %v6538_v22 = vld [vmem:[%s11656_s5 + $0xb80] sm:$0xf] }
  0x90   :  { %5058 = vmatmul.msk.f32.vlgmr.msrb.gmra.mxu2 %vm129_vm0, %v7738_v18  ;;  %5061 = vmatmul.msk.f32.vlgmr.msrb.gmra.mxu3 %vm129_vm0, %v7738_v18  ;;  %v5962_v18 = vld [vmem:[%s11656_s5 + $0x700] sm:$0xf] }
  0x91   :  { %v5963_v21 = vor.u32 %v7365_v20, %v5962_v18  ;;  %v7645_v18 = vld [vmem:[%s11656_s5 + $0xfdc] sm:$0xf0] }
  0x92   :  { %359 = vadd.xlane.f32.xlu2 %v358_v57  ;;  %3582 = vmatpush.bf16.msra.mxu0 %v5099_v49  ;;  %v5867_v57 = vor.u32 %v7341_v56, %v5866_v55  ;;  %v7083_v19 = vor.u32 %v7645_v18, %v7082_v16  ;;  %v6282_v20 = vld [vmem:[%s11656_s5 + $0x980] sm:$0xf] }
  0x93   :  { %3633 = vmatpush.bf16.msra.mxu3 %v5963_v21  ;;  %v7445_v21 = vld [vmem:[%s11656_s5 + $0x99c] sm:$0xf0] }
  0x94   :  { %v6283_v23 = vor.u32 %v7445_v21, %v6282_v20  ;;  %v6794_v25 = vld [vmem:[%s11656_s5 + $0xd80] sm:$0xf] }
  0x95   :  { %v6250_v32 = vld [vmem:[%s11656_s5 + $0x940] sm:$0xf] }
  0x96   :  { %v6762_v36 = vld [vmem:[%s11656_s5 + $0xd40] sm:$0xf] }
  0x97   :  { %5053 = vmatmul.msk.f32.gmra.mxu0 %vm129_vm0, %v5038_v24  ;;  %5056 = vmatmul.msk.f32.gmra.mxu1 %vm129_vm0, %v5038_v24  ;;  %v7565_v37 = vld [vmem:[%s11656_s5 + $0xd5c] sm:$0xf0] }
  0x98   :  { %5059 = vmatmul.msk.f32.gmra.mxu2 %vm129_vm0, %v5038_v24  ;;  %5062 = vmatmul.msk.f32.gmra.mxu3 %vm129_vm0, %v5038_v24  ;;  %v5418_v24 = vld [vmem:[%s11656_s5 + $0x2c0] sm:$0xf]  ;;  %v6763_v43 = vor.u32 %v7565_v37, %v6762_v36 }
  0x99   :  { %v5419_v29 = vor.u32 %v7229_v26, %v5418_v24  ;;  %3634 = vmatpush.bf16.msra.mxu3 %v5931_v33  ;;  %v7509_v24 = vld [vmem:[%s11656_s5 + $0xb9c] sm:$0xf0] }
  0x9a   :  { %372 = vadd.xlane.f32.xlu2 %v371_v59  ;;  %v7141_v59 = vld [vmem:[%s11656_s5 + $0x1c] sm:$0xf0] }
  0x9b   :  { %3598 = vmatpush.bf16.msra.mxu1 %v5419_v29  ;;  %v5067_v61 = vor.u32 %v7141_v59, %v5066_v58  ;;  %v7573_v26 = vld [vmem:[%s11656_s5 + $0xd9c] sm:$0xf0] }
  0x9c   :  { %v7050_v29 = vld [vmem:[%s11656_s5 + $0xf80] sm:$0xf] }
  0x9d   :  { %3635 = vmatpush.bf16.msra.mxu3 %v5899_v45  ;;  %3583 = vmatpush.bf16.msra.mxu0 %v5067_v61  ;;  %v7437_v33 = vld [vmem:[%s11656_s5 + $0x95c] sm:$0xf0] }
  0x9e   :  { %v6251_v38 = vor.u32 %v7437_v33, %v6250_v32  ;;  %v7018_v40 = vld [vmem:[%s11656_s5 + $0xf40] sm:$0xf] }
  0x9f   :  { %5054 = vmatmul.msk.f32.gmra.mxu0 %vm129_vm0, %v7756_v27  ;;  %5057 = vmatmul.msk.f32.gmra.mxu1 %vm129_vm0, %v7756_v27  ;;  %v8067_v45 = vld [vmem:[%s11657_s0 + $0x20] sm:$0xff] }
  0xa0   :  { %5060 = vmatmul.msk.f32.gmra.mxu2 %vm129_vm0, %v7756_v27  ;;  %5063 = vmatmul.msk.f32.gmra.mxu3 %vm129_vm0, %v7756_v27  ;;  %v5674_v27 = vld [vmem:[%s11656_s5 + $0x4c0] sm:$0xf]  ;;  %v47_v10 = vunpack.c.h.bf16 %v8067_v45 }
  0xa1   :  { %v5675_v30 = vor.u32 %v7293_v28, %v5674_v27  ;;  %3599 = vmatpush.bf16.msra.mxu1 %v5387_v41  ;;  %3636 = vmatpush.bf16.msra.mxu3 %v5867_v57  ;;  %v6539_v27 = vor.u32 %v7509_v24, %v6538_v22  ;;  %v6795_v28 = vor.u32 %v7573_v26, %v6794_v25  ;;  %v7629_v41 = vld [vmem:[%s11656_s5 + $0xf5c] sm:$0xf0]  ;;  %v31_v57 = vld [vmem:[%s11657_s0 + $0x28] sm:$0xff] }
  0xa2   :  { %3648 = vmatpush.bf16.msrb.mxu0 %v6315_v9  ;;  %v7019_v44 = vor.u32 %v7629_v41, %v7018_v40  ;;  %v8072_v46 = vld [vmem:[%s11658_s1 + $0x20] sm:$0xff]  ;;  %v41_v9 = vunpack.c.h.bf16 %v8077_v47  ;;  %v48_v13 = vunpack.c.l.bf16 %v31_v57 }
  0xa3   :  { %3616 = vmatpush.bf16.msra.mxu2 %v5675_v30  ;;  %v7637_v30 = vld [vmem:[%s11656_s5 + $0xf9c] sm:$0xf0]  ;;  %v11672_v6 = vunpack.c.l.bf16 %v8072_v46  ;;  %v11668_v11 = vunpack.c.h.bf16 %v8072_v46 }
  0xa4   :  { %v7051_v31 = vor.u32 %v7637_v30, %v7050_v29  ;;  %v6218_v48 = vld [vmem:[%s11656_s5 + $0x900] sm:$0xf]  ;;  %v11666_v29 = vunpack.c.l.bf16 %v8130_v8  ;;  %v11663_v30 = vunpack.c.h.bf16 %v8130_v8 }
  0xa5   :  { %3600 = vmatpush.bf16.msra.mxu1 %v5355_v53  ;;  %3637 = vmatpush.bf16.msra.mxu3 %v5835_v5  ;;  %v7429_v49 = vld [vmem:[%s11656_s5 + $0x91c] sm:$0xf0]  ;;  %v46_v5 = vunpack.c.l.bf16 %v8067_v45 }
  0xa6   :  { %3649 = vmatpush.bf16.msrb.mxu0 %v6283_v23  ;;  %v6474_v50 = vld [vmem:[%s11656_s5 + $0xb00] sm:$0xf]  ;;  %v6219_v51 = vor.u32 %v7429_v49, %v6218_v48 }
  0xa7   :  { %3617 = vmatpush.bf16.msra.mxu2 %v5643_v42  ;;  %v26_v42 = vld [vmem:[%s11657_s0] sm:$0xff] }
  0xa8   :  { %v7493_v52 = vld [vmem:[%s11656_s5 + $0xb1c] sm:$0xf0]  ;;  %v38_v62 = vunpack.c.l.bf16 %v26_v42  ;;  %v39_v63 = vunpack.c.h.bf16 %v26_v42 }
  0xa9   :  { %3601 = vmatpush.bf16.msra.mxu1 %v5323_v1  ;;  %3702 = vmatpush.bf16.msrb.mxu3 %v7083_v19  ;;  %v6730_v53 = vld [vmem:[%s11656_s5 + $0xd00] sm:$0xf]  ;;  %v6475_v58 = vor.u32 %v7493_v52, %v6474_v50 }
  0xaa   :  { %3650 = vmatpush.bf16.msrb.mxu0 %v6251_v38  ;;  %v7621_v61 = vld [vmem:[%s11656_s5 + $0xf1c] sm:$0xf0] }
  0xab   :  { %3618 = vmatpush.bf16.msra.mxu2 %v5611_v54  ;;  %v7557_v54 = vld [vmem:[%s11656_s5 + $0xd1c] sm:$0xf0]  ;;  %v6987_v3 = vor.u32 %v7621_v61, %v6986_v60 }
  0xac   :  { %v6731_v59 = vor.u32 %v7557_v54, %v6730_v53  ;;  %v8115_v1 = vld [vmem:[%s11658_s1] sm:$0xff] }
  0xad   :  { %3666 = vmatpush.bf16.msrb.mxu1 %v6571_v14  ;;  %3703 = vmatpush.bf16.msrb.mxu3 %v7051_v31  ;;  %v49_v14 = vunpack.c.h.bf16 %v31_v57  ;;  %v7421_v16 = vld [vmem:[%s11656_s5 + $0x8dc] sm:$0xf0]  ;;  %v11673_v20 = vunpack.c.l.bf16 %v8115_v1  ;;  %v11669_v21 = vunpack.c.h.bf16 %v8115_v1 }
  0xae   :  { %3651 = vmatpush.bf16.msrb.mxu0 %v6219_v51  ;;  %v6442_v18 = vld [vmem:[%s11656_s5 + $0xac0] sm:$0xf] }
  0xaf   :  { %3619 = vmatpush.bf16.msra.mxu2 %v5579_v2  ;;  %v8120_v2 = vld [vmem:[%s11658_s1 + $0x28] sm:$0xff]  ;;  %v7485_v24 = vld [vmem:[%s11656_s5 + $0xadc] sm:$0xf0] }
  0xb0   :  { %v11665_v22 = vunpack.c.l.bf16 %v8120_v2  ;;  %v11662_v23 = vunpack.c.h.bf16 %v8120_v2  ;;  %v6698_v25 = vld [vmem:[%s11656_s5 + $0xcc0] sm:$0xf]  ;;  %v6443_v35 = vor.u32 %v7485_v24, %v6442_v18 }
  0xb1   :  { %3667 = vmatpush.bf16.msrb.mxu1 %v6539_v27  ;;  %3704 = vmatpush.bf16.msrb.mxu3 %v7019_v44  ;;  %v7549_v26 = vld [vmem:[%s11656_s5 + $0xcdc] sm:$0xf0] }
  0xb2   :  { %v6954_v31 = vld [vmem:[%s11656_s5 + $0xec0] sm:$0xf]  ;;  %v6699_v36 = vor.u32 %v7549_v26, %v6698_v25 }
  0xb3   :  { %3684 = vmatpush.bf16.msrb.mxu2 %v6827_v15  ;;  %v6186_v15 = vld [vmem:[%s11656_s5 + $0x8c0] sm:$0xf] }
  0xb4   :  { %v7613_v32 = vld [vmem:[%s11656_s5 + $0xedc] sm:$0xf0]  ;;  %v6187_v34 = vor.u32 %v7421_v16, %v6186_v15 }
  0xb5   :  { %3668 = vmatpush.bf16.msrb.mxu1 %v6507_v39  ;;  %3705 = vmatpush.bf16.msrb.mxu3 %v6987_v3  ;;  %v6955_v42 = vor.u32 %v7613_v32, %v6954_v31  ;;  %v6154_v61 = vld [vmem:[%s11656_s5 + $0x880] sm:$0xf] }
  0xb6   :  { %3652 = vmatpush.bf16.msrb.mxu0 %v6187_v34  ;;  %v6922_v25 = vld [vmem:[%s11656_s5 + $0xe80] sm:$0xf] }
  0xb7   :  { %3685 = vmatpush.bf16.msrb.mxu2 %v6795_v28  ;;  %v7605_v32 = vld [vmem:[%s11656_s5 + $0xe9c] sm:$0xf0] }
  0xb8   :  { %v7405_v34 = vld [vmem:[%s11656_s5 + $0x85c] sm:$0xf0] }
  0xb9   :  { %3669 = vmatpush.bf16.msrb.mxu1 %v6475_v58  ;;  %3706 = vmatpush.bf16.msrb.mxu3 %v6955_v42 }
  0xbb   :  { %3686 = vmatpush.bf16.msrb.mxu2 %v6763_v43 }
  0xbd   :  { %3670 = vmatpush.bf16.msrb.mxu1 %v6443_v35 }
  0xbf   :  { %3687 = vmatpush.bf16.msrb.mxu2 %v6731_v59 }
  0xc3   :  { %3688 = vmatpush.bf16.msrb.mxu2 %v6699_v36 }
  0xed   :  { %v8122_v4 = vpop.xlane.xlu1 %353 }
  0xee   :  { %v374_v27 = vmul.f32 %v8122_v4, %v38_v62  ;;  %v375_v28 = vmul.f32 %v8122_v4, %v39_v63  ;;  %v376_v43 = vmul.f32 %v8122_v4, %v40_v7  ;;  %v377_v45 = vmul.f32 %v8122_v4, %v41_v9  ;;  %v7413_v62 = vld [vmem:[%s11656_s5 + $0x89c] sm:$0xf0] }
  0xef   :  { %v6410_v63 = vld [vmem:[%s11656_s5 + $0xa80] sm:$0xf] }
  0xf4   :  { %v8097_v55 = vpop.f32.mrf.mxu0  ;;  %v8099_v56 = vpop.f32.mrf.mxu1 }
  0xf5   :  { %v8110_v0 = vpop.xlane.xlu2 %356  ;;  %v8144_v19 = vpop.xlane.xlu0 %369 }
  0xf6   :  { %v382_v33 = vmul.f32 %v8110_v0, %v46_v5  ;;  %v406_v39 = vmul.f32 %v8144_v19, %v11672_v6  ;;  %v383_v40 = vmul.f32 %v8110_v0, %v47_v10  ;;  %v407_v41 = vmul.f32 %v8144_v19, %v11668_v11  ;;  %v7477_v10 = vld [vmem:[%s11656_s5 + $0xa9c] sm:$0xf0] }
  0xf7   :  { %v384_v44 = vmul.f32 %v8110_v0, %v48_v13  ;;  %v408_v48 = vmul.f32 %v8144_v19, %v11665_v22  ;;  %v385_v49 = vmul.f32 %v8110_v0, %v49_v14  ;;  %v409_v50 = vmul.f32 %v8144_v19, %v11662_v23  ;;  %v6666_v13 = vld [vmem:[%s11656_s5 + $0xc80] sm:$0xf] }
  0xf8   :  { %v430_v59 = vadd.f32 %v406_v39, %v382_v33  ;;  %v431_v60 = vadd.f32 %v407_v41, %v383_v40  ;;  %v7541_v14 = vld [vmem:[%s11656_s5 + $0xc9c] sm:$0xf0]  ;;  %v6155_v39 = vor.u32 %v7413_v62, %v6154_v61 }
  0xf9   :  { %v432_v18 = vadd.f32 %v408_v48, %v384_v44  ;;  %v433_v24 = vadd.f32 %v409_v50, %v385_v49  ;;  %v6122_v33 = vld [vmem:[%s11656_s5 + $0x840] sm:$0xf]  ;;  %v6667_v40 = vor.u32 %v7541_v14, %v6666_v13  ;;  %v6923_v50 = vor.u32 %v7605_v32, %v6922_v25  ;;  %v7193_v32 = vld [vmem:[%s11656_s5 + $0x1c4] sm:$0xf] }
  0xfa   :  { %v34_v44 = vld [vmem:[%s11657_s0 + $0x40] sm:$0xff]  ;;  %3653 = vmatpush.bf16.msrb.mxu0 %v6155_v39 }
  0xfb   :  { %v208_v37 = vpop.f32.mrf.mxu2  ;;  %v234_v38 = vpop.f32.mrf.mxu3  ;;  %v8254_v48 = vld [vmem:[%s11658_s1 + $0x40] sm:$0xff]  ;;  %3689 = vmatpush.bf16.msrb.mxu2 %v6667_v40  ;;  %3707 = vmatpush.bf16.msrb.mxu3 %v6923_v50 }
  0xfc   :  { %v159_v51 = vpop.f32.mrf.mxu0  ;;  %v185_v52 = vpop.f32.mrf.mxu1  ;;  %v6090_v61 = vld [vmem:[%s11656_s5 + $0x800] sm:$0xf]  ;;  %v7257_v40 = vld [vmem:[%s11656_s5 + $0x3c4] sm:$0xf] }
  0xfd   :  { %v8180_v47 = vpop.xlane.xlu2 %366  ;;  %v454_v15 = vadd.f32 %v430_v59, %v159_v51  ;;  %v455_v16 = vadd.f32 %v431_v60, %v185_v52  ;;  %v6123_v51 = vor.u32 %v7405_v34, %v6122_v33  ;;  %v6634_v52 = vld [vmem:[%s11656_s5 + $0xc40] sm:$0xf]  ;;  %v5292_v33 = vld [vmem:[%s11656_s5 + $0x1e0] sm:$0xf0]  ;;  %v11667_v34 = vunpack.c.h.bf16 %v8254_v48 }
  0xfe   :  { %v398_v53 = vmul.f32 %v8180_v47, %v11673_v20  ;;  %v399_v54 = vmul.f32 %v8180_v47, %v11669_v21  ;;  %v400_v57 = vmul.f32 %v8180_v47, %v11666_v29  ;;  %v401_v58 = vmul.f32 %v8180_v47, %v11663_v30  ;;  %v7597_v60 = vld [vmem:[%s11656_s5 + $0xe5c] sm:$0xf0]  ;;  %v7385_v50 = vld [vmem:[%s11656_s5 + $0x7c4] sm:$0xf] }
  0xff   :  { %v7397_v62 = vld [vmem:[%s11656_s5 + $0x81c] sm:$0xf0]  ;;  %3654 = vmatpush.bf16.msrb.mxu0 %v6123_v51 }
 0x100   :  { %v422_v3 = vadd.f32 %v398_v53, %v374_v27  ;;  %v423_v5 = vadd.f32 %v399_v54, %v375_v28  ;;  %v424_v7 = vadd.f32 %v400_v57, %v376_v43  ;;  %v425_v9 = vadd.f32 %v401_v58, %v377_v45  ;;  %v8249_v45 = vld [vmem:[%s11657_s0 + $0x48] sm:$0xff]  ;;  %v7533_v53 = vld [vmem:[%s11656_s5 + $0xc5c] sm:$0xf0] }
 0x101   :  { %v6890_v54 = vld [vmem:[%s11656_s5 + $0xe40] sm:$0xf]  ;;  %v56_v13 = vunpack.c.l.bf16 %v8249_v45  ;;  %v6635_v14 = vor.u32 %v7533_v53, %v6634_v52  ;;  %v57_v25 = vunpack.c.h.bf16 %v8249_v45  ;;  %v5804_v45 = vld [vmem:[%s11656_s5 + $0x5e0] sm:$0xf0] }
 0x102   :  { %v446_v26 = vadd.f32 %v422_v3, %v8097_v55  ;;  %v447_v27 = vadd.f32 %v423_v5, %v8099_v56  ;;  %v448_v28 = vadd.f32 %v424_v7, %v208_v37  ;;  %v449_v31 = vadd.f32 %v425_v9, %v234_v38  ;;  %v6378_v56 = vld [vmem:[%s11656_s5 + $0xa40] sm:$0xf]  ;;  %v8298_v7 = vld [vmem:[%s11657_s0 + $0x10] sm:$0xff] }
 0x103   :  { %v211_v35 = vpop.f32.mrf.mxu2  ;;  %v237_v36 = vpop.f32.mrf.mxu3  ;;  %v6411_v55 = vor.u32 %v7477_v10, %v6410_v63  ;;  %v7469_v37 = vld [vmem:[%s11656_s5 + $0xa5c] sm:$0xf0]  ;;  %v8285_v63 = vld [vmem:[%s11658_s1 + $0x48] sm:$0xff]  ;;  %v54_v9 = vunpack.c.l.bf16 %v34_v44  ;;  %v55_v10 = vunpack.c.h.bf16 %v34_v44  ;;  %3690 = vmatpush.bf16.msrb.mxu2 %v6635_v14  ;;  %v7321_v44 = vld [vmem:[%s11656_s5 + $0x5c4] sm:$0xf] }
 0x104   :  { %v8239_v38 = vpack.c.bf16 %v454_v15, %v446_v26  ;;  %v8241_v41 = vpack.c.bf16 %v455_v16, %v447_v27  ;;  %v456_v42 = vadd.f32 %v432_v18, %v211_v35  ;;  %v457_v43 = vadd.f32 %v433_v24, %v237_v36  ;;  %v6346_v3 = vld [vmem:[%s11656_s5 + $0xa00] sm:$0xf]  ;;  %v8307_v18 = vpop.f32.mrf.mxu0  ;;  %v8309_v24 = vpop.f32.mrf.mxu1 }
 0x105   :  { %v8256_v49 = vpop.xlane.xlu2 %359  ;;  %3671 = vmatpush.bf16.msrb.mxu1 %v6411_v55  ;;  %v6379_v59 = vor.u32 %v7469_v37, %v6378_v56  ;;  %v7461_v5 = vld [vmem:[%s11656_s5 + $0xa1c] sm:$0xf0]  ;;  %v11671_v26 = vunpack.c.l.bf16 %v8254_v48  ;;  %v6891_v27 = vor.u32 %v7597_v60, %v6890_v54  ;;  %v11664_v35 = vunpack.c.l.bf16 %v8285_v63  ;;  %v5548_v56 = vld [vmem:[%s11656_s5 + $0x3e0] sm:$0xf0] }
 0x106   :  { %v8267_v57 = vpack.c.bf16 %v456_v42, %v448_v28  ;;  %v8269_v58 = vpack.c.bf16 %v457_v43, %v449_v31  ;;  %3584 = vmatmul.bf16.vlgmr.msra.gmra.mxu0 %v8239_v38  ;;  %3602 = vmatmul.bf16.vlgmr.msra.gmra.mxu1 %v8241_v41  ;;  %v6602_v15 = vld [vmem:[%s11656_s5 + $0xc00] sm:$0xf]  ;;  %v6091_v28 = vor.u32 %v7397_v62, %v6090_v61  ;;  %v11661_v36 = vunpack.c.h.bf16 %v8285_v63  ;;  %v7185_v60 = vld [vmem:[%s11656_s5 + $0x184] sm:$0xf] }
 0x107   :  { %v7525_v16 = vld [vmem:[%s11656_s5 + $0xc1c] sm:$0xf0]  ;;  %v6347_v39 = vor.u32 %v7461_v5, %v6346_v3  ;;  %v390_v51 = vmul.f32 %v8256_v49, %v54_v9  ;;  %v391_v52 = vmul.f32 %v8256_v49, %v55_v10  ;;  %v392_v53 = vmul.f32 %v8256_v49, %v56_v13  ;;  %v5260_v61 = vld [vmem:[%s11656_s5 + $0x1a0] sm:$0xf0]  ;;  %3708 = vmatpush.bf16.msrb.mxu3 %v6891_v27  ;;  %v8379_v27 = vld [vmem:[%s11657_s0 + $0x30] sm:$0xff] }
 0x108   :  { %3620 = vmatmul.bf16.vlgmr.msra.gmra.mxu2 %v8267_v57  ;;  %3638 = vmatmul.bf16.vlgmr.msra.gmra.mxu3 %v8269_v58  ;;  %v6858_v31 = vld [vmem:[%s11656_s5 + $0xe00] sm:$0xf]  ;;  %v6603_v43 = vor.u32 %v7525_v16, %v6602_v15  ;;  %v5295_v54 = vor.u32 %v7193_v32, %v5292_v33  ;;  %v42_v62 = vunpack.c.l.bf16 %v8298_v7  ;;  %v393_v5 = vmul.f32 %v8256_v49, %v57_v25  ;;  %v8374_v25 = vld [vmem:[%s11657_s0 + $0x18] sm:$0xff] }
 0x109   :  { %3672 = vmatpush.bf16.msrb.mxu1 %v6379_v59  ;;  %v7589_v55 = vld [vmem:[%s11656_s5 + $0xe1c] sm:$0xf0]  ;;  %v6060_v59 = vld [vmem:[%s11656_s5 + $0x7e0] sm:$0xf0]  ;;  %3655 = vmatpush.bf16.msrb.mxu0 %v6091_v28  ;;  %v5551_v10 = vor.u32 %v7257_v40, %v5548_v56  ;;  %v8384_v28 = vld [vmem:[%s11658_s1 + $0x30] sm:$0xff]  ;;  %v5807_v32 = vor.u32 %v7321_v44, %v5804_v45  ;;  %v44_v44 = vunpack.c.l.bf16 %v8374_v25  ;;  %v45_v45 = vunpack.c.h.bf16 %v8374_v25 }
 0x10a   :  { %v6859_v9 = vor.u32 %v7589_v55, %v6858_v31  ;;  %v43_v31 = vunpack.c.h.bf16 %v8298_v7  ;;  %3691 = vmatpush.bf16.msrb.mxu2 %v6603_v43  ;;  %v6063_v33 = vor.u32 %v7385_v50, %v6060_v59  ;;  %v5263_v55 = vor.u32 %v7185_v60, %v5260_v61  ;;  %v7249_v40 = vld [vmem:[%s11656_s5 + $0x384] sm:$0xf] }
 0x10b   :  { %v214_v37 = vpop.f32.mrf.mxu2  ;;  %v240_v42 = vpop.f32.mrf.mxu3  ;;  %v5772_v43 = vld [vmem:[%s11656_s5 + $0x5a0] sm:$0xf0]  ;;  %v50_v50 = vunpack.c.l.bf16 %v8379_v27  ;;  %v378_v29 = vmul.f32 %v8122_v4, %v42_v62  ;;  %v380_v6 = vmul.f32 %v8122_v4, %v44_v44 }
 0x10c   :  { %3709 = vmatpush.bf16.msrb.mxu3 %v6859_v9  ;;  %v7177_v9 = vld [vmem:[%s11656_s5 + $0x144] sm:$0xf] }
 0x10d   :  { %v8356_v3 = vpop.xlane.xlu2 %372  ;;  %3673 = vmatpush.bf16.msrb.mxu1 %v6347_v39  ;;  %3720 = vmatpush.bf16.msra.mxu0 %v5295_v54  ;;  %v7313_v39 = vld [vmem:[%s11656_s5 + $0x584] sm:$0xf]  ;;  %v386_v20 = vmul.f32 %v8110_v0, %v50_v50 }
 0x10e   :  { %v414_v13 = vmul.f32 %v8356_v3, %v11671_v26  ;;  %v415_v14 = vmul.f32 %v8356_v3, %v11667_v34  ;;  %v416_v15 = vmul.f32 %v8356_v3, %v11664_v35  ;;  %v417_v16 = vmul.f32 %v8356_v3, %v11661_v36  ;;  %v5516_v35 = vld [vmem:[%s11656_s5 + $0x3a0] sm:$0xf0]  ;;  %3756 = vmatpush.bf16.msra.mxu2 %v5807_v32 }
 0x10f   :  { %v5484_v32 = vld [vmem:[%s11656_s5 + $0x360] sm:$0xf0] }
 0x110   :  { %v438_v56 = vadd.f32 %v414_v13, %v390_v51  ;;  %v439_v36 = vadd.f32 %v415_v14, %v391_v52  ;;  %v440_v23 = vadd.f32 %v416_v15, %v392_v53  ;;  %v441_v30 = vadd.f32 %v417_v16, %v393_v5  ;;  %v8406_v52 = vld [vmem:[%s11657_s0 + $0x38] sm:$0xff]  ;;  %v8411_v53 = vld [vmem:[%s11656_s5 + $0x784] sm:$0xf]  ;;  %3774 = vmatpush.bf16.msra.mxu3 %v6063_v33 }
 0x111   :  { %v11674_v51 = vunpack.c.l.bf16 %v8384_v28  ;;  %3738 = vmatpush.bf16.msra.mxu1 %v5551_v10  ;;  %v6028_v5 = vld [vmem:[%s11656_s5 + $0x7a0] sm:$0xf0]  ;;  %v5775_v10 = vor.u32 %v7313_v39, %v5772_v43  ;;  %3721 = vmatpush.bf16.msra.mxu0 %v5263_v55  ;;  %v52_v43 = vunpack.c.l.bf16 %v8406_v52 }
 0x112   :  { %v462_v54 = vadd.f32 %v438_v56, %v8307_v18  ;;  %v463_v59 = vadd.f32 %v439_v36, %v8309_v24  ;;  %v464_v60 = vadd.f32 %v440_v23, %v214_v37  ;;  %v465_v61 = vadd.f32 %v441_v30, %v240_v42  ;;  %v5228_v13 = vld [vmem:[%s11656_s5 + $0x160] sm:$0xf0]  ;;  %v8427_v18 = vld [vmem:[%s11658_s1 + $0x10] sm:$0xff]  ;;  %v8429_v23 = vpop.f32.mrf.mxu0  ;;  %v8431_v30 = vpop.f32.mrf.mxu1  ;;  %v8438_v37 = vld [vmem:[%s11658_s1 + $0x38] sm:$0xff] }
 0x113   :  { %v51_v24 = vunpack.c.h.bf16 %v8379_v27  ;;  %v11677_v36 = vunpack.c.h.bf16 %v8384_v28  ;;  %v5519_v42 = vor.u32 %v7249_v40, %v5516_v35  ;;  %v7241_v14 = vld [vmem:[%s11656_s5 + $0x344] sm:$0xf]  ;;  %v8463_v40 = vld [vmem:[%s11658_s1 + $0x18] sm:$0xff]  ;;  %v8465_v39 = vpop.f32.mrf.mxu2  ;;  %v8467_v55 = vpop.f32.mrf.mxu3  ;;  %v11678_v22 = vunpack.c.l.bf16 %v8427_v18  ;;  %3757 = vmatpush.bf16.msra.mxu2 %v5775_v10 }
 0x114   :  { %v8443_v15 = vpack.c.bf16 %v462_v54, %v462_v54  ;;  %v8445_v16 = vpack.c.bf16 %v463_v59, %v463_v59  ;;  %v8447_v27 = vpack.c.bf16 %v464_v60, %v464_v60  ;;  %v8449_v56 = vpack.c.bf16 %v465_v61, %v465_v61  ;;  %v7305_v35 = vld [vmem:[%s11656_s5 + $0x544] sm:$0xf] }
 0x115   :  { %v5740_v33 = vld [vmem:[%s11656_s5 + $0x560] sm:$0xf0]  ;;  %v53_v54 = vunpack.c.h.bf16 %v8406_v52  ;;  %v6031_v59 = vor.u32 %v8411_v53, %v6028_v5  ;;  %v5231_v60 = vor.u32 %v7177_v9, %v5228_v13  ;;  %v11676_v34 = vunpack.c.l.bf16 %v8438_v37  ;;  %3739 = vmatpush.bf16.msra.mxu1 %v5519_v42 }
 0x116   :  { %v7369_v61 = vld [vmem:[%s11656_s5 + $0x744] sm:$0xf]  ;;  %3589 = vmatmul.bf16.gmra.mxu0 %v8443_v15  ;;  %3607 = vmatmul.bf16.gmra.mxu1 %v8445_v16  ;;  %v11679_v52 = vunpack.c.h.bf16 %v8438_v37  ;;  %v11681_v9 = vunpack.c.h.bf16 %v8427_v18  ;;  %v379_v13 = vmul.f32 %v8122_v4, %v43_v31  ;;  %v5487_v11 = vor.u32 %v7241_v14, %v5484_v32 }
 0x117   :  { %v5996_v53 = vld [vmem:[%s11656_s5 + $0x760] sm:$0xf0]  ;;  %v5743_v21 = vor.u32 %v7305_v35, %v5740_v33  ;;  %v11680_v26 = vunpack.c.l.bf16 %v8463_v40  ;;  %v410_v7 = vmul.f32 %v8144_v19, %v11674_v51  ;;  %v11683_v50 = vunpack.c.h.bf16 %v8463_v40  ;;  %3775 = vmatpush.bf16.msra.mxu3 %v6031_v59  ;;  %3722 = vmatpush.bf16.msra.mxu0 %v5231_v60 }
 0x118   :  { %v7169_v5 = vld [vmem:[%s11656_s5 + $0x104] sm:$0xf]  ;;  %3625 = vmatmul.bf16.gmra.mxu2 %v8447_v27  ;;  %3643 = vmatmul.bf16.gmra.mxu3 %v8449_v56  ;;  %v387_v10 = vmul.f32 %v8110_v0, %v51_v24  ;;  %v5999_v14 = vor.u32 %v7369_v61, %v5996_v53  ;;  %v402_v33 = vmul.f32 %v8180_v47, %v11678_v22 }
 0x119   :  { %v5196_v62 = vld [vmem:[%s11656_s5 + $0x120] sm:$0xf0]  ;;  %v411_v51 = vmul.f32 %v8144_v19, %v11677_v36  ;;  %v388_v12 = vmul.f32 %v8110_v0, %v52_v43  ;;  %v412_v24 = vmul.f32 %v8144_v19, %v11676_v34  ;;  %v403_v43 = vmul.f32 %v8180_v47, %v11681_v9  ;;  %3740 = vmatpush.bf16.msra.mxu1 %v5487_v11 }
 0x11a   :  { %v5452_v31 = vld [vmem:[%s11656_s5 + $0x320] sm:$0xf0]  ;;  %v5199_v32 = vor.u32 %v7169_v5, %v5196_v62  ;;  %3758 = vmatpush.bf16.msra.mxu2 %v5743_v21  ;;  %v404_v34 = vmul.f32 %v8180_v47, %v11680_v26  ;;  %v381_v36 = vmul.f32 %v8122_v4, %v45_v45  ;;  %v389_v22 = vmul.f32 %v8110_v0, %v53_v54  ;;  %v263_v4 = vpop.f32.mrf.mxu0  ;;  %v289_v45 = vpop.f32.mrf.mxu1 }
 0x11b   :  { %v7297_v42 = vld [vmem:[%s11656_s5 + $0x504] sm:$0xf]  ;;  %v5455_v53 = vor.u32 %v7233_v17, %v5452_v31  ;;  %v413_v11 = vmul.f32 %v8144_v19, %v11679_v52  ;;  %v405_v0 = vmul.f32 %v8180_v47, %v11683_v50  ;;  %3776 = vmatpush.bf16.msra.mxu3 %v5999_v14  ;;  %v435_v52 = vadd.f32 %v411_v51, %v387_v10 }
 0x11c   :  { %v5708_v44 = vld [vmem:[%s11656_s5 + $0x520] sm:$0xf0]  ;;  %3723 = vmatpush.bf16.msra.mxu0 %v5199_v32  ;;  %v436_v26 = vadd.f32 %v412_v24, %v388_v12  ;;  %v427_v32 = vadd.f32 %v403_v43, %v379_v13  ;;  %v428_v51 = vadd.f32 %v404_v34, %v380_v6  ;;  %v8595_v6 = vld [vmem:[%s11657_s0 + $0x50] sm:$0xff] }
 0x11d   :  { %v7361_v35 = vld [vmem:[%s11656_s5 + $0x704] sm:$0xf]  ;;  %v5711_v5 = vor.u32 %v7297_v42, %v5708_v44  ;;  %v426_v42 = vadd.f32 %v402_v33, %v378_v29  ;;  %v434_v44 = vadd.f32 %v410_v7, %v386_v20  ;;  %3741 = vmatpush.bf16.msra.mxu1 %v5455_v53  ;;  %v459_v10 = vadd.f32 %v435_v52, %v289_v45 }
 0x11e   :  { %v5964_v59 = vld [vmem:[%s11656_s5 + $0x720] sm:$0xf0]  ;;  %v437_v33 = vadd.f32 %v413_v11, %v389_v22  ;;  %v8600_v22 = vld [vmem:[%s11658_s1 + $0x50] sm:$0xff]  ;;  %v451_v53 = vadd.f32 %v427_v32, %v8431_v30 }
 0x11f   :  { %v7161_v60 = vld [vmem:[%s11656_s5 + $0xc4] sm:$0xf]  ;;  %v5967_v19 = vor.u32 %v7361_v35, %v5964_v59  ;;  %v315_v35 = vpop.f32.mrf.mxu2  ;;  %v341_v59 = vpop.f32.mrf.mxu3  ;;  %3759 = vmatpush.bf16.msra.mxu2 %v5711_v5  ;;  %v458_v7 = vadd.f32 %v434_v44, %v263_v4 }
 0x120   :  { %v5164_v61 = vld [vmem:[%s11656_s5 + $0xe0] sm:$0xf0]  ;;  %v460_v5 = vadd.f32 %v436_v26, %v315_v35  ;;  %v8628_v45 = vpack.c.bf16 %v459_v10, %v451_v53 }
 0x121   :  { %v7225_v62 = vld [vmem:[%s11656_s5 + $0x2c4] sm:$0xf]  ;;  %v5167_v54 = vor.u32 %v7161_v60, %v5164_v61  ;;  %v429_v61 = vadd.f32 %v405_v0, %v381_v36  ;;  %3777 = vmatpush.bf16.msra.mxu3 %v5967_v19  ;;  %v450_v36 = vadd.f32 %v426_v42, %v8429_v23  ;;  %v8619_v23 = vld [vmem:[%s11658_s1 + $0x58] sm:$0xff] }
 0x122   :  { %v5420_v17 = vld [vmem:[%s11656_s5 + $0x2e0] sm:$0xf0]  ;;  %v8644_v42 = vld [vmem:[%s11657_s0 + $0x58] sm:$0xff]  ;;  %v11682_v10 = vunpack.c.h.bf16 %v8619_v23 }
 0x123   :  { %v7289_v21 = vld [vmem:[%s11656_s5 + $0x4c4] sm:$0xf]  ;;  %v5423_v20 = vor.u32 %v7225_v62, %v5420_v17  ;;  %3724 = vmatpush.bf16.msra.mxu0 %v5167_v54  ;;  %v461_v62 = vadd.f32 %v437_v33, %v341_v59  ;;  %v453_v0 = vadd.f32 %v429_v61, %v8467_v55  ;;  %v8626_v4 = vpack.c.bf16 %v458_v7, %v450_v36 }
 0x124   :  { %v5676_v25 = vld [vmem:[%s11656_s5 + $0x4e0] sm:$0xf0]  ;;  %v94_v55 = vunpack.c.l.bf16 %v8600_v22 }
 0x125   :  { %v7353_v31 = vld [vmem:[%s11656_s5 + $0x6c4] sm:$0xf]  ;;  %v5679_v29 = vor.u32 %v7289_v21, %v5676_v25  ;;  %3742 = vmatpush.bf16.msra.mxu1 %v5423_v20  ;;  %v452_v25 = vadd.f32 %v428_v51, %v8465_v39  ;;  %v58_v39 = vunpack.c.l.bf16 %v8595_v6  ;;  %v8654_v59 = vpack.c.bf16 %v461_v62, %v453_v0 }
 0x126   :  { %v5932_v9 = vld [vmem:[%s11656_s5 + $0x6e0] sm:$0xf0]  ;;  %v95_v20 = vunpack.c.h.bf16 %v8600_v22  ;;  %3656 = vmatmul.bf16.vlgmr.msrb.gmra.mxu0 %v8626_v4  ;;  %3674 = vmatmul.bf16.vlgmr.msrb.gmra.mxu1 %v8628_v45 }
 0x127   :  { %v7153_v47 = vld [vmem:[%s11656_s5 + $0x84] sm:$0xf]  ;;  %v5935_v34 = vor.u32 %v7353_v31, %v5932_v9  ;;  %3760 = vmatpush.bf16.msra.mxu2 %v5679_v29  ;;  %v8652_v35 = vpack.c.bf16 %v460_v5, %v452_v25  ;;  %v96_v29 = vunpack.c.l.bf16 %v8619_v23  ;;  %v61_v5 = vunpack.c.h.bf16 %v8644_v42 }
 0x128   :  { %v5132_v14 = vld [vmem:[%s11656_s5 + $0xa0] sm:$0xf0]  ;;  %3710 = vmatmul.bf16.vlgmr.msrb.gmra.mxu3 %v8654_v59 }
 0x129   :  { %v7217_v12 = vld [vmem:[%s11656_s5 + $0x284] sm:$0xf]  ;;  %v5135_v52 = vor.u32 %v7153_v47, %v5132_v14  ;;  %3778 = vmatpush.bf16.msra.mxu3 %v5935_v34  ;;  %v59_v34 = vunpack.c.h.bf16 %v8595_v6  ;;  %3692 = vmatmul.bf16.vlgmr.msrb.gmra.mxu2 %v8652_v35  ;;  %v418_v6 = vmul.f32 %v8356_v3, %v94_v55  ;;  %v420_v25 = vmul.f32 %v8356_v3, %v96_v29 }
 0x12a   :  { %v5388_v24 = vld [vmem:[%s11656_s5 + $0x2a0] sm:$0xf0] }
 0x12b   :  { %v7281_v13 = vld [vmem:[%s11656_s5 + $0x484] sm:$0xf]  ;;  %v5391_v26 = vor.u32 %v7217_v12, %v5388_v24  ;;  %3725 = vmatpush.bf16.msra.mxu0 %v5135_v52  ;;  %v60_v52 = vunpack.c.l.bf16 %v8644_v42 }
 0x12c   :  { %v5644_v60 = vld [vmem:[%s11656_s5 + $0x4a0] sm:$0xf0] }
 0x12d   :  { %v7345_v43 = vld [vmem:[%s11656_s5 + $0x684] sm:$0xf]  ;;  %v5647_v30 = vor.u32 %v7281_v13, %v5644_v60  ;;  %3743 = vmatpush.bf16.msra.mxu1 %v5391_v26 }
 0x12e   :  { %v5900_v11 = vld [vmem:[%s11656_s5 + $0x6a0] sm:$0xf0] }
 0x12f   :  { %v7145_v17 = vld [vmem:[%s11656_s5 + $0x44] sm:$0xf]  ;;  %v5903_v44 = vor.u32 %v7345_v43, %v5900_v11  ;;  %3761 = vmatpush.bf16.msra.mxu2 %v5647_v30  ;;  %v394_v30 = vmul.f32 %v8256_v49, %v58_v39  ;;  %v421_v39 = vmul.f32 %v8356_v3, %v11682_v10 }
 0x130   :  { %v5100_v9 = vld [vmem:[%s11656_s5 + $0x60] sm:$0xf0] }
 0x131   :  { %v7209_v21 = vld [vmem:[%s11656_s5 + $0x244] sm:$0xf]  ;;  %v5103_v47 = vor.u32 %v7145_v17, %v5100_v9  ;;  %3779 = vmatpush.bf16.msra.mxu3 %v5903_v44 }
 0x132   :  { %v5356_v19 = vld [vmem:[%s11656_s5 + $0x260] sm:$0xf0] }
 0x133   :  { %v7273_v54 = vld [vmem:[%s11656_s5 + $0x444] sm:$0xf]  ;;  %v5359_v33 = vor.u32 %v7209_v21, %v5356_v19  ;;  %3726 = vmatpush.bf16.msra.mxu0 %v5103_v47  ;;  %v419_v21 = vmul.f32 %v8356_v3, %v95_v20  ;;  %v395_v3 = vmul.f32 %v8256_v49, %v59_v34 }
 0x134   :  { %v5612_v31 = vld [vmem:[%s11656_s5 + $0x460] sm:$0xf0] }
 0x135   :  { %v7337_v14 = vld [vmem:[%s11656_s5 + $0x644] sm:$0xf]  ;;  %v5615_v24 = vor.u32 %v7273_v54, %v5612_v31  ;;  %3744 = vmatpush.bf16.msra.mxu1 %v5359_v33 }
 0x136   :  { %v5868_v32 = vld [vmem:[%s11656_s5 + $0x660] sm:$0xf0] }
 0x137   :  { %v7137_v12 = vld [vmem:[%s11656_s5 + $0x4] sm:$0xf]  ;;  %v5871_v62 = vor.u32 %v7337_v14, %v5868_v32  ;;  %3762 = vmatpush.bf16.msra.mxu2 %v5615_v24 }
 0x138   :  { %v5068_v51 = vld [vmem:[%s11656_s5 + $0x20] sm:$0xf0] }
 0x139   :  { %v8669_v7 = vld [vmem:[%s11656_s5 + $0x204] sm:$0xf]  ;;  %v5071_v11 = vor.u32 %v7137_v12, %v5068_v51  ;;  %v266_v12 = vpop.f32.mrf.mxu0  ;;  %v396_v51 = vmul.f32 %v8256_v49, %v60_v52  ;;  %3780 = vmatpush.bf16.msra.mxu3 %v5871_v62 }
 0x13a   :  { %v5324_v13 = vld [vmem:[%s11656_s5 + $0x220] sm:$0xf0] }
 0x13b   :  { %v7265_v60 = vld [vmem:[%s11656_s5 + $0x404] sm:$0xf]  ;;  %v5327_v42 = vor.u32 %v8669_v7, %v5324_v13  ;;  %v442_v13 = vadd.f32 %v418_v6, %v394_v30  ;;  %3727 = vmatpush.bf16.msra.mxu0 %v5071_v11  ;;  %v444_v62 = vadd.f32 %v420_v25, %v396_v51  ;;  %v344_v11 = vpop.f32.mrf.mxu3 }
 0x13c   :  { %v5580_v61 = vld [vmem:[%s11656_s5 + $0x420] sm:$0xf0] }
 0x13d   :  { %v7449_v43 = vld [vmem:[%s11656_s5 + $0x9c4] sm:$0xf]  ;;  %v5583_v44 = vor.u32 %v7265_v60, %v5580_v61  ;;  %v292_v60 = vpop.f32.mrf.mxu1  ;;  %v397_v61 = vmul.f32 %v8256_v49, %v61_v5  ;;  %v466_v49 = vadd.f32 %v442_v13, %v266_v12  ;;  %v318_v5 = vpop.f32.mrf.mxu2  ;;  %3745 = vmatpush.bf16.msra.mxu1 %v5327_v42 }
 0x13e   :  { %v6316_v36 = vld [vmem:[%s11656_s5 + $0x9e0] sm:$0xf0] }
 0x13f   :  { %v7513_v53 = vld [vmem:[%s11656_s5 + $0xbc4] sm:$0xf]  ;;  %v6319_v54 = vor.u32 %v7449_v43, %v6316_v36  ;;  %3763 = vmatpush.bf16.msra.mxu2 %v5583_v44  ;;  %v8778_v51 = vpack.c.bf16 %v466_v49, %v466_v49 }
 0x140   :  { %v6572_v17 = vld [vmem:[%s11656_s5 + $0xbe0] sm:$0xf0] }
 0x141   :  { %v7577_v9 = vld [vmem:[%s11656_s5 + $0xdc4] sm:$0xf]  ;;  %v6575_v33 = vor.u32 %v7513_v53, %v6572_v17  ;;  %v443_v53 = vadd.f32 %v419_v21, %v395_v3  ;;  %3792 = vmatpush.bf16.msrb.mxu0 %v6319_v54 }
 0x142   :  { %v6828_v26 = vld [vmem:[%s11656_s5 + $0xde0] sm:$0xf0]  ;;  %3661 = vmatmul.bf16.gmra.mxu0 %v8778_v51 }
 0x143   :  { %v7329_v0 = vld [vmem:[%s11656_s5 + $0x604] sm:$0xf]  ;;  %v6831_v7 = vor.u32 %v7577_v9, %v6828_v26  ;;  %v445_v9 = vadd.f32 %v421_v39, %v397_v61  ;;  %v467_v30 = vadd.f32 %v443_v53, %v292_v60  ;;  %3810 = vmatpush.bf16.msrb.mxu1 %v6575_v33  ;;  %v468_v39 = vadd.f32 %v444_v62, %v318_v5 }
 0x144   :  { %v5836_v19 = vld [vmem:[%s11656_s5 + $0x620] sm:$0xf0] }
 0x145   :  { %v7641_v31 = vld [vmem:[%s11656_s5 + $0xfc4] sm:$0xf]  ;;  %v5839_v43 = vor.u32 %v7329_v0, %v5836_v19  ;;  %3828 = vmatpush.bf16.msrb.mxu2 %v6831_v7  ;;  %v469_v42 = vadd.f32 %v445_v9, %v344_v11  ;;  %v8780_v33 = vpack.c.bf16 %v467_v30, %v467_v30 }
 0x146   :  { %v7084_v47 = vld [vmem:[%s11656_s5 + $0xfe0] sm:$0xf0] }
 0x147   :  { %v7441_v14 = vld [vmem:[%s11656_s5 + $0x984] sm:$0xf]  ;;  %v7087_v6 = vor.u32 %v7641_v31, %v7084_v47  ;;  %3781 = vmatpush.bf16.msra.mxu3 %v5839_v43  ;;  %3679 = vmatmul.bf16.gmra.mxu1 %v8780_v33 }
 0x148   :  { %v6284_v32 = vld [vmem:[%s11656_s5 + $0x9a0] sm:$0xf0] }
 0x149   :  { %v7505_v24 = vld [vmem:[%s11656_s5 + $0xb84] sm:$0xf]  ;;  %v6287_v17 = vor.u32 %v7441_v14, %v6284_v32 }
 0x14a   :  { %v6540_v36 = vld [vmem:[%s11656_s5 + $0xba0] sm:$0xf0] }
 0x14b   :  { %v7569_v34 = vld [vmem:[%s11656_s5 + $0xd84] sm:$0xf]  ;;  %v6543_v0 = vor.u32 %v7505_v24, %v6540_v36  ;;  %3846 = vmatpush.bf16.msrb.mxu3 %v7087_v6  ;;  %3793 = vmatpush.bf16.msrb.mxu0 %v6287_v17  ;;  %v8794_v36 = vpack.c.bf16 %v468_v39, %v468_v39 }
 0x14c   :  { %v6796_v52 = vld [vmem:[%s11656_s5 + $0xda0] sm:$0xf0] }
 0x14d   :  { %v7633_v26 = vld [vmem:[%s11656_s5 + $0xf84] sm:$0xf]  ;;  %v6799_v19 = vor.u32 %v7569_v34, %v6796_v52  ;;  %3811 = vmatpush.bf16.msrb.mxu1 %v6543_v0  ;;  %v8796_v34 = vpack.c.bf16 %v469_v42, %v469_v42  ;;  %3697 = vmatmul.bf16.gmra.mxu2 %v8794_v36 }
 0x14e   :  { %v7052_v21 = vld [vmem:[%s11656_s5 + $0xfa0] sm:$0xf0] }
 0x14f   :  { %v7433_v25 = vld [vmem:[%s11656_s5 + $0x944] sm:$0xf]  ;;  %v7055_v32 = vor.u32 %v7633_v26, %v7052_v21  ;;  %3829 = vmatpush.bf16.msrb.mxu2 %v6799_v19  ;;  %3715 = vmatmul.bf16.gmra.mxu3 %v8796_v34 }
 0x150   :  { %v6252_v54 = vld [vmem:[%s11656_s5 + $0x960] sm:$0xf0] }
 0x151   :  { %v7497_v31 = vld [vmem:[%s11656_s5 + $0xb44] sm:$0xf]  ;;  %v6255_v12 = vor.u32 %v7433_v25, %v6252_v54  ;;  %3847 = vmatpush.bf16.msrb.mxu3 %v7055_v32 }
 0x152   :  { %v6508_v44 = vld [vmem:[%s11656_s5 + $0xb60] sm:$0xf0]  ;;  %3728 = vmatmul.bf16.vlgmr.msra.gmra.mxu0 %v8239_v38 }
 0x153   :  { %v7561_v47 = vld [vmem:[%s11656_s5 + $0xd44] sm:$0xf]  ;;  %v6511_v60 = vor.u32 %v7497_v31, %v6508_v44  ;;  %3794 = vmatpush.bf16.msrb.mxu0 %v6255_v12 }
 0x154   :  { %v6764_v14 = vld [vmem:[%s11656_s5 + $0xd60] sm:$0xf0] }
 0x155   :  { %v7625_v3 = vld [vmem:[%s11656_s5 + $0xf44] sm:$0xf]  ;;  %v6767_v61 = vor.u32 %v7561_v47, %v6764_v14  ;;  %3812 = vmatpush.bf16.msrb.mxu1 %v6511_v60 }
 0x156   :  { %v7020_v7 = vld [vmem:[%s11656_s5 + $0xf60] sm:$0xf0] }
 0x157   :  { %v7425_v24 = vld [vmem:[%s11656_s5 + $0x904] sm:$0xf]  ;;  %v7023_v17 = vor.u32 %v7625_v3, %v7020_v7  ;;  %3830 = vmatpush.bf16.msrb.mxu2 %v6767_v61  ;;  %3746 = vmatmul.bf16.vlgmr.msra.gmra.mxu1 %v8241_v41 }
 0x158   :  { %v6220_v13 = vld [vmem:[%s11656_s5 + $0x920] sm:$0xf0] }
 0x159   :  { %v7489_v43 = vld [vmem:[%s11656_s5 + $0xb04] sm:$0xf]  ;;  %v6223_v49 = vor.u32 %v7425_v24, %v6220_v13  ;;  %3848 = vmatpush.bf16.msrb.mxu3 %v7023_v17 }
 0x15a   :  { %v6476_v52 = vld [vmem:[%s11656_s5 + $0xb20] sm:$0xf0] }
 0x15b   :  { %v7553_v53 = vld [vmem:[%s11656_s5 + $0xd04] sm:$0xf]  ;;  %v6479_v26 = vor.u32 %v7489_v43, %v6476_v52  ;;  %3795 = vmatpush.bf16.msrb.mxu0 %v6223_v49 }
 0x15c   :  { %v6732_v6 = vld [vmem:[%s11656_s5 + $0xd20] sm:$0xf0] }
 0x15d   :  { %v7617_v5 = vld [vmem:[%s11656_s5 + $0xf04] sm:$0xf]  ;;  %v6735_v30 = vor.u32 %v7553_v53, %v6732_v6  ;;  %3813 = vmatpush.bf16.msrb.mxu1 %v6479_v26  ;;  %3764 = vmatmul.bf16.vlgmr.msra.gmra.mxu2 %v8267_v57 }
 0x15e   :  { %v6988_v62 = vld [vmem:[%s11656_s5 + $0xf20] sm:$0xf0] }
 0x15f   :  { %v7417_v11 = vld [vmem:[%s11656_s5 + $0x8c4] sm:$0xf]  ;;  %v6991_v54 = vor.u32 %v7617_v5, %v6988_v62  ;;  %3831 = vmatpush.bf16.msrb.mxu2 %v6735_v30  ;;  %3782 = vmatmul.bf16.vlgmr.msra.gmra.mxu3 %v8269_v58 }
 0x160   :  { %v6188_v9 = vld [vmem:[%s11656_s5 + $0x8e0] sm:$0xf0] }
 0x161   :  { %v7481_v0 = vld [vmem:[%s11656_s5 + $0xac4] sm:$0xf]  ;;  %v6191_v31 = vor.u32 %v7417_v11, %v6188_v9  ;;  %3849 = vmatpush.bf16.msrb.mxu3 %v6991_v54 }
 0x162   :  { %v6444_v19 = vld [vmem:[%s11656_s5 + $0xae0] sm:$0xf0]  ;;  %3733 = vmatmul.bf16.gmra.mxu0 %v8443_v15 }
 0x163   :  { %v7545_v21 = vld [vmem:[%s11656_s5 + $0xcc4] sm:$0xf]  ;;  %v6447_v14 = vor.u32 %v7481_v0, %v6444_v19  ;;  %3796 = vmatpush.bf16.msrb.mxu0 %v6191_v31 }
 0x164   :  { %v6700_v25 = vld [vmem:[%s11656_s5 + $0xce0] sm:$0xf0] }
 0x165   :  { %v7609_v39 = vld [vmem:[%s11656_s5 + $0xec4] sm:$0xf]  ;;  %v6703_v32 = vor.u32 %v7545_v21, %v6700_v25  ;;  %3814 = vmatpush.bf16.msrb.mxu1 %v6447_v14 }
 0x166   :  { %v6956_v42 = vld [vmem:[%s11656_s5 + $0xee0] sm:$0xf0] }
 0x167   :  { %v7409_v44 = vld [vmem:[%s11656_s5 + $0x884] sm:$0xf]  ;;  %v6959_v13 = vor.u32 %v7609_v39, %v6956_v42  ;;  %3832 = vmatpush.bf16.msrb.mxu2 %v6703_v32  ;;  %3751 = vmatmul.bf16.gmra.mxu1 %v8445_v16 }
 0x168   :  { %v6156_v47 = vld [vmem:[%s11656_s5 + $0x8a0] sm:$0xf0] }
 0x169   :  { %v7473_v12 = vld [vmem:[%s11656_s5 + $0xa84] sm:$0xf]  ;;  %v6159_v60 = vor.u32 %v7409_v44, %v6156_v47  ;;  %3850 = vmatpush.bf16.msrb.mxu3 %v6959_v13 }
 0x16a   :  { %v6412_v3 = vld [vmem:[%s11656_s5 + $0xaa0] sm:$0xf0] }
 0x16b   :  { %v7537_v7 = vld [vmem:[%s11656_s5 + $0xc84] sm:$0xf]  ;;  %v6415_v6 = vor.u32 %v7473_v12, %v6412_v3  ;;  %3797 = vmatpush.bf16.msrb.mxu0 %v6159_v60  ;;  %v5298_v3 = vld [vmem:[%s11656_s5 + $0x1c8] sm:$0xf] }
 0x16c   :  { %v6668_v24 = vld [vmem:[%s11656_s5 + $0xca0] sm:$0xf0] }
 0x16d   :  { %v7601_v61 = vld [vmem:[%s11656_s5 + $0xe84] sm:$0xf]  ;;  %v6671_v17 = vor.u32 %v7537_v7, %v6668_v24  ;;  %3815 = vmatpush.bf16.msrb.mxu1 %v6415_v6  ;;  %v7198_v7 = vld [vmem:[%s11656_s5 + $0x1e4] sm:$0xf0]  ;;  %3769 = vmatmul.bf16.gmra.mxu2 %v8447_v27 }
 0x16e   :  { %v6924_v43 = vld [vmem:[%s11656_s5 + $0xea0] sm:$0xf0]  ;;  %v5554_v24 = vld [vmem:[%s11656_s5 + $0x3c8] sm:$0xf] }
 0x16f   :  { %v7401_v52 = vld [vmem:[%s11656_s5 + $0x844] sm:$0xf]  ;;  %v6927_v9 = vor.u32 %v7601_v61, %v6924_v43  ;;  %3833 = vmatpush.bf16.msrb.mxu2 %v6671_v17  ;;  %v5299_v61 = vor.u32 %v7198_v7, %v5298_v3  ;;  %v7262_v43 = vld [vmem:[%s11656_s5 + $0x3e4] sm:$0xf0]  ;;  %3787 = vmatmul.bf16.gmra.mxu3 %v8449_v56 }
 0x170   :  { %v6124_v53 = vld [vmem:[%s11656_s5 + $0x860] sm:$0xf0]  ;;  %v5555_v6 = vor.u32 %v7262_v43, %v5554_v24  ;;  %v7246_v3 = vld [vmem:[%s11656_s5 + $0x364] sm:$0xf0] }
 0x171   :  { %v7465_v49 = vld [vmem:[%s11656_s5 + $0xa44] sm:$0xf]  ;;  %v6127_v26 = vor.u32 %v7401_v52, %v6124_v53  ;;  %3851 = vmatpush.bf16.msrb.mxu3 %v6927_v9  ;;  %v5810_v52 = vld [vmem:[%s11656_s5 + $0x5c8] sm:$0xf] }
 0x172   :  { %v6380_v5 = vld [vmem:[%s11656_s5 + $0xa60] sm:$0xf0]  ;;  %v7326_v53 = vld [vmem:[%s11656_s5 + $0x5e4] sm:$0xf0] }
 0x173   :  { %v7529_v62 = vld [vmem:[%s11656_s5 + $0xc44] sm:$0xf]  ;;  %v6383_v25 = vor.u32 %v7465_v49, %v6380_v5  ;;  %3798 = vmatpush.bf16.msrb.mxu0 %v6127_v26  ;;  %v5811_v17 = vor.u32 %v7326_v53, %v5810_v52  ;;  %v6066_v49 = vld [vmem:[%s11656_s5 + $0x7c8] sm:$0xf] }
 0x174   :  { %v6636_v11 = vld [vmem:[%s11656_s5 + $0xc60] sm:$0xf0]  ;;  %v7390_v5 = vld [vmem:[%s11656_s5 + $0x7e4] sm:$0xf0] }
 0x175   :  { %v7593_v30 = vld [vmem:[%s11656_s5 + $0xe44] sm:$0xf]  ;;  %v6639_v54 = vor.u32 %v7529_v62, %v6636_v11  ;;  %3816 = vmatpush.bf16.msrb.mxu1 %v6383_v25  ;;  %v5266_v62 = vld [vmem:[%s11656_s5 + $0x188] sm:$0xf] }
 0x176   :  { %v6892_v0 = vld [vmem:[%s11656_s5 + $0xe60] sm:$0xf0]  ;;  %v7190_v9 = vld [vmem:[%s11656_s5 + $0x1a4] sm:$0xf0] }
 0x177   :  { %v7393_v19 = vld [vmem:[%s11656_s5 + $0x804] sm:$0xf]  ;;  %v6895_v47 = vor.u32 %v7593_v30, %v6892_v0  ;;  %3834 = vmatpush.bf16.msrb.mxu2 %v6639_v54  ;;  %v5522_v26 = vld [vmem:[%s11656_s5 + $0x388] sm:$0xf]  ;;  %v6067_v0 = vor.u32 %v7390_v5, %v6066_v49 }
 0x178   :  { %v6092_v21 = vld [vmem:[%s11656_s5 + $0x820] sm:$0xf0]  ;;  %v7254_v30 = vld [vmem:[%s11656_s5 + $0x3a4] sm:$0xf0] }
 0x179   :  { %v7457_v31 = vld [vmem:[%s11656_s5 + $0xa04] sm:$0xf]  ;;  %v6095_v14 = vor.u32 %v7393_v19, %v6092_v21  ;;  %3852 = vmatpush.bf16.msrb.mxu3 %v6895_v47  ;;  %v5267_v19 = vor.u32 %v7190_v9, %v5266_v62  ;;  %v5778_v21 = vld [vmem:[%s11656_s5 + $0x588] sm:$0xf] }
 0x17a   :  { %v6348_v39 = vld [vmem:[%s11656_s5 + $0xa20] sm:$0xf0]  ;;  %v7318_v25 = vld [vmem:[%s11656_s5 + $0x5a4] sm:$0xf0] }
 0x17b   :  { %v7521_v42 = vld [vmem:[%s11656_s5 + $0xc04] sm:$0xf]  ;;  %v6351_v13 = vor.u32 %v7457_v31, %v6348_v39  ;;  %3799 = vmatpush.bf16.msrb.mxu0 %v6095_v14  ;;  %v6034_v54 = vld [vmem:[%s11656_s5 + $0x788] sm:$0xf]  ;;  %v5779_v47 = vor.u32 %v7318_v25, %v5778_v21 }
 0x17c   :  { %v6604_v44 = vld [vmem:[%s11656_s5 + $0xc20] sm:$0xf0]  ;;  %v7382_v31 = vld [vmem:[%s11656_s5 + $0x7a4] sm:$0xf0] }
 0x17d   :  { %v7585_v32 = vld [vmem:[%s11656_s5 + $0xe04] sm:$0xf]  ;;  %v6607_v60 = vor.u32 %v7521_v42, %v6604_v44  ;;  %3817 = vmatpush.bf16.msrb.mxu1 %v6351_v13  ;;  %v5234_v39 = vld [vmem:[%s11656_s5 + $0x148] sm:$0xf]  ;;  %v5523_v44 = vor.u32 %v7254_v30, %v5522_v26 }
 0x17e   :  { %v6860_v12 = vld [vmem:[%s11656_s5 + $0xe20] sm:$0xf0]  ;;  %v7182_v42 = vld [vmem:[%s11656_s5 + $0x164] sm:$0xf0]  ;;  %3800 = vmatmul.bf16.vlgmr.msrb.gmra.mxu0 %v8626_v4 }
 0x17f   :  { %v6863_v11 = vor.u32 %v7585_v32, %v6860_v12  ;;  %3864 = vmatpush.bf16.msra.mxu0 %v5299_v61  ;;  %3835 = vmatpush.bf16.msrb.mxu2 %v6607_v60  ;;  %v5490_v14 = vld [vmem:[%s11656_s5 + $0x348] sm:$0xf]  ;;  %v6035_v32 = vor.u32 %v7382_v31, %v6034_v54  ;;  %v5235_v12 = vor.u32 %v7182_v42, %v5234_v39 }
 0x180   :  { %v5746_v7 = vld [vmem:[%s11656_s5 + $0x548] sm:$0xf]  ;;  %v5491_v52 = vor.u32 %v7246_v3, %v5490_v14  ;;  %3818 = vmatmul.bf16.vlgmr.msrb.gmra.mxu1 %v8628_v45 }
 0x181   :  { %3882 = vmatpush.bf16.msra.mxu1 %v5555_v6  ;;  %3853 = vmatpush.bf16.msrb.mxu3 %v6863_v11  ;;  %v7310_v24 = vld [vmem:[%s11656_s5 + $0x564] sm:$0xf0] }
 0x182   :  { %v6002_v13 = vld [vmem:[%s11656_s5 + $0x748] sm:$0xf]  ;;  %v5747_v53 = vor.u32 %v7310_v24, %v5746_v7  ;;  %3836 = vmatmul.bf16.vlgmr.msrb.gmra.mxu2 %v8652_v35 }
 0x183   :  { %3900 = vmatpush.bf16.msra.mxu2 %v5811_v17  ;;  %3865 = vmatpush.bf16.msra.mxu0 %v5267_v19  ;;  %v7374_v60 = vld [vmem:[%s11656_s5 + $0x764] sm:$0xf0] }
 0x184   :  { %v5202_v61 = vld [vmem:[%s11656_s5 + $0x108] sm:$0xf]  ;;  %v6003_v62 = vor.u32 %v7374_v60, %v6002_v13  ;;  %3854 = vmatmul.bf16.vlgmr.msrb.gmra.mxu3 %v8654_v59 }
 0x185   :  { %3918 = vmatpush.bf16.msra.mxu3 %v6067_v0  ;;  %3883 = vmatpush.bf16.msra.mxu1 %v5523_v44  ;;  %v7174_v43 = vld [vmem:[%s11656_s5 + $0x124] sm:$0xf0] }
 0x186   :  { %v5458_v6 = vld [vmem:[%s11656_s5 + $0x308] sm:$0xf]  ;;  %v5203_v11 = vor.u32 %v7174_v43, %v5202_v61 }
 0x187   :  { %3901 = vmatpush.bf16.msra.mxu2 %v5779_v47  ;;  %3866 = vmatpush.bf16.msra.mxu0 %v5235_v12  ;;  %v7238_v17 = vld [vmem:[%s11656_s5 + $0x324] sm:$0xf0] }
 0x188   :  { %v5714_v49 = vld [vmem:[%s11656_s5 + $0x508] sm:$0xf]  ;;  %v5459_v30 = vor.u32 %v7238_v17, %v5458_v6 }
 0x189   :  { %3919 = vmatpush.bf16.msra.mxu3 %v6035_v32  ;;  %v7302_v5 = vld [vmem:[%s11656_s5 + $0x524] sm:$0xf0]  ;;  %3884 = vmatpush.bf16.msra.mxu1 %v5491_v52 }
 0x18a   :  { %v5970_v9 = vld [vmem:[%s11656_s5 + $0x708] sm:$0xf]  ;;  %v5715_v0 = vor.u32 %v7302_v5, %v5714_v49 }
 0x18b   :  { %v7366_v26 = vld [vmem:[%s11656_s5 + $0x724] sm:$0xf0]  ;;  %3902 = vmatpush.bf16.msra.mxu2 %v5747_v53  ;;  %3867 = vmatpush.bf16.msra.mxu0 %v5203_v11 }
 0x18c   :  { %v5170_v19 = vld [vmem:[%s11656_s5 + $0xc8] sm:$0xf]  ;;  %v5971_v54 = vor.u32 %v7366_v26, %v5970_v9 }
 0x18d   :  { %v7166_v21 = vld [vmem:[%s11656_s5 + $0xe4] sm:$0xf0]  ;;  %3920 = vmatpush.bf16.msra.mxu3 %v6003_v62  ;;  %3885 = vmatpush.bf16.msra.mxu1 %v5459_v30 }
 0x18e   :  { %v5426_v25 = vld [vmem:[%s11656_s5 + $0x2c8] sm:$0xf]  ;;  %v5171_v31 = vor.u32 %v7166_v21, %v5170_v19  ;;  %3805 = vmatmul.bf16.gmra.mxu0 %v8778_v51 }
 0x18f   :  { %v7230_v39 = vld [vmem:[%s11656_s5 + $0x2e4] sm:$0xf0]  ;;  %3903 = vmatpush.bf16.msra.mxu2 %v5715_v0 }
 0x190   :  { %v5682_v42 = vld [vmem:[%s11656_s5 + $0x4c8] sm:$0xf]  ;;  %v5427_v12 = vor.u32 %v7230_v39, %v5426_v25  ;;  %3868 = vmatpush.bf16.msra.mxu0 %v5171_v31  ;;  %3823 = vmatmul.bf16.gmra.mxu1 %v8780_v33 }
 0x191   :  { %v7294_v44 = vld [vmem:[%s11656_s5 + $0x4e4] sm:$0xf0]  ;;  %3921 = vmatpush.bf16.msra.mxu3 %v5971_v54 }
 0x192   :  { %v5938_v47 = vld [vmem:[%s11656_s5 + $0x6c8] sm:$0xf]  ;;  %v5683_v3 = vor.u32 %v7294_v44, %v5682_v42  ;;  %3886 = vmatpush.bf16.msra.mxu1 %v5427_v12  ;;  %3841 = vmatmul.bf16.gmra.mxu2 %v8794_v36 }
 0x193   :  { %v7358_v14 = vld [vmem:[%s11656_s5 + $0x6e4] sm:$0xf0] }
 0x194   :  { %v5138_v32 = vld [vmem:[%s11656_s5 + $0x88] sm:$0xf]  ;;  %v5939_v43 = vor.u32 %v7358_v14, %v5938_v47  ;;  %3904 = vmatpush.bf16.msra.mxu2 %v5683_v3  ;;  %3859 = vmatmul.bf16.gmra.mxu3 %v8796_v34 }
 0x195   :  { %v7158_v7 = vld [vmem:[%s11656_s5 + $0xa4] sm:$0xf0] }
 0x196   :  { %v5394_v24 = vld [vmem:[%s11656_s5 + $0x288] sm:$0xf]  ;;  %v5139_v52 = vor.u32 %v7158_v7, %v5138_v32  ;;  %3922 = vmatpush.bf16.msra.mxu3 %v5939_v43 }
 0x197   :  { %v7222_v13 = vld [vmem:[%s11656_s5 + $0x2a4] sm:$0xf0] }
 0x198   :  { %v5650_v60 = vld [vmem:[%s11656_s5 + $0x488] sm:$0xf]  ;;  %v5395_v5 = vor.u32 %v7222_v13, %v5394_v24  ;;  %3869 = vmatpush.bf16.msra.mxu0 %v5139_v52 }
 0x199   :  { %v7286_v61 = vld [vmem:[%s11656_s5 + $0x4a4] sm:$0xf0] }
 0x19a   :  { %v5906_v53 = vld [vmem:[%s11656_s5 + $0x688] sm:$0xf]  ;;  %v5651_v62 = vor.u32 %v7286_v61, %v5650_v60  ;;  %3887 = vmatpush.bf16.msra.mxu1 %v5395_v5 }
 0x19b   :  { %v7350_v6 = vld [vmem:[%s11656_s5 + $0x6a4] sm:$0xf0] }
 0x19c   :  { %v5106_v17 = vld [vmem:[%s11656_s5 + $0x48] sm:$0xf]  ;;  %v5907_v0 = vor.u32 %v7350_v6, %v5906_v53  ;;  %3905 = vmatpush.bf16.msra.mxu2 %v5651_v62 }
 0x19d   :  { %v7150_v49 = vld [vmem:[%s11656_s5 + $0x64] sm:$0xf0] }
 0x19e   :  { %v5362_v11 = vld [vmem:[%s11656_s5 + $0x248] sm:$0xf]  ;;  %v5107_v19 = vor.u32 %v7150_v49, %v5106_v17  ;;  %3923 = vmatpush.bf16.msra.mxu3 %v5907_v0 }
 0x19f   :  { %v7214_v9 = vld [vmem:[%s11656_s5 + $0x264] sm:$0xf0] }
 0x1a0   :  { %v5618_v26 = vld [vmem:[%s11656_s5 + $0x448] sm:$0xf]  ;;  %v5363_v54 = vor.u32 %v7214_v9, %v5362_v11  ;;  %3870 = vmatpush.bf16.msra.mxu0 %v5107_v19 }
 0x1a1   :  { %v7278_v30 = vld [vmem:[%s11656_s5 + $0x464] sm:$0xf0] }
 0x1a2   :  { %v5874_v21 = vld [vmem:[%s11656_s5 + $0x648] sm:$0xf]  ;;  %v5619_v31 = vor.u32 %v7278_v30, %v5618_v26  ;;  %3888 = vmatpush.bf16.msra.mxu1 %v5363_v54 }
 0x1a3   :  { %v7342_v25 = vld [vmem:[%s11656_s5 + $0x664] sm:$0xf0] }
 0x1a4   :  { %v5875_v39 = vor.u32 %v7342_v25, %v5874_v21  ;;  %v5074_v42 = vld [vmem:[%s11656_s5 + $0x8] sm:$0xf]  ;;  %3906 = vmatpush.bf16.msra.mxu2 %v5619_v31 }
 0x1a5   :  { %v7142_v44 = vld [vmem:[%s11656_s5 + $0x24] sm:$0xf0] }
 0x1a6   :  { %v5330_v47 = vld [vmem:[%s11656_s5 + $0x208] sm:$0xf]  ;;  %v5075_v14 = vor.u32 %v7142_v44, %v5074_v42  ;;  %3924 = vmatpush.bf16.msra.mxu3 %v5875_v39 }
 0x1a7   :  { %v7206_v32 = vld [vmem:[%s11656_s5 + $0x224] sm:$0xf0] }
 0x1a8   :  { %v5586_v12 = vld [vmem:[%s11656_s5 + $0x408] sm:$0xf]  ;;  %v5331_v7 = vor.u32 %v7206_v32, %v5330_v47  ;;  %3871 = vmatpush.bf16.msra.mxu0 %v5075_v14 }
 0x1a9   :  { %v7270_v3 = vld [vmem:[%s11656_s5 + $0x424] sm:$0xf0] }
 0x1aa   :  { %v5587_v24 = vor.u32 %v7270_v3, %v5586_v12  ;;  %v5842_v13 = vld [vmem:[%s11656_s5 + $0x608] sm:$0xf]  ;;  %3889 = vmatpush.bf16.msra.mxu1 %v5331_v7 }
 0x1ab   :  { %v7334_v60 = vld [vmem:[%s11656_s5 + $0x624] sm:$0xf0]  ;;  %3872 = vmatmul.bf16.vlgmr.msra.gmra.mxu0 %v8239_v38 }
 0x1ac   :  { %v6322_v61 = vld [vmem:[%s11656_s5 + $0x9c8] sm:$0xf]  ;;  %v5843_v43 = vor.u32 %v7334_v60, %v5842_v13  ;;  %3907 = vmatpush.bf16.msra.mxu2 %v5587_v24 }
 0x1ad   :  { %v7454_v52 = vld [vmem:[%s11656_s5 + $0x9e4] sm:$0xf0]  ;;  %3890 = vmatmul.bf16.vlgmr.msra.gmra.mxu1 %v8241_v41 }
 0x1ae   :  { %v6578_v53 = vld [vmem:[%s11656_s5 + $0xbc8] sm:$0xf]  ;;  %v6323_v17 = vor.u32 %v7454_v52, %v6322_v61  ;;  %3925 = vmatpush.bf16.msra.mxu3 %v5843_v43 }
 0x1af   :  { %v7518_v6 = vld [vmem:[%s11656_s5 + $0xbe4] sm:$0xf0]  ;;  %3908 = vmatmul.bf16.vlgmr.msra.gmra.mxu2 %v8267_v57 }
 0x1b0   :  { %v6579_v49 = vor.u32 %v7518_v6, %v6578_v53  ;;  %v6834_v5 = vld [vmem:[%s11656_s5 + $0xdc8] sm:$0xf]  ;;  %3936 = vmatpush.bf16.msrb.mxu0 %v6323_v17 }
 0x1b1   :  { %v7582_v62 = vld [vmem:[%s11656_s5 + $0xde4] sm:$0xf0]  ;;  %3926 = vmatmul.bf16.vlgmr.msra.gmra.mxu3 %v8269_v58 }
 0x1b2   :  { %v7090_v11 = vld [vmem:[%s11656_s5 + $0xfc8] sm:$0xf]  ;;  %v6835_v9 = vor.u32 %v7582_v62, %v6834_v5  ;;  %3954 = vmatpush.bf16.msrb.mxu1 %v6579_v49 }
 0x1b3   :  { %v7646_v26 = vld [vmem:[%s11656_s5 + $0xfe4] sm:$0xf0] }
 0x1b4   :  { %v7091_v30 = vor.u32 %v7646_v26, %v7090_v11  ;;  %3972 = vmatpush.bf16.msrb.mxu2 %v6835_v9  ;;  %v6290_v0 = vld [vmem:[%s11656_s5 + $0x988] sm:$0xf]  ;;  %v9205_v11 = vld [vmem:[%s11659_s6] sm:$0xff] }
 0x1b5   :  { %v7446_v19 = vld [vmem:[%s11656_s5 + $0x9a4] sm:$0xf0] }
 0x1b6   :  { %3990 = vmatpush.bf16.msrb.mxu3 %v7091_v30  ;;  %v6546_v21 = vld [vmem:[%s11656_s5 + $0xb88] sm:$0xf]  ;;  %v6291_v25 = vor.u32 %v7446_v19, %v6290_v0 }
 0x1b7   :  { %v7510_v54 = vld [vmem:[%s11656_s5 + $0xba4] sm:$0xf0] }
 0x1b8   :  { %v6802_v31 = vld [vmem:[%s11656_s5 + $0xd88] sm:$0xf]  ;;  %v6547_v42 = vor.u32 %v7510_v54, %v6546_v21  ;;  %3937 = vmatpush.bf16.msrb.mxu0 %v6291_v25 }
 0x1b9   :  { %v7574_v39 = vld [vmem:[%s11656_s5 + $0xda4] sm:$0xf0] }
 0x1ba   :  { %v6803_v44 = vor.u32 %v7574_v39, %v6802_v31  ;;  %v7058_v47 = vld [vmem:[%s11656_s5 + $0xf88] sm:$0xf]  ;;  %3955 = vmatpush.bf16.msrb.mxu1 %v6547_v42 }
 0x1bb   :  { %v7638_v14 = vld [vmem:[%s11656_s5 + $0xfa4] sm:$0xf0]  ;;  %3877 = vmatmul.bf16.gmra.mxu0 %v8443_v15 }
 0x1bc   :  { %v6258_v32 = vld [vmem:[%s11656_s5 + $0x948] sm:$0xf]  ;;  %v7059_v12 = vor.u32 %v7638_v14, %v7058_v47  ;;  %3973 = vmatpush.bf16.msrb.mxu2 %v6803_v44 }
 0x1bd   :  { %v7438_v3 = vld [vmem:[%s11656_s5 + $0x964] sm:$0xf0]  ;;  %3895 = vmatmul.bf16.gmra.mxu1 %v8445_v16 }
 0x1be   :  { %v6514_v7 = vld [vmem:[%s11656_s5 + $0xb48] sm:$0xf]  ;;  %v6259_v13 = vor.u32 %v7438_v3, %v6258_v32  ;;  %3991 = vmatpush.bf16.msrb.mxu3 %v7059_v12 }
 0x1bf   :  { %v7502_v24 = vld [vmem:[%s11656_s5 + $0xb64] sm:$0xf0]  ;;  %3913 = vmatmul.bf16.gmra.mxu2 %v8447_v27 }
 0x1c0   :  { %v6515_v60 = vor.u32 %v7502_v24, %v6514_v7  ;;  %v6770_v61 = vld [vmem:[%s11656_s5 + $0xd48] sm:$0xf]  ;;  %3938 = vmatpush.bf16.msrb.mxu0 %v6259_v13  ;;  %v9247_v13 = vperm.slane %v9205_v11, 0 }
 0x1c1   :  { %v7566_v43 = vld [vmem:[%s11656_s5 + $0xd64] sm:$0xf0]  ;;  %3931 = vmatmul.bf16.gmra.mxu3 %v8449_v56 }
 0x1c2   :  { %v7026_v52 = vld [vmem:[%s11656_s5 + $0xf48] sm:$0xf]  ;;  %v6771_v6 = vor.u32 %v7566_v43, %v6770_v61  ;;  %3956 = vmatpush.bf16.msrb.mxu1 %v6515_v60 }
 0x1c3   :  { %v7630_v53 = vld [vmem:[%s11656_s5 + $0xf64] sm:$0xf0] }
 0x1c4   :  { %v7027_v17 = vor.u32 %v7630_v53, %v7026_v52  ;;  %v6226_v49 = vld [vmem:[%s11656_s5 + $0x908] sm:$0xf]  ;;  %3974 = vmatpush.bf16.msrb.mxu2 %v6771_v6 }
 0x1c5   :  { %v7430_v5 = vld [vmem:[%s11656_s5 + $0x924] sm:$0xf0] }
 0x1c6   :  { %v6482_v62 = vld [vmem:[%s11656_s5 + $0xb08] sm:$0xf]  ;;  %v6227_v9 = vor.u32 %v7430_v5, %v6226_v49  ;;  %3992 = vmatpush.bf16.msrb.mxu3 %v7027_v17 }
 0x1c7   :  { %v7494_v26 = vld [vmem:[%s11656_s5 + $0xb24] sm:$0xf0] }
 0x1c8   :  { %v6738_v30 = vld [vmem:[%s11656_s5 + $0xd08] sm:$0xf]  ;;  %v6483_v19 = vor.u32 %v7494_v26, %v6482_v62  ;;  %3939 = vmatpush.bf16.msrb.mxu0 %v6227_v9 }
 0x1c9   :  { %v7558_v0 = vld [vmem:[%s11656_s5 + $0xd24] sm:$0xf0] }
 0x1ca   :  { %v6739_v21 = vor.u32 %v7558_v0, %v6738_v30  ;;  %v6994_v25 = vld [vmem:[%s11656_s5 + $0xf08] sm:$0xf]  ;;  %3957 = vmatpush.bf16.msrb.mxu1 %v6483_v19 }
 0x1cb   :  { %v7622_v54 = vld [vmem:[%s11656_s5 + $0xf24] sm:$0xf0] }
 0x1cc   :  { %v6194_v31 = vld [vmem:[%s11656_s5 + $0x8c8] sm:$0xf]  ;;  %v6995_v39 = vor.u32 %v7622_v54, %v6994_v25  ;;  %3975 = vmatpush.bf16.msrb.mxu2 %v6739_v21 }
 0x1cd   :  { %v7422_v42 = vld [vmem:[%s11656_s5 + $0x8e4] sm:$0xf0] }
 0x1ce   :  { %v6450_v44 = vld [vmem:[%s11656_s5 + $0xac8] sm:$0xf]  ;;  %v6195_v14 = vor.u32 %v7422_v42, %v6194_v31  ;;  %3993 = vmatpush.bf16.msrb.mxu3 %v6995_v39 }
 0x1cf   :  { %v7486_v47 = vld [vmem:[%s11656_s5 + $0xae4] sm:$0xf0] }
 0x1d0   :  { %v6451_v32 = vor.u32 %v7486_v47, %v6450_v44  ;;  %v6706_v12 = vld [vmem:[%s11656_s5 + $0xcc8] sm:$0xf]  ;;  %3940 = vmatpush.bf16.msrb.mxu0 %v6195_v14  ;;  %v3585_v44 = vpop.f32.mrf.mxu0  ;;  %v3603_v47 = vpop.f32.mrf.mxu1 }
 0x1d1   :  { %v7550_v3 = vld [vmem:[%s11656_s5 + $0xce4] sm:$0xf0] }
 0x1d2   :  { %v6962_v7 = vld [vmem:[%s11656_s5 + $0xec8] sm:$0xf]  ;;  %v6707_v60 = vor.u32 %v7550_v3, %v6706_v12  ;;  %3958 = vmatpush.bf16.msrb.mxu1 %v6451_v32  ;;  %v3586_v3 = vadd.f32 %v3585_v44, %v9247_v13  ;;  %v7322_v44 = vld [vmem:[%s11656_s5 + $0x5cc] sm:$0xf] }
 0x1d3   :  { %v7614_v24 = vld [vmem:[%s11656_s5 + $0xee4] sm:$0xf0] }
 0x1d4   :  { %v6963_v61 = vor.u32 %v7614_v24, %v6962_v7  ;;  %v6162_v43 = vld [vmem:[%s11656_s5 + $0x888] sm:$0xf]  ;;  %3976 = vmatpush.bf16.msrb.mxu2 %v6707_v60  ;;  %v3604_v60 = vadd.f32 %v3603_v47, %v3586_v3  ;;  %v5812_v47 = vld [vmem:[%s11656_s5 + $0x5e8] sm:$0xf0] }
 0x1d5   :  { %v7414_v52 = vld [vmem:[%s11656_s5 + $0x8a4] sm:$0xf0] }
 0x1d6   :  { %v6418_v53 = vld [vmem:[%s11656_s5 + $0xa88] sm:$0xf]  ;;  %v6163_v6 = vor.u32 %v7414_v52, %v6162_v43  ;;  %3994 = vmatpush.bf16.msrb.mxu3 %v6963_v61 }
 0x1d7   :  { %v7478_v17 = vld [vmem:[%s11656_s5 + $0xaa4] sm:$0xf0] }
 0x1d8   :  { %v6674_v49 = vld [vmem:[%s11656_s5 + $0xc88] sm:$0xf]  ;;  %v6419_v62 = vor.u32 %v7478_v17, %v6418_v53  ;;  %3941 = vmatpush.bf16.msrb.mxu0 %v6163_v6  ;;  %v3605_v3 = vpop.f32.mrf.mxu1 }
 0x1d9   :  { %v7542_v5 = vld [vmem:[%s11656_s5 + $0xca4] sm:$0xf0] }
 0x1da   :  { %v6930_v9 = vld [vmem:[%s11656_s5 + $0xe88] sm:$0xf]  ;;  %v6675_v0 = vor.u32 %v7542_v5, %v6674_v49  ;;  %3959 = vmatpush.bf16.msrb.mxu1 %v6419_v62 }
 0x1db   :  { %v7606_v26 = vld [vmem:[%s11656_s5 + $0xea4] sm:$0xf0] }
 0x1dc   :  { %v6130_v30 = vld [vmem:[%s11656_s5 + $0x848] sm:$0xf]  ;;  %v6931_v19 = vor.u32 %v7606_v26, %v6930_v9  ;;  %3977 = vmatpush.bf16.msrb.mxu2 %v6675_v0 }
 0x1dd   :  { %v7406_v21 = vld [vmem:[%s11656_s5 + $0x864] sm:$0xf0] }
 0x1de   :  { %v6386_v25 = vld [vmem:[%s11656_s5 + $0xa48] sm:$0xf]  ;;  %v6131_v14 = vor.u32 %v7406_v21, %v6130_v30  ;;  %3995 = vmatpush.bf16.msrb.mxu3 %v6931_v19  ;;  %v7194_v30 = vld [vmem:[%s11656_s5 + $0x1cc] sm:$0xf] }
 0x1df   :  { %v7470_v54 = vld [vmem:[%s11656_s5 + $0xa64] sm:$0xf0]  ;;  %v5300_v19 = vld [vmem:[%s11656_s5 + $0x1e8] sm:$0xf0] }
 0x1e0   :  { %v6642_v31 = vld [vmem:[%s11656_s5 + $0xc48] sm:$0xf]  ;;  %v6387_v32 = vor.u32 %v7470_v54, %v6386_v25  ;;  %3942 = vmatpush.bf16.msrb.mxu0 %v6131_v14  ;;  %v7258_v21 = vld [vmem:[%s11656_s5 + $0x3cc] sm:$0xf]  ;;  %v3621_v54 = vpop.f32.mrf.mxu2 }
 0x1e1   :  { %v7534_v39 = vld [vmem:[%s11656_s5 + $0xc64] sm:$0xf0]  ;;  %v5556_v25 = vld [vmem:[%s11656_s5 + $0x3e8] sm:$0xf0] }
 0x1e2   :  { %v6898_v42 = vld [vmem:[%s11656_s5 + $0xe48] sm:$0xf]  ;;  %v6643_v7 = vor.u32 %v7534_v39, %v6642_v31  ;;  %3960 = vmatpush.bf16.msrb.mxu1 %v6387_v32  ;;  %v3639_v31 = vpop.f32.mrf.mxu3  ;;  %v5303_v39 = vor.u32 %v7194_v30, %v5300_v19  ;;  %v7386_v14 = vld [vmem:[%s11656_s5 + $0x7cc] sm:$0xf]  ;;  %v3622_v32 = vadd.f32 %v3621_v54, %v3604_v60 }
 0x1e3   :  { %v7598_v12 = vld [vmem:[%s11656_s5 + $0xe64] sm:$0xf0]  ;;  %v7314_v19 = vld [vmem:[%s11656_s5 + $0x58c] sm:$0xf] }
 0x1e4   :  { %v6899_v24 = vor.u32 %v7598_v12, %v6898_v42  ;;  %v6098_v61 = vld [vmem:[%s11656_s5 + $0x808] sm:$0xf]  ;;  %3978 = vmatpush.bf16.msrb.mxu2 %v6643_v7  ;;  %v5559_v42 = vor.u32 %v7258_v21, %v5556_v25  ;;  %v3587_v12 = vpop.f32.mrf.mxu0  ;;  %v5815_v7 = vor.u32 %v7322_v44, %v5812_v47  ;;  %v5780_v21 = vld [vmem:[%s11656_s5 + $0x5a8] sm:$0xf0] }
 0x1e5   :  { %v7398_v43 = vld [vmem:[%s11656_s5 + $0x824] sm:$0xf0] }
 0x1e6   :  { %v6354_v52 = vld [vmem:[%s11656_s5 + $0xa08] sm:$0xf]  ;;  %v6099_v53 = vor.u32 %v7398_v43, %v6098_v61  ;;  %3996 = vmatpush.bf16.msrb.mxu3 %v6899_v24  ;;  %v6068_v24 = vld [vmem:[%s11656_s5 + $0x7e8] sm:$0xf0]  ;;  %v3588_v61 = vadd.f32 %v3587_v12, %v9247_v13 }
 0x1e7   :  { %v7462_v6 = vld [vmem:[%s11656_s5 + $0xa24] sm:$0xf0]  ;;  %v6071_v43 = vor.u32 %v7386_v14, %v6068_v24  ;;  %v5236_v14 = vld [vmem:[%s11656_s5 + $0x168] sm:$0xf0] }
 0x1e8   :  { %v6610_v17 = vld [vmem:[%s11656_s5 + $0xc08] sm:$0xf]  ;;  %v6355_v5 = vor.u32 %v7462_v6, %v6354_v52  ;;  %3943 = vmatpush.bf16.msrb.mxu0 %v6099_v53  ;;  %v9351_v52 = vadd.f32 %v3639_v31, %v3622_v32  ;;  %v3606_v53 = vadd.f32 %v3605_v3, %v3588_v61  ;;  %v3623_v60 = vpop.f32.mrf.mxu2  ;;  %v5783_v31 = vor.u32 %v7314_v19, %v5780_v21  ;;  %v7242_v32 = vld [vmem:[%s11656_s5 + $0x34c] sm:$0xf] }
 0x1e9   :  { %v7526_v49 = vld [vmem:[%s11656_s5 + $0xc24] sm:$0xf0]  ;;  %v7306_v24 = vld [vmem:[%s11656_s5 + $0x54c] sm:$0xf] }
 0x1ea   :  { %v6611_v62 = vor.u32 %v7526_v49, %v6610_v17  ;;  %v6866_v9 = vld [vmem:[%s11656_s5 + $0xe08] sm:$0xf]  ;;  %3961 = vmatpush.bf16.msrb.mxu1 %v6355_v5  ;;  %v3641_v6 = vpop.f32.mrf.mxu3  ;;  %v7186_v17 = vld [vmem:[%s11656_s5 + $0x18c] sm:$0xf] }
 0x1eb   :  { %v7590_v26 = vld [vmem:[%s11656_s5 + $0xe24] sm:$0xf0]  ;;  %v5268_v49 = vld [vmem:[%s11656_s5 + $0x1a8] sm:$0xf0]  ;;  %3944 = vmatmul.bf16.vlgmr.msrb.gmra.mxu0 %v8626_v4 }
 0x1ec   :  { %v6867_v0 = vor.u32 %v7590_v26, %v6866_v9  ;;  %3979 = vmatpush.bf16.msrb.mxu2 %v6611_v62  ;;  %4008 = vmatpush.bf16.msra.mxu0 %v5303_v39  ;;  %v7250_v5 = vld [vmem:[%s11656_s5 + $0x38c] sm:$0xf]  ;;  %v3624_v62 = vadd.f32 %v3623_v60, %v3606_v53  ;;  %v3590_v9 = vpop.f32.mrf.mxu0  ;;  %v3608_v26 = vpop.f32.mrf.mxu1  ;;  %v5271_v30 = vor.u32 %v7186_v17, %v5268_v49 }
 0x1ed   :  { %v3591_v25 = vadd.f32 %v3590_v9, %v9247_v13  ;;  %v7378_v39 = vld [vmem:[%s11656_s5 + $0x78c] sm:$0xf]  ;;  %3962 = vmatmul.bf16.vlgmr.msrb.gmra.mxu1 %v8628_v45 }
 0x1ee   :  { %3997 = vmatpush.bf16.msrb.mxu3 %v6867_v0  ;;  %4026 = vmatpush.bf16.msra.mxu1 %v5559_v42  ;;  %v5524_v0 = vld [vmem:[%s11656_s5 + $0x3a8] sm:$0xf0]  ;;  %v9378_v44 = vadd.f32 %v3641_v6, %v3624_v62 }
 0x1ef   :  { %v5527_v54 = vor.u32 %v7250_v5, %v5524_v0  ;;  %v6036_v42 = vld [vmem:[%s11656_s5 + $0x7a8] sm:$0xf0]  ;;  %v3609_v12 = vadd.f32 %v3608_v26, %v3591_v25  ;;  %3980 = vmatmul.bf16.vlgmr.msrb.gmra.mxu2 %v8652_v35 }
 0x1f0   :  { %4044 = vmatpush.bf16.msra.mxu2 %v5815_v7  ;;  %v6039_v47 = vor.u32 %v7378_v39, %v6036_v42  ;;  %v7178_v13 = vld [vmem:[%s11656_s5 + $0x14c] sm:$0xf]  ;;  %4009 = vmatpush.bf16.msra.mxu0 %v5271_v30  ;;  %v3626_v49 = vpop.f32.mrf.mxu2 }
 0x1f1   :  { %v5239_v3 = vor.u32 %v7178_v13, %v5236_v14  ;;  %v5492_v7 = vld [vmem:[%s11656_s5 + $0x368] sm:$0xf0]  ;;  %v3627_v30 = vadd.f32 %v3626_v49, %v3609_v12  ;;  %3998 = vmatmul.bf16.vlgmr.msrb.gmra.mxu3 %v8654_v59 }
 0x1f2   :  { %4062 = vmatpush.bf16.msra.mxu3 %v6071_v43  ;;  %4027 = vmatpush.bf16.msra.mxu1 %v5527_v54  ;;  %v5748_v61 = vld [vmem:[%s11656_s5 + $0x568] sm:$0xf0]  ;;  %v5495_v43 = vor.u32 %v7242_v32, %v5492_v7  ;;  %v3644_v5 = vpop.f32.mrf.mxu3 }
 0x1f3   :  { %v7370_v53 = vld [vmem:[%s11656_s5 + $0x74c] sm:$0xf]  ;;  %v5751_v6 = vor.u32 %v7306_v24, %v5748_v61  ;;  %v9432_v14 = vadd.f32 %v3644_v5, %v3627_v30 }
 0x1f4   :  { %v6004_v60 = vld [vmem:[%s11656_s5 + $0x768] sm:$0xf0]  ;;  %4045 = vmatpush.bf16.msra.mxu2 %v5783_v31  ;;  %4010 = vmatpush.bf16.msra.mxu0 %v5239_v3  ;;  %v3592_v0 = vpop.f32.mrf.mxu0  ;;  %v3610_v19 = vpop.f32.mrf.mxu1 }
 0x1f5   :  { %v6007_v17 = vor.u32 %v7370_v53, %v6004_v60  ;;  %v7170_v62 = vld [vmem:[%s11656_s5 + $0x10c] sm:$0xf] }
 0x1f6   :  { %4063 = vmatpush.bf16.msra.mxu3 %v6039_v47  ;;  %4028 = vmatpush.bf16.msra.mxu1 %v5495_v43  ;;  %v5204_v9 = vld [vmem:[%s11656_s5 + $0x128] sm:$0xf0] }
 0x1f7   :  { %v7234_v26 = vld [vmem:[%s11656_s5 + $0x30c] sm:$0xf]  ;;  %v5207_v21 = vor.u32 %v7170_v62, %v5204_v9 }
 0x1f8   :  { %v5460_v25 = vld [vmem:[%s11656_s5 + $0x328] sm:$0xf0]  ;;  %4046 = vmatpush.bf16.msra.mxu2 %v5751_v6  ;;  %v3628_v62 = vpop.f32.mrf.mxu2 }
 0x1f9   :  { %v7298_v54 = vld [vmem:[%s11656_s5 + $0x50c] sm:$0xf]  ;;  %v5463_v39 = vor.u32 %v7234_v26, %v5460_v25  ;;  %4011 = vmatpush.bf16.msra.mxu0 %v5207_v21 }
 0x1fa   :  { %v5716_v31 = vld [vmem:[%s11656_s5 + $0x528] sm:$0xf0]  ;;  %4064 = vmatpush.bf16.msra.mxu3 %v6007_v17  ;;  %v3646_v9 = vpop.f32.mrf.mxu3 }
 0x1fb   :  { %v5719_v42 = vor.u32 %v7298_v54, %v5716_v31  ;;  %v7362_v47 = vld [vmem:[%s11656_s5 + $0x70c] sm:$0xf]  ;;  %4029 = vmatpush.bf16.msra.mxu1 %v5463_v39  ;;  %3949 = vmatmul.bf16.gmra.mxu0 %v8778_v51 }
 0x1fc   :  { %v5972_v13 = vld [vmem:[%s11656_s5 + $0x728] sm:$0xf0]  ;;  %v3657_v19 = vpop.f32.mrf.mxu0  ;;  %v3675_v21 = vpop.f32.mrf.mxu1 }
 0x1fd   :  { %v5975_v32 = vor.u32 %v7362_v47, %v5972_v13  ;;  %v7162_v12 = vld [vmem:[%s11656_s5 + $0xcc] sm:$0xf]  ;;  %4047 = vmatpush.bf16.msra.mxu2 %v5719_v42  ;;  %v3658_v42 = vadd.f32 %v3657_v19, %v9351_v52  ;;  %3967 = vmatmul.bf16.gmra.mxu1 %v8780_v33 }
 0x1fe   :  { %v5172_v3 = vld [vmem:[%s11656_s5 + $0xe8] sm:$0xf0] }
 0x1ff   :  { %v7226_v7 = vld [vmem:[%s11656_s5 + $0x2cc] sm:$0xf]  ;;  %v5175_v24 = vor.u32 %v7162_v12, %v5172_v3  ;;  %4065 = vmatpush.bf16.msra.mxu3 %v5975_v32  ;;  %3985 = vmatmul.bf16.gmra.mxu2 %v8794_v36 }
 0x200   :  { %v5428_v61 = vld [vmem:[%s11656_s5 + $0x2e8] sm:$0xf0] }
 0x201   :  { %v7290_v43 = vld [vmem:[%s11656_s5 + $0x4cc] sm:$0xf]  ;;  %v5431_v60 = vor.u32 %v7226_v7, %v5428_v61  ;;  %4012 = vmatpush.bf16.msra.mxu0 %v5175_v24  ;;  %v3676_v7 = vadd.f32 %v3675_v21, %v3658_v42  ;;  %4003 = vmatmul.bf16.gmra.mxu3 %v8796_v34 }
 0x202   :  { %v5684_v53 = vld [vmem:[%s11656_s5 + $0x4e8] sm:$0xf0] }
 0x203   :  { %v5687_v6 = vor.u32 %v7290_v43, %v5684_v53  ;;  %v7354_v17 = vld [vmem:[%s11656_s5 + $0x6cc] sm:$0xf]  ;;  %4030 = vmatpush.bf16.msra.mxu1 %v5431_v60 }
 0x204   :  { %v5940_v49 = vld [vmem:[%s11656_s5 + $0x6e8] sm:$0xf0] }
 0x205   :  { %v5943_v5 = vor.u32 %v7354_v17, %v5940_v49  ;;  %v7154_v26 = vld [vmem:[%s11656_s5 + $0x8c] sm:$0xf]  ;;  %4048 = vmatpush.bf16.msra.mxu2 %v5687_v6 }
 0x206   :  { %v5140_v30 = vld [vmem:[%s11656_s5 + $0xa8] sm:$0xf0] }
 0x207   :  { %v7218_v0 = vld [vmem:[%s11656_s5 + $0x28c] sm:$0xf]  ;;  %v5143_v25 = vor.u32 %v7154_v26, %v5140_v30  ;;  %4066 = vmatpush.bf16.msra.mxu3 %v5943_v5  ;;  %v3693_v26 = vpop.f32.mrf.mxu2  ;;  %v3711_v30 = vpop.f32.mrf.mxu3 }
 0x208   :  { %v5396_v54 = vld [vmem:[%s11656_s5 + $0x2a8] sm:$0xf0] }
 0x209   :  { %v7282_v31 = vld [vmem:[%s11656_s5 + $0x48c] sm:$0xf]  ;;  %v5399_v47 = vor.u32 %v7218_v0, %v5396_v54  ;;  %4013 = vmatpush.bf16.msra.mxu0 %v5143_v25  ;;  %v3694_v25 = vadd.f32 %v3693_v26, %v3676_v7  ;;  %v3659_v54 = vpop.f32.mrf.mxu0 }
 0x20a   :  { %v5652_v39 = vld [vmem:[%s11656_s5 + $0x4a8] sm:$0xf0] }
 0x20b   :  { %v5655_v13 = vor.u32 %v7282_v31, %v5652_v39  ;;  %v7346_v32 = vld [vmem:[%s11656_s5 + $0x68c] sm:$0xf]  ;;  %4031 = vmatpush.bf16.msra.mxu1 %v5399_v47  ;;  %v3677_v31 = vpop.f32.mrf.mxu1 }
 0x20c   :  { %v5908_v12 = vld [vmem:[%s11656_s5 + $0x6a8] sm:$0xf0] }
 0x20d   :  { %v5911_v3 = vor.u32 %v7346_v32, %v5908_v12  ;;  %v7146_v52 = vld [vmem:[%s11656_s5 + $0x4c] sm:$0xf]  ;;  %4049 = vmatpush.bf16.msra.mxu2 %v5655_v13  ;;  %v3660_v32 = vadd.f32 %v3659_v54, %v9378_v44 }
 0x20e   :  { %v5108_v24 = vld [vmem:[%s11656_s5 + $0x68] sm:$0xf0] }
 0x20f   :  { %v7210_v61 = vld [vmem:[%s11656_s5 + $0x24c] sm:$0xf]  ;;  %v5111_v43 = vor.u32 %v7146_v52, %v5108_v24  ;;  %4067 = vmatpush.bf16.msra.mxu3 %v5911_v3  ;;  %v11684_v24 = vlaneseq }
 0x210   :  { %v5364_v53 = vld [vmem:[%s11656_s5 + $0x268] sm:$0xf0] }
 0x211   :  { %v7274_v60 = vld [vmem:[%s11656_s5 + $0x44c] sm:$0xf]  ;;  %v5367_v17 = vor.u32 %v7210_v61, %v5364_v53  ;;  %4014 = vmatpush.bf16.msra.mxu0 %v5111_v43  ;;  %v4898_v61 = vshrl.u32 %v11684_v24, 7  ;;  %v3712_v43 = vadd.f32 %v3711_v30, %v3694_v25  ;;  %v3662_v24 = vpop.f32.mrf.mxu0 }
 0x212   :  { %v5620_v6 = vld [vmem:[%s11656_s5 + $0x468] sm:$0xf0] }
 0x213   :  { %v5623_v49 = vor.u32 %v7274_v60, %v5620_v6  ;;  %v7338_v5 = vld [vmem:[%s11656_s5 + $0x64c] sm:$0xf]  ;;  %4032 = vmatpush.bf16.msra.mxu1 %v5367_v17  ;;  %v3678_v60 = vadd.f32 %v3677_v31, %v3660_v32  ;;  %v9565_v54 = vadd.s32 16, %v4898_v61  ;;  %v3680_v61 = vpop.f32.mrf.mxu1 }
 0x214   :  { %v5876_v62 = vld [vmem:[%s11656_s5 + $0x668] sm:$0xf0] }
 0x215   :  { %v5879_v9 = vor.u32 %v7338_v5, %v5876_v62  ;;  %v7138_v0 = vld [vmem:[%s11656_s5 + $0xc] sm:$0xf]  ;;  %4050 = vmatpush.bf16.msra.mxu2 %v5623_v49  ;;  %v11685_v49 = vunpack.c.l.bf16 %v8115_v1  ;;  %vm4907_vm5 = vcmp.lt.s32.totalorder %v9565_v54, 18 }
 0x216   :  { %v5076_v19 = vld [vmem:[%s11656_s5 + $0x28] sm:$0xf0] }
 0x217   :  { %v7202_v21 = vld [vmem:[%s11656_s5 + $0x20c] sm:$0xf]  ;;  %v5079_v39 = vor.u32 %v7138_v0, %v5076_v19  ;;  %4068 = vmatpush.bf16.msra.mxu3 %v5879_v9  ;;  %v9548_v5 = vsub.f32 %v11685_v49, %v3712_v43 }
 0x218   :  { %v5332_v42 = vld [vmem:[%s11656_s5 + $0x228] sm:$0xf0] }
 0x219   :  { %v7266_v47 = vld [vmem:[%s11656_s5 + $0x40c] sm:$0xf]  ;;  %v5335_v12 = vor.u32 %v7202_v21, %v5332_v42  ;;  %4015 = vmatpush.bf16.msra.mxu0 %v5079_v39  ;;  %v4752_v31 = vand.u32 2147483647, %v9548_v5  ;;  %v3695_v42 = vpop.f32.mrf.mxu2 }
 0x21a   :  { %v5588_v13 = vld [vmem:[%s11656_s5 + $0x428] sm:$0xf0] }
 0x21b   :  { %v5591_v3 = vor.u32 %v7266_v47, %v5588_v13  ;;  %v7330_v7 = vld [vmem:[%s11656_s5 + $0x60c] sm:$0xf]  ;;  %4033 = vmatpush.bf16.msra.mxu1 %v5335_v12  ;;  %v3713_v47 = vpop.f32.mrf.mxu3  ;;  %vm9577_vm4 = vcmp.lt.f32.partialorder %v4752_v31, 1.0 }
 0x21c   :  { %v5844_v52 = vld [vmem:[%s11656_s5 + $0x628] sm:$0xf0]  ;;  %4016 = vmatmul.bf16.vlgmr.msra.gmra.mxu0 %v8239_v38 }
 0x21d   :  { %v5847_v53 = vor.u32 %v7330_v7, %v5844_v52  ;;  %v7450_v44 = vld [vmem:[%s11656_s5 + $0x9cc] sm:$0xf]  ;;  %4051 = vmatpush.bf16.msra.mxu2 %v5591_v3  ;;  %v4800_v7 = vmul.f32 0.5, %v9548_v5  ;;  %v3696_v52 = vadd.f32 %v3695_v42, %v3678_v60  ;;  %v9689_v3 = vperm.slane %v9205_v11, 1 }
 0x21e   :  { %v6324_v6 = vld [vmem:[%s11656_s5 + $0x9e8] sm:$0xf0]  ;;  %4034 = vmatmul.bf16.vlgmr.msra.gmra.mxu1 %v8241_v41 }
 0x21f   :  { %v7514_v17 = vld [vmem:[%s11656_s5 + $0xbcc] sm:$0xf]  ;;  %v6327_v62 = vor.u32 %v7450_v44, %v6324_v6  ;;  %4069 = vmatpush.bf16.msra.mxu3 %v5847_v53  ;;  %v3663_v44 = vadd.f32 %v3662_v24, %v9432_v14 }
 0x220   :  { %v6580_v9 = vld [vmem:[%s11656_s5 + $0xbe8] sm:$0xf0]  ;;  %4052 = vmatmul.bf16.vlgmr.msra.gmra.mxu2 %v8267_v57 }
 0x221   :  { %v7578_v26 = vld [vmem:[%s11656_s5 + $0xdcc] sm:$0xf]  ;;  %v6583_v0 = vor.u32 %v7514_v17, %v6580_v9  ;;  %4080 = vmatpush.bf16.msrb.mxu0 %v6327_v62  ;;  %v3714_v9 = vadd.f32 %v3713_v47, %v3696_v52 }
 0x222   :  { %v6836_v30 = vld [vmem:[%s11656_s5 + $0xde8] sm:$0xf0]  ;;  %4070 = vmatmul.bf16.vlgmr.msra.gmra.mxu3 %v8269_v58 }
 0x223   :  { %v6839_v19 = vor.u32 %v7578_v26, %v6836_v30  ;;  %v7642_v21 = vld [vmem:[%s11656_s5 + $0xfcc] sm:$0xf]  ;;  %4098 = vmatpush.bf16.msrb.mxu1 %v6583_v0 }
 0x224   :  { %v7092_v25 = vld [vmem:[%s11656_s5 + $0xfe8] sm:$0xf0] }
 0x225   :  { %v7095_v39 = vor.u32 %v7642_v21, %v7092_v25  ;;  %4116 = vmatpush.bf16.msrb.mxu2 %v6839_v19  ;;  %v7442_v13 = vld [vmem:[%s11656_s5 + $0x98c] sm:$0xf]  ;;  %v3681_v19 = vadd.f32 %v3680_v61, %v3663_v44 }
 0x226   :  { %v6292_v32 = vld [vmem:[%s11656_s5 + $0x9a8] sm:$0xf0] }
 0x227   :  { %v7506_v12 = vld [vmem:[%s11656_s5 + $0xb8c] sm:$0xf]  ;;  %4134 = vmatpush.bf16.msrb.mxu3 %v7095_v39  ;;  %v6295_v6 = vor.u32 %v7442_v13, %v6292_v32  ;;  %v11688_v13 = vunpack.c.l.bf16 %v8072_v46 }
 0x228   :  { %v6548_v43 = vld [vmem:[%s11656_s5 + $0xba8] sm:$0xf0] }
 0x229   :  { %v7570_v53 = vld [vmem:[%s11656_s5 + $0xd8c] sm:$0xf]  ;;  %v6551_v17 = vor.u32 %v7506_v12, %v6548_v43  ;;  %4081 = vmatpush.bf16.msrb.mxu0 %v6295_v6  ;;  %v4736_v32 = vsub.f32 %v11688_v13, %v3714_v9  ;;  %v3664_v13 = vpop.f32.mrf.mxu0 }
 0x22a   :  { %v6804_v49 = vld [vmem:[%s11656_s5 + $0xda8] sm:$0xf0] }
 0x22b   :  { %v7634_v60 = vld [vmem:[%s11656_s5 + $0xf8c] sm:$0xf]  ;;  %v6807_v14 = vor.u32 %v7570_v53, %v6804_v49  ;;  %4099 = vmatpush.bf16.msrb.mxu1 %v6551_v17  ;;  %v4824_v49 = vmul.f32 %v4800_v7, %v9548_v5  ;;  %v4808_v9 = vmul.f32 0.5, %v4736_v32 }
 0x22c   :  { %v7060_v62 = vld [vmem:[%s11656_s5 + $0xfa8] sm:$0xf0]  ;;  %4021 = vmatmul.bf16.gmra.mxu0 %v8443_v15 }
 0x22d   :  { %v7434_v26 = vld [vmem:[%s11656_s5 + $0x94c] sm:$0xf]  ;;  %v7063_v21 = vor.u32 %v7634_v60, %v7060_v62  ;;  %4117 = vmatpush.bf16.msrb.mxu2 %v6807_v14  ;;  %v7112_v60 = vadd.f32 -0.5, %v4752_v31  ;;  %v4760_v62 = vand.u32 2147483647, %v4736_v32 }
 0x22e   :  { %v6260_v30 = vld [vmem:[%s11656_s5 + $0x968] sm:$0xf0]  ;;  %4039 = vmatmul.bf16.gmra.mxu1 %v8445_v16 }
 0x22f   :  { %v7498_v0 = vld [vmem:[%s11656_s5 + $0xb4c] sm:$0xf]  ;;  %v6263_v25 = vor.u32 %v7434_v26, %v6260_v30  ;;  %4135 = vmatpush.bf16.msrb.mxu3 %v7063_v21  ;;  %v3698_v26 = vpop.f32.mrf.mxu2  ;;  %v3716_v30 = vpop.f32.mrf.mxu3  ;;  %vm9654_vm6 = vcmp.lt.f32.partialorder %v4760_v62, 1.0 }
 0x230   :  { %v6516_v39 = vld [vmem:[%s11656_s5 + $0xb68] sm:$0xf0]  ;;  %4057 = vmatmul.bf16.gmra.mxu2 %v8447_v27 }
 0x231   :  { %v7562_v42 = vld [vmem:[%s11656_s5 + $0xd4c] sm:$0xf]  ;;  %v6519_v12 = vor.u32 %v7498_v0, %v6516_v39  ;;  %4082 = vmatpush.bf16.msrb.mxu0 %v6263_v25  ;;  %v4832_v25 = vmul.f32 %v4808_v9, %v4736_v32 }
 0x232   :  { %v6772_v47 = vld [vmem:[%s11656_s5 + $0xd68] sm:$0xf0]  ;;  %4075 = vmatmul.bf16.gmra.mxu3 %v8449_v56 }
 0x233   :  { %v7626_v52 = vld [vmem:[%s11656_s5 + $0xf4c] sm:$0xf]  ;;  %v6775_v43 = vor.u32 %v7562_v42, %v6772_v47  ;;  %4100 = vmatpush.bf16.msrb.mxu1 %v6519_v12  ;;  %v7120_v42 = vadd.f32 -0.5, %v4760_v62  ;;  %v3699_v47 = vadd.f32 %v3698_v26, %v3681_v19  ;;  %v3682_v12 = vpop.f32.mrf.mxu1 }
 0x234   :  { %v7028_v24 = vld [vmem:[%s11656_s5 + $0xf68] sm:$0xf0] }
 0x235   :  { %v7426_v61 = vld [vmem:[%s11656_s5 + $0x90c] sm:$0xf]  ;;  %v7031_v53 = vor.u32 %v7626_v52, %v7028_v24  ;;  %4118 = vmatpush.bf16.msrb.mxu2 %v6775_v43  ;;  %v4880_v43 = vsel %vm9654_vm6, %v4832_v25, %v7120_v42 }
 0x236   :  { %v6228_v44 = vld [vmem:[%s11656_s5 + $0x928] sm:$0xf0] }
 0x237   :  { %v7490_v6 = vld [vmem:[%s11656_s5 + $0xb0c] sm:$0xf]  ;;  %v6231_v0 = vor.u32 %v7426_v61, %v6228_v44  ;;  %4136 = vmatpush.bf16.msrb.mxu3 %v7031_v53  ;;  %v3717_v53 = vadd.f32 %v3716_v30, %v3699_v47 }
 0x238   :  { %v6484_v17 = vld [vmem:[%s11656_s5 + $0xb28] sm:$0xf0] }
 0x239   :  { %v7554_v14 = vld [vmem:[%s11656_s5 + $0xd0c] sm:$0xf]  ;;  %v6487_v21 = vor.u32 %v7490_v6, %v6484_v17  ;;  %v4872_v17 = vsel %vm9577_vm4, %v4824_v49, %v7112_v60  ;;  %4083 = vmatpush.bf16.msrb.mxu0 %v6231_v0 }
 0x23a   :  { %v6740_v39 = vld [vmem:[%s11656_s5 + $0xd28] sm:$0xf0]  ;;  %v9686_v26 = vadd.f32 %v4880_v43, %v4872_v17 }
 0x23b   :  { %v7618_v5 = vld [vmem:[%s11656_s5 + $0xf0c] sm:$0xf]  ;;  %v6743_v61 = vor.u32 %v7554_v14, %v6740_v39  ;;  %4101 = vmatpush.bf16.msrb.mxu1 %v6487_v21  ;;  %v11691_v39 = vunpack.c.l.bf16 %v8254_v48 }
 0x23c   :  { %v6996_v31 = vld [vmem:[%s11656_s5 + $0xf28] sm:$0xf0] }
 0x23d   :  { %v7418_v52 = vld [vmem:[%s11656_s5 + $0x8cc] sm:$0xf]  ;;  %v6999_v44 = vor.u32 %v7618_v5, %v6996_v31  ;;  %v4744_v5 = vsub.f32 %v11691_v39, %v3717_v53  ;;  %4119 = vmatpush.bf16.msrb.mxu2 %v6743_v61 }
 0x23e   :  { %v6196_v24 = vld [vmem:[%s11656_s5 + $0x8e8] sm:$0xf0] }
 0x23f   :  { %v7482_v32 = vld [vmem:[%s11656_s5 + $0xacc] sm:$0xf]  ;;  %v6199_v49 = vor.u32 %v7418_v52, %v6196_v24  ;;  %4137 = vmatpush.bf16.msrb.mxu3 %v6999_v44  ;;  %v4768_v13 = vand.u32 2147483647, %v4744_v5  ;;  %v4816_v12 = vmul.f32 0.5, %v4744_v5  ;;  %v11692_v24 = vmov 0.0   ;;  %v3700_v44 = vpop.f32.mrf.mxu2 }
 0x240   :  { %v6452_v19 = vld [vmem:[%s11656_s5 + $0xae8] sm:$0xf0]  ;;  %v9720_v61 = vsel %vm4907_vm5, 1.0, %v11692_v24 }
 0x241   :  { %v7546_v6 = vld [vmem:[%s11656_s5 + $0xccc] sm:$0xf]  ;;  %v6455_v60 = vor.u32 %v7482_v32, %v6452_v19  ;;  %v3718_v32 = vpop.f32.mrf.mxu3  ;;  %4084 = vmatpush.bf16.msrb.mxu0 %v6199_v49  ;;  %vm9728_vm7 = vcmp.lt.f32.partialorder %v4768_v13, 1.0  ;;  %v4840_v54 = vmul.f32 %v4816_v12, %v4744_v5 }
 0x242   :  { %v6708_v62 = vld [vmem:[%s11656_s5 + $0xce8] sm:$0xf0] }
 0x243   :  { %v7610_v9 = vld [vmem:[%s11656_s5 + $0xecc] sm:$0xf]  ;;  %v6711_v21 = vor.u32 %v7546_v6, %v6708_v62  ;;  %4102 = vmatpush.bf16.msrb.mxu1 %v6455_v60  ;;  %v7128_v62 = vadd.f32 -0.5, %v4768_v13 }
 0x244   :  { %v6964_v14 = vld [vmem:[%s11656_s5 + $0xee8] sm:$0xf0] }
 0x245   :  { %v7410_v30 = vld [vmem:[%s11656_s5 + $0x88c] sm:$0xf]  ;;  %v6967_v7 = vor.u32 %v7610_v9, %v6964_v14  ;;  %v3729_v9 = vpop.f32.mrf.mxu0  ;;  %v3747_v14 = vpop.f32.mrf.mxu1  ;;  %4120 = vmatpush.bf16.msrb.mxu2 %v6711_v21 }
 0x246   :  { %v6164_v31 = vld [vmem:[%s11656_s5 + $0x8a8] sm:$0xf0] }
 0x247   :  { %v7474_v11 = vld [vmem:[%s11656_s5 + $0xa8c] sm:$0xf]  ;;  %v6167_v19 = vor.u32 %v7410_v30, %v6164_v31  ;;  %v3730_v30 = vadd.f32 %v3729_v9, %v9689_v3  ;;  %4138 = vmatpush.bf16.msrb.mxu3 %v6967_v7  ;;  %v5562_v9 = vld [vmem:[%s11656_s5 + $0x3d0] sm:$0xf] }
 0x248   :  { %v6420_v0 = vld [vmem:[%s11656_s5 + $0xaa8] sm:$0xf0] }
 0x249   :  { %v7538_v25 = vld [vmem:[%s11656_s5 + $0xc8c] sm:$0xf]  ;;  %v6423_v6 = vor.u32 %v7474_v11, %v6420_v0  ;;  %v4888_v11 = vsel %vm9728_vm7, %v4840_v54, %v7128_v62  ;;  %4085 = vmatpush.bf16.msrb.mxu0 %v6167_v19  ;;  %v5306_v62 = vld [vmem:[%s11656_s5 + $0x1d0] sm:$0xf] }
 0x24a   :  { %v6676_v42 = vld [vmem:[%s11656_s5 + $0xca8] sm:$0xf0] }
 0x24b   :  { %v7602_v47 = vld [vmem:[%s11656_s5 + $0xe8c] sm:$0xf]  ;;  %v6679_v39 = vor.u32 %v7538_v25, %v6676_v42  ;;  %v4930_v25 = vmul.f32 %v9720_v61, %v4888_v11  ;;  %v3748_v42 = vadd.f32 %v3747_v14, %v3730_v30  ;;  %4103 = vmatpush.bf16.msrb.mxu1 %v6423_v6  ;;  %v7263_v14 = vld [vmem:[%s11656_s5 + $0x3ec] sm:$0xf0] }
 0x24c   :  { %v6932_v52 = vld [vmem:[%s11656_s5 + $0xea8] sm:$0xf0] }
 0x24d   :  { %v7402_v17 = vld [vmem:[%s11656_s5 + $0x84c] sm:$0xf]  ;;  %v6935_v31 = vor.u32 %v7602_v47, %v6932_v52  ;;  %v9777_v6 = vadd.f32 %v9686_v26, %v4930_v25  ;;  %4121 = vmatpush.bf16.msrb.mxu2 %v6679_v39  ;;  %v7199_v26 = vld [vmem:[%s11656_s5 + $0x1ec] sm:$0xf0]  ;;  %v5563_v25 = vor.u32 %v7263_v14, %v5562_v9 }
 0x24e   :  { %v6132_v43 = vld [vmem:[%s11656_s5 + $0x868] sm:$0xf0]  ;;  %v5530_v14 = vld [vmem:[%s11656_s5 + $0x390] sm:$0xf] }
 0x24f   :  { %v7466_v49 = vld [vmem:[%s11656_s5 + $0xa4c] sm:$0xf]  ;;  %v6135_v0 = vor.u32 %v7402_v17, %v6132_v43  ;;  %4139 = vmatpush.bf16.msrb.mxu3 %v6935_v31  ;;  %v5818_v31 = vld [vmem:[%s11656_s5 + $0x5d0] sm:$0xf] }
 0x250   :  { %v6388_v60 = vld [vmem:[%s11656_s5 + $0xa68] sm:$0xf0] }
 0x251   :  { %v7530_v5 = vld [vmem:[%s11656_s5 + $0xc4c] sm:$0xf]  ;;  %v6391_v47 = vor.u32 %v7466_v49, %v6388_v60  ;;  %v3765_v49 = vpop.f32.mrf.mxu2  ;;  %v3783_v60 = vpop.f32.mrf.mxu3  ;;  %4086 = vmatpush.bf16.msrb.mxu0 %v6135_v0  ;;  %v6074_v0 = vld [vmem:[%s11656_s5 + $0x7d0] sm:$0xf] }
 0x252   :  { %v6644_v13 = vld [vmem:[%s11656_s5 + $0xc68] sm:$0xf0]  ;;  %v3766_v11 = vadd.f32 %v3765_v49, %v3748_v42 }
 0x253   :  { %v7594_v21 = vld [vmem:[%s11656_s5 + $0xe4c] sm:$0xf]  ;;  %v6647_v17 = vor.u32 %v7530_v5, %v6644_v13  ;;  %4104 = vmatpush.bf16.msrb.mxu1 %v6391_v47  ;;  %v7327_v5 = vld [vmem:[%s11656_s5 + $0x5ec] sm:$0xf0]  ;;  %v3731_v13 = vpop.f32.mrf.mxu0 }
 0x254   :  { %v6900_v7 = vld [vmem:[%s11656_s5 + $0xe68] sm:$0xf0]  ;;  %v7391_v47 = vld [vmem:[%s11656_s5 + $0x7ec] sm:$0xf0]  ;;  %v5819_v42 = vor.u32 %v7327_v5, %v5818_v31 }
 0x255   :  { %v7394_v12 = vld [vmem:[%s11656_s5 + $0x80c] sm:$0xf]  ;;  %v6903_v43 = vor.u32 %v7594_v21, %v6900_v7  ;;  %v3749_v21 = vpop.f32.mrf.mxu1  ;;  %v5307_v7 = vor.u32 %v7199_v26, %v5306_v62  ;;  %4122 = vmatpush.bf16.msrb.mxu2 %v6647_v17  ;;  %v6075_v49 = vor.u32 %v7391_v47, %v6074_v0  ;;  %v7319_v5 = vld [vmem:[%s11656_s5 + $0x5ac] sm:$0xf0] }
 0x256   :  { %v6100_v52 = vld [vmem:[%s11656_s5 + $0x828] sm:$0xf0]  ;;  %v7183_v0 = vld [vmem:[%s11656_s5 + $0x16c] sm:$0xf0] }
 0x257   :  { %v7458_v24 = vld [vmem:[%s11656_s5 + $0xa0c] sm:$0xf]  ;;  %v6103_v30 = vor.u32 %v7394_v12, %v6100_v52  ;;  %v3732_v12 = vadd.f32 %v3731_v13, %v9689_v3  ;;  %4140 = vmatpush.bf16.msrb.mxu3 %v6903_v43  ;;  %v7383_v13 = vld [vmem:[%s11656_s5 + $0x7ac] sm:$0xf0] }
 0x258   :  { %v6356_v44 = vld [vmem:[%s11656_s5 + $0xa28] sm:$0xf0]  ;;  %v5498_v47 = vld [vmem:[%s11656_s5 + $0x350] sm:$0xf] }
 0x259   :  { %v7522_v32 = vld [vmem:[%s11656_s5 + $0xc0c] sm:$0xf]  ;;  %v6359_v39 = vor.u32 %v7458_v24, %v6356_v44  ;;  %v9810_v44 = vadd.f32 %v3783_v60, %v3766_v11  ;;  %v3750_v62 = vadd.f32 %v3749_v21, %v3732_v12  ;;  %4087 = vmatpush.bf16.msrb.mxu0 %v6103_v30  ;;  %v3767_v26 = vpop.f32.mrf.mxu2  ;;  %v3785_v9 = vpop.f32.mrf.mxu3  ;;  %v7255_v60 = vld [vmem:[%s11656_s5 + $0x3ac] sm:$0xf0] }
 0x25a   :  { %v6612_v19 = vld [vmem:[%s11656_s5 + $0xc28] sm:$0xf0]  ;;  %v5786_v30 = vld [vmem:[%s11656_s5 + $0x590] sm:$0xf]  ;;  %v5531_v31 = vor.u32 %v7255_v60, %v5530_v14 }
 0x25b   :  { %v7586_v53 = vld [vmem:[%s11656_s5 + $0xe0c] sm:$0xf]  ;;  %v6615_v52 = vor.u32 %v7522_v32, %v6612_v19  ;;  %4105 = vmatpush.bf16.msrb.mxu1 %v6359_v39  ;;  %v5274_v32 = vld [vmem:[%s11656_s5 + $0x190] sm:$0xf]  ;;  %v3768_v17 = vadd.f32 %v3767_v26, %v3750_v62  ;;  %v3734_v43 = vpop.f32.mrf.mxu0 }
 0x25c   :  { %v6868_v54 = vld [vmem:[%s11656_s5 + $0xe28] sm:$0xf0]  ;;  %v7191_v19 = vld [vmem:[%s11656_s5 + $0x1ac] sm:$0xf0]  ;;  %v3735_v39 = vadd.f32 %v3734_v43, %v9689_v3  ;;  %v5787_v3 = vor.u32 %v7319_v5, %v5786_v30  ;;  %4088 = vmatmul.bf16.vlgmr.msrb.gmra.mxu0 %v8626_v4 }
 0x25d   :  { %v6871_v24 = vor.u32 %v7586_v53, %v6868_v54  ;;  %4152 = vmatpush.bf16.msra.mxu0 %v5307_v7  ;;  %4123 = vmatpush.bf16.msrb.mxu2 %v6615_v52  ;;  %v3752_v53 = vpop.f32.mrf.mxu1  ;;  %v5275_v54 = vor.u32 %v7191_v19, %v5274_v32  ;;  %v6042_v11 = vld [vmem:[%s11656_s5 + $0x790] sm:$0xf]  ;;  %v9837_v21 = vadd.f32 %v3785_v9, %v3768_v17 }
 0x25e   :  { %v6043_v7 = vor.u32 %v7383_v13, %v6042_v11  ;;  %v3753_v12 = vadd.f32 %v3752_v53, %v3735_v39  ;;  %v6010_v26 = vld [vmem:[%s11656_s5 + $0x750] sm:$0xf]  ;;  %4106 = vmatmul.bf16.vlgmr.msrb.gmra.mxu1 %v8628_v45 }
 0x25f   :  { %4170 = vmatpush.bf16.msra.mxu1 %v5563_v25  ;;  %4141 = vmatpush.bf16.msrb.mxu3 %v6871_v24  ;;  %v5242_v25 = vld [vmem:[%s11656_s5 + $0x150] sm:$0xf] }
 0x260   :  { %v5243_v52 = vor.u32 %v7183_v0, %v5242_v25  ;;  %v7247_v24 = vld [vmem:[%s11656_s5 + $0x36c] sm:$0xf0]  ;;  %4124 = vmatmul.bf16.vlgmr.msrb.gmra.mxu2 %v8652_v35 }
 0x261   :  { %4188 = vmatpush.bf16.msra.mxu2 %v5819_v42  ;;  %4153 = vmatpush.bf16.msra.mxu0 %v5275_v54  ;;  %v5754_v42 = vld [vmem:[%s11656_s5 + $0x550] sm:$0xf]  ;;  %v5499_v62 = vor.u32 %v7247_v24, %v5498_v47  ;;  %v3770_v17 = vpop.f32.mrf.mxu2  ;;  %v3788_v43 = vpop.f32.mrf.mxu3 }
 0x262   :  { %v7375_v9 = vld [vmem:[%s11656_s5 + $0x76c] sm:$0xf0]  ;;  %v3771_v60 = vadd.f32 %v3770_v17, %v3753_v12  ;;  %4142 = vmatmul.bf16.vlgmr.msrb.gmra.mxu3 %v8654_v59 }
 0x263   :  { %4206 = vmatpush.bf16.msra.mxu3 %v6075_v49  ;;  %4171 = vmatpush.bf16.msra.mxu1 %v5531_v31  ;;  %v7311_v49 = vld [vmem:[%s11656_s5 + $0x56c] sm:$0xf0]  ;;  %v6011_v19 = vor.u32 %v7375_v9, %v6010_v26  ;;  %v3736_v30 = vpop.f32.mrf.mxu0 }
 0x264   :  { %v5755_v32 = vor.u32 %v7311_v49, %v5754_v42  ;;  %v5210_v53 = vld [vmem:[%s11656_s5 + $0x110] sm:$0xf]  ;;  %v9891_v47 = vadd.f32 %v3788_v43, %v3771_v60 }
 0x265   :  { %4189 = vmatpush.bf16.msra.mxu2 %v5787_v3  ;;  %4154 = vmatpush.bf16.msra.mxu0 %v5243_v52  ;;  %v7175_v54 = vld [vmem:[%s11656_s5 + $0x12c] sm:$0xf0]  ;;  %v3754_v39 = vpop.f32.mrf.mxu1 }
 0x266   :  { %v5466_v14 = vld [vmem:[%s11656_s5 + $0x310] sm:$0xf]  ;;  %v5211_v31 = vor.u32 %v7175_v54, %v5210_v53 }
 0x267   :  { %4207 = vmatpush.bf16.msra.mxu3 %v6043_v7  ;;  %4172 = vmatpush.bf16.msra.mxu1 %v5499_v62  ;;  %v7239_v5 = vld [vmem:[%s11656_s5 + $0x32c] sm:$0xf0] }
 0x268   :  { %v5722_v11 = vld [vmem:[%s11656_s5 + $0x510] sm:$0xf]  ;;  %v5467_v3 = vor.u32 %v7239_v5, %v5466_v14 }
 0x269   :  { %v7303_v13 = vld [vmem:[%s11656_s5 + $0x52c] sm:$0xf0]  ;;  %4190 = vmatpush.bf16.msra.mxu2 %v5755_v32  ;;  %4155 = vmatpush.bf16.msra.mxu0 %v5211_v31  ;;  %v3772_v54 = vpop.f32.mrf.mxu2  ;;  %v3790_v14 = vpop.f32.mrf.mxu3 }
 0x26a   :  { %v5723_v7 = vor.u32 %v7303_v13, %v5722_v11  ;;  %v5978_v25 = vld [vmem:[%s11656_s5 + $0x710] sm:$0xf] }
 0x26b   :  { %4208 = vmatpush.bf16.msra.mxu3 %v6011_v19  ;;  %v7367_v0 = vld [vmem:[%s11656_s5 + $0x72c] sm:$0xf0]  ;;  %4173 = vmatpush.bf16.msra.mxu1 %v5467_v3  ;;  %v3801_v31 = vpop.f32.mrf.mxu0 }
 0x26c   :  { %v5979_v12 = vor.u32 %v7367_v0, %v5978_v25  ;;  %v5178_v52 = vld [vmem:[%s11656_s5 + $0xd0] sm:$0xf]  ;;  %v3802_v25 = vadd.f32 %v3801_v31, %v9810_v44  ;;  %4093 = vmatmul.bf16.gmra.mxu0 %v8778_v51 }
 0x26d   :  { %v7167_v24 = vld [vmem:[%s11656_s5 + $0xec] sm:$0xf0]  ;;  %4191 = vmatpush.bf16.msra.mxu2 %v5723_v7  ;;  %v3819_v5 = vpop.f32.mrf.mxu1 }
 0x26e   :  { %v5434_v42 = vld [vmem:[%s11656_s5 + $0x2d0] sm:$0xf]  ;;  %v5179_v49 = vor.u32 %v7167_v24, %v5178_v52  ;;  %4111 = vmatmul.bf16.gmra.mxu1 %v8780_v33 }
 0x26f   :  { %v7231_v62 = vld [vmem:[%s11656_s5 + $0x2ec] sm:$0xf0]  ;;  %4209 = vmatpush.bf16.msra.mxu3 %v5979_v12 }
 0x270   :  { %v5690_v26 = vld [vmem:[%s11656_s5 + $0x4d0] sm:$0xf]  ;;  %v5435_v32 = vor.u32 %v7231_v62, %v5434_v42  ;;  %4156 = vmatpush.bf16.msra.mxu0 %v5179_v49  ;;  %v3820_v49 = vadd.f32 %v3819_v5, %v3802_v25  ;;  %4129 = vmatmul.bf16.gmra.mxu2 %v8794_v36 }
 0x271   :  { %v7295_v9 = vld [vmem:[%s11656_s5 + $0x4ec] sm:$0xf0] }
 0x272   :  { %v5691_v19 = vor.u32 %v7295_v9, %v5690_v26  ;;  %v5946_v17 = vld [vmem:[%s11656_s5 + $0x6d0] sm:$0xf]  ;;  %4174 = vmatpush.bf16.msra.mxu1 %v5435_v32  ;;  %4147 = vmatmul.bf16.gmra.mxu3 %v8796_v34 }
 0x273   :  { %v7359_v43 = vld [vmem:[%s11656_s5 + $0x6ec] sm:$0xf0] }
 0x274   :  { %v5947_v53 = vor.u32 %v7359_v43, %v5946_v17  ;;  %v5146_v60 = vld [vmem:[%s11656_s5 + $0x90] sm:$0xf]  ;;  %4192 = vmatpush.bf16.msra.mxu2 %v5691_v19 }
 0x275   :  { %v7159_v30 = vld [vmem:[%s11656_s5 + $0xac] sm:$0xf0] }
 0x276   :  { %v5402_v39 = vld [vmem:[%s11656_s5 + $0x290] sm:$0xf]  ;;  %v5147_v11 = vor.u32 %v7159_v30, %v5146_v60  ;;  %4210 = vmatpush.bf16.msra.mxu3 %v5947_v53  ;;  %v3837_v30 = vpop.f32.mrf.mxu2 }
 0x277   :  { %v7223_v13 = vld [vmem:[%s11656_s5 + $0x2ac] sm:$0xf0] }
 0x278   :  { %v5658_v3 = vld [vmem:[%s11656_s5 + $0x490] sm:$0xf]  ;;  %v5403_v0 = vor.u32 %v7223_v13, %v5402_v39  ;;  %4157 = vmatpush.bf16.msra.mxu0 %v5147_v11  ;;  %v3855_v39 = vpop.f32.mrf.mxu3  ;;  %v3838_v13 = vadd.f32 %v3837_v30, %v3820_v49 }
 0x279   :  { %v7287_v7 = vld [vmem:[%s11656_s5 + $0x4ac] sm:$0xf0] }
 0x27a   :  { %v5659_v12 = vor.u32 %v7287_v7, %v5658_v3  ;;  %v5914_v52 = vld [vmem:[%s11656_s5 + $0x690] sm:$0xf]  ;;  %4175 = vmatpush.bf16.msra.mxu1 %v5403_v0  ;;  %v3803_v3 = vpop.f32.mrf.mxu0  ;;  %v3821_v7 = vpop.f32.mrf.mxu1 }
 0x27b   :  { %v7351_v24 = vld [vmem:[%s11656_s5 + $0x6ac] sm:$0xf0] }
 0x27c   :  { %v5915_v42 = vor.u32 %v7351_v24, %v5914_v52  ;;  %v5114_v44 = vld [vmem:[%s11656_s5 + $0x50] sm:$0xf]  ;;  %4193 = vmatpush.bf16.msra.mxu2 %v5659_v12  ;;  %v3804_v24 = vadd.f32 %v3803_v3, %v9837_v21 }
 0x27d   :  { %v7151_v62 = vld [vmem:[%s11656_s5 + $0x6c] sm:$0xf0] }
 0x27e   :  { %v5370_v26 = vld [vmem:[%s11656_s5 + $0x250] sm:$0xf]  ;;  %v5115_v9 = vor.u32 %v7151_v62, %v5114_v44  ;;  %4211 = vmatpush.bf16.msra.mxu3 %v5915_v42  ;;  %v3839_v3 = vpop.f32.mrf.mxu2 }
 0x27f   :  { %v7215_v32 = vld [vmem:[%s11656_s5 + $0x26c] sm:$0xf0] }
 0x280   :  { %v5626_v19 = vld [vmem:[%s11656_s5 + $0x450] sm:$0xf]  ;;  %v5371_v43 = vor.u32 %v7215_v32, %v5370_v26  ;;  %4158 = vmatpush.bf16.msra.mxu0 %v5115_v9  ;;  %v3856_v26 = vadd.f32 %v3855_v39, %v3838_v13  ;;  %v3822_v32 = vadd.f32 %v3821_v7, %v3804_v24  ;;  %v3857_v7 = vpop.f32.mrf.mxu3 }
 0x281   :  { %v7279_v17 = vld [vmem:[%s11656_s5 + $0x46c] sm:$0xf0] }
 0x282   :  { %v5627_v53 = vor.u32 %v7279_v17, %v5626_v19  ;;  %v5882_v54 = vld [vmem:[%s11656_s5 + $0x650] sm:$0xf]  ;;  %4176 = vmatpush.bf16.msra.mxu1 %v5371_v43  ;;  %v11695_v43 = vunpack.c.h.bf16 %v8115_v1  ;;  %v3840_v24 = vadd.f32 %v3839_v3, %v3822_v32  ;;  %v11698_v3 = vunpack.c.h.bf16 %v8072_v46 }
 0x283   :  { %v7343_v14 = vld [vmem:[%s11656_s5 + $0x66c] sm:$0xf0] }
 0x284   :  { %v5883_v60 = vor.u32 %v7343_v14, %v5882_v54  ;;  %v5082_v31 = vld [vmem:[%s11656_s5 + $0x10] sm:$0xf]  ;;  %4194 = vmatpush.bf16.msra.mxu2 %v5627_v53  ;;  %v4729_v53 = vsub.f32 %v11695_v43, %v3856_v26  ;;  %v4940_v43 = vrot.slane %v9777_v6, 4 }
 0x285   :  { %v7143_v5 = vld [vmem:[%s11656_s5 + $0x2c] sm:$0xf0] }
 0x286   :  { %v5338_v11 = vld [vmem:[%s11656_s5 + $0x210] sm:$0xf]  ;;  %v5083_v25 = vor.u32 %v7143_v5, %v5082_v31  ;;  %4212 = vmatpush.bf16.msra.mxu3 %v5883_v60 }
 0x287   :  { %v7207_v0 = vld [vmem:[%s11656_s5 + $0x22c] sm:$0xf0] }
 0x288   :  { %v5594_v12 = vld [vmem:[%s11656_s5 + $0x410] sm:$0xf]  ;;  %v5339_v42 = vor.u32 %v7207_v0, %v5338_v11  ;;  %4159 = vmatpush.bf16.msra.mxu0 %v5083_v25  ;;  %v4753_v11 = vand.u32 2147483647, %v4729_v53 }
 0x289   :  { %v7271_v52 = vld [vmem:[%s11656_s5 + $0x42c] sm:$0xf0] }
 0x28a   :  { %v5595_v49 = vor.u32 %v7271_v52, %v5594_v12  ;;  %v5850_v44 = vld [vmem:[%s11656_s5 + $0x610] sm:$0xf]  ;;  %4177 = vmatpush.bf16.msra.mxu1 %v5339_v42  ;;  %v4801_v52 = vmul.f32 0.5, %v4729_v53  ;;  %v3806_v42 = vpop.f32.mrf.mxu0  ;;  %vm10057_vm8 = vcmp.lt.f32.partialorder %v4753_v11, 1.0 }
 0x28b   :  { %v7335_v62 = vld [vmem:[%s11656_s5 + $0x62c] sm:$0xf0]  ;;  %v3807_v26 = vadd.f32 %v3806_v42, %v9891_v47  ;;  %v10052_v47 = vld [vmem:[%s11659_s6] sm:$0xff]  ;;  %4160 = vmatmul.bf16.vlgmr.msra.gmra.mxu0 %v8239_v38 }
 0x28c   :  { %v5851_v9 = vor.u32 %v7335_v62, %v5850_v44  ;;  %v6330_v21 = vld [vmem:[%s11656_s5 + $0x9d0] sm:$0xf]  ;;  %4195 = vmatpush.bf16.msra.mxu2 %v5595_v49  ;;  %v3824_v49 = vpop.f32.mrf.mxu1 }
 0x28d   :  { %v7455_v19 = vld [vmem:[%s11656_s5 + $0x9ec] sm:$0xf0]  ;;  %4178 = vmatmul.bf16.vlgmr.msra.gmra.mxu1 %v8241_v41 }
 0x28e   :  { %v6586_v17 = vld [vmem:[%s11656_s5 + $0xbd0] sm:$0xf]  ;;  %v6331_v54 = vor.u32 %v7455_v19, %v6330_v21  ;;  %4213 = vmatpush.bf16.msra.mxu3 %v5851_v9 }
 0x28f   :  { %v7519_v14 = vld [vmem:[%s11656_s5 + $0xbec] sm:$0xf0]  ;;  %4196 = vmatmul.bf16.vlgmr.msra.gmra.mxu2 %v8267_v57 }
 0x290   :  { %v6842_v60 = vld [vmem:[%s11656_s5 + $0xdd0] sm:$0xf]  ;;  %v6587_v39 = vor.u32 %v7519_v14, %v6586_v17  ;;  %4224 = vmatpush.bf16.msrb.mxu0 %v6331_v54  ;;  %v3858_v54 = vadd.f32 %v3857_v7, %v3840_v24  ;;  %v10055_v14 = vperm.slane %v10052_v47, 2  ;;  %v4825_v24 = vmul.f32 %v4801_v52, %v4729_v53  ;;  %v3842_v52 = vpop.f32.mrf.mxu2 }
 0x291   :  { %v7583_v30 = vld [vmem:[%s11656_s5 + $0xdec] sm:$0xf0]  ;;  %4214 = vmatmul.bf16.vlgmr.msra.gmra.mxu3 %v8269_v58 }
 0x292   :  { %v6843_v31 = vor.u32 %v7583_v30, %v6842_v60  ;;  %v7098_v1 = vld [vmem:[%s11656_s5 + $0xfd0] sm:$0xf]  ;;  %4242 = vmatpush.bf16.msrb.mxu1 %v6587_v39  ;;  %v7113_v39 = vadd.f32 -0.5, %v4753_v11  ;;  %v4737_v7 = vsub.f32 %v11698_v3, %v3858_v54  ;;  %v3808_v3 = vpop.f32.mrf.mxu0 }
 0x293   :  { %v7647_v5 = vld [vmem:[%s11656_s5 + $0xfec] sm:$0xf0]  ;;  %v10158_v3 = vadd.f32 %v4940_v43, %v9777_v6 }
 0x294   :  { %v7099_v13 = vor.u32 %v7647_v5, %v7098_v1  ;;  %4260 = vmatpush.bf16.msrb.mxu2 %v6843_v31  ;;  %v6298_v25 = vld [vmem:[%s11656_s5 + $0x990] sm:$0xf]  ;;  %v3825_v31 = vadd.f32 %v3824_v49, %v3807_v26  ;;  %v4809_v26 = vmul.f32 0.5, %v4737_v7 }
 0x295   :  { %v7447_v0 = vld [vmem:[%s11656_s5 + $0x9ac] sm:$0xf0] }
 0x296   :  { %v6554_v12 = vld [vmem:[%s11656_s5 + $0xb90] sm:$0xf]  ;;  %4278 = vmatpush.bf16.msrb.mxu3 %v7099_v13  ;;  %v6299_v9 = vor.u32 %v7447_v0, %v6298_v25 }
 0x297   :  { %v7511_v44 = vld [vmem:[%s11656_s5 + $0xbac] sm:$0xf0] }
 0x298   :  { %v6810_v62 = vld [vmem:[%s11656_s5 + $0xd90] sm:$0xf]  ;;  %v6555_v21 = vor.u32 %v7511_v44, %v6554_v12  ;;  %4225 = vmatpush.bf16.msrb.mxu0 %v6299_v9  ;;  %v3844_v43 = vpop.f32.mrf.mxu2 }
 0x299   :  { %v7575_v19 = vld [vmem:[%s11656_s5 + $0xdac] sm:$0xf0] }
 0x29a   :  { %v7066_v32 = vld [vmem:[%s11656_s5 + $0xf90] sm:$0xf]  ;;  %v6811_v60 = vor.u32 %v7575_v19, %v6810_v62  ;;  %4243 = vmatpush.bf16.msrb.mxu1 %v6555_v21  ;;  %v4761_v62 = vand.u32 2147483647, %v4737_v7  ;;  %v3860_v19 = vpop.f32.mrf.mxu3 }
 0x29b   :  { %v7639_v17 = vld [vmem:[%s11656_s5 + $0xfac] sm:$0xf0]  ;;  %4165 = vmatmul.bf16.gmra.mxu0 %v8443_v15 }
 0x29c   :  { %v7067_v1 = vor.u32 %v7639_v17, %v7066_v32  ;;  %v6266_v5 = vld [vmem:[%s11656_s5 + $0x950] sm:$0xf]  ;;  %4261 = vmatpush.bf16.msrb.mxu2 %v6811_v60  ;;  %vm10101_vm9 = vcmp.lt.f32.partialorder %v4761_v62, 1.0 }
 0x29d   :  { %v7439_v13 = vld [vmem:[%s11656_s5 + $0x96c] sm:$0xf0]  ;;  %4183 = vmatmul.bf16.gmra.mxu1 %v8445_v16 }
 0x29e   :  { %v6267_v11 = vor.u32 %v7439_v13, %v6266_v5  ;;  %v6522_v25 = vld [vmem:[%s11656_s5 + $0xb50] sm:$0xf]  ;;  %4279 = vmatpush.bf16.msrb.mxu3 %v7067_v1  ;;  %v4833_v1 = vmul.f32 %v4809_v26, %v4737_v7  ;;  %v7121_v5 = vadd.f32 -0.5, %v4761_v62  ;;  %v3843_v13 = vadd.f32 %v3842_v52, %v3825_v31 }
 0x29f   :  { %v7503_v0 = vld [vmem:[%s11656_s5 + $0xb6c] sm:$0xf0]  ;;  %4201 = vmatmul.bf16.gmra.mxu2 %v8447_v27 }
 0x2a0   :  { %v6778_v12 = vld [vmem:[%s11656_s5 + $0xd50] sm:$0xf]  ;;  %v6523_v46 = vor.u32 %v7503_v0, %v6522_v25  ;;  %4226 = vmatpush.bf16.msrb.mxu0 %v6267_v11  ;;  %v3826_v11 = vpop.f32.mrf.mxu1  ;;  %v4881_v62 = vsel %vm10101_vm9, %v4833_v1, %v7121_v5  ;;  %v3861_v26 = vadd.f32 %v3860_v19, %v3843_v13 }
 0x2a1   :  { %v7567_v42 = vld [vmem:[%s11656_s5 + $0xd6c] sm:$0xf0]  ;;  %4219 = vmatmul.bf16.gmra.mxu3 %v8449_v56 }
 0x2a2   :  { %v7034_v49 = vld [vmem:[%s11656_s5 + $0xf50] sm:$0xf]  ;;  %v6779_v9 = vor.u32 %v7567_v42, %v6778_v12  ;;  %4244 = vmatpush.bf16.msrb.mxu1 %v6523_v46 }
 0x2a3   :  { %v7631_v44 = vld [vmem:[%s11656_s5 + $0xf6c] sm:$0xf0] }
 0x2a4   :  { %v7035_v21 = vor.u32 %v7631_v44, %v7034_v49  ;;  %v6234_v53 = vld [vmem:[%s11656_s5 + $0x910] sm:$0xf]  ;;  %4262 = vmatpush.bf16.msrb.mxu2 %v6779_v9  ;;  %v4873_v44 = vsel %vm10057_vm8, %v4825_v24, %v7113_v39 }
 0x2a5   :  { %v7431_v32 = vld [vmem:[%s11656_s5 + $0x92c] sm:$0xf0] }
 0x2a6   :  { %v6490_v17 = vld [vmem:[%s11656_s5 + $0xb10] sm:$0xf]  ;;  %4280 = vmatpush.bf16.msrb.mxu3 %v7035_v21  ;;  %v6235_v12 = vor.u32 %v7431_v32, %v6234_v53  ;;  %v10133_v32 = vadd.f32 %v4881_v62, %v4873_v44 }
 0x2a7   :  { %v7495_v54 = vld [vmem:[%s11656_s5 + $0xb2c] sm:$0xf0] }
 0x2a8   :  { %v6746_v25 = vld [vmem:[%s11656_s5 + $0xd10] sm:$0xf]  ;;  %v6491_v46 = vor.u32 %v7495_v54, %v6490_v17  ;;  %4227 = vmatpush.bf16.msrb.mxu0 %v6235_v12  ;;  %v11701_v54 = vunpack.c.h.bf16 %v8254_v48 }
 0x2a9   :  { %v7559_v0 = vld [vmem:[%s11656_s5 + $0xd2c] sm:$0xf0] }
 0x2aa   :  { %v6747_v42 = vor.u32 %v7559_v0, %v6746_v25  ;;  %v7002_v7 = vld [vmem:[%s11656_s5 + $0xf10] sm:$0xf]  ;;  %4245 = vmatpush.bf16.msrb.mxu1 %v6491_v46  ;;  %v4745_v60 = vsub.f32 %v11701_v54, %v3861_v26 }
 0x2ab   :  { %v7623_v31 = vld [vmem:[%s11656_s5 + $0xf2c] sm:$0xf0] }
 0x2ac   :  { %v6202_v49 = vld [vmem:[%s11656_s5 + $0x8d0] sm:$0xf]  ;;  %v7003_v9 = vor.u32 %v7623_v31, %v7002_v7  ;;  %4263 = vmatpush.bf16.msrb.mxu2 %v6747_v42  ;;  %v4769_v46 = vand.u32 2147483647, %v4745_v60  ;;  %v4817_v7 = vmul.f32 0.5, %v4745_v60  ;;  %v3862_v42 = vpop.f32.mrf.mxu3 }
 0x2ad   :  { %v7423_v21 = vld [vmem:[%s11656_s5 + $0x8ec] sm:$0xf0] }
 0x2ae   :  { %v6458_v53 = vld [vmem:[%s11656_s5 + $0xad0] sm:$0xf]  ;;  %v6203_v30 = vor.u32 %v7423_v21, %v6202_v49  ;;  %4281 = vmatpush.bf16.msrb.mxu3 %v7003_v9  ;;  %vm10181_vm10 = vcmp.lt.f32.partialorder %v4769_v46, 1.0  ;;  %v4841_v21 = vmul.f32 %v4817_v7, %v4745_v60 }
 0x2af   :  { %v7487_v52 = vld [vmem:[%s11656_s5 + $0xaec] sm:$0xf0] }
 0x2b0   :  { %v6459_v39 = vor.u32 %v7487_v52, %v6458_v53  ;;  %v6714_v24 = vld [vmem:[%s11656_s5 + $0xcd0] sm:$0xf]  ;;  %4228 = vmatpush.bf16.msrb.mxu0 %v6203_v30  ;;  %v7129_v53 = vadd.f32 -0.5, %v4769_v46  ;;  %v3873_v52 = vpop.f32.mrf.mxu0  ;;  %v3891_v30 = vpop.f32.mrf.mxu1 }
 0x2b1   :  { %v7551_v19 = vld [vmem:[%s11656_s5 + $0xcec] sm:$0xf0] }
 0x2b2   :  { %v6970_v17 = vld [vmem:[%s11656_s5 + $0xed0] sm:$0xf]  ;;  %v6715_v48 = vor.u32 %v7551_v19, %v6714_v24  ;;  %4246 = vmatpush.bf16.msrb.mxu1 %v6459_v39  ;;  %v4942_v19 = vrot.slane %v10158_v3, 2 }
 0x2b3   :  { %v7615_v1 = vld [vmem:[%s11656_s5 + $0xeec] sm:$0xf0] }
 0x2b4   :  { %v6170_v5 = vld [vmem:[%s11656_s5 + $0x890] sm:$0xf]  ;;  %v6971_v11 = vor.u32 %v7615_v1, %v6970_v17  ;;  %v3874_v17 = vadd.f32 %v3873_v52, %v10055_v14  ;;  %4264 = vmatpush.bf16.msrb.mxu2 %v6715_v48  ;;  %v7195_v52 = vld [vmem:[%s11656_s5 + $0x1d4] sm:$0xf] }
 0x2b5   :  { %v7415_v13 = vld [vmem:[%s11656_s5 + $0x8ac] sm:$0xf0] }
 0x2b6   :  { %v6426_v25 = vld [vmem:[%s11656_s5 + $0xa90] sm:$0xf]  ;;  %v6171_v31 = vor.u32 %v7415_v13, %v6170_v5  ;;  %4282 = vmatpush.bf16.msrb.mxu3 %v6971_v11  ;;  %v4889_v13 = vsel %vm10181_vm10, %v4841_v21, %v7129_v53  ;;  %v3892_v46 = vadd.f32 %v3891_v30, %v3874_v17  ;;  %v7259_v30 = vld [vmem:[%s11656_s5 + $0x3d4] sm:$0xf]  ;;  %v3909_v17 = vpop.f32.mrf.mxu2  ;;  %vm5023_vm10 = vcmask 1044484  }
 0x2b7   :  { %v7479_v0 = vld [vmem:[%s11656_s5 + $0xaac] sm:$0xf0] }
 0x2b8   :  { %v6682_v12 = vld [vmem:[%s11656_s5 + $0xc90] sm:$0xf]  ;;  %v6427_v49 = vor.u32 %v7479_v0, %v6426_v25  ;;  %4229 = vmatpush.bf16.msrb.mxu0 %v6171_v31 }
 0x2b9   :  { %v7543_v6 = vld [vmem:[%s11656_s5 + $0xcac] sm:$0xf0] }
 0x2ba   :  { %v6938_v44 = vld [vmem:[%s11656_s5 + $0xe90] sm:$0xf]  ;;  %v6683_v54 = vor.u32 %v7543_v6, %v6682_v12  ;;  %v4931_v12 = vmul.f32 %v9720_v61, %v4889_v13  ;;  %4247 = vmatpush.bf16.msrb.mxu1 %v6427_v49  ;;  %v5820_v13 = vld [vmem:[%s11656_s5 + $0x5f0] sm:$0xf0] }
 0x2bb   :  { %v7607_v62 = vld [vmem:[%s11656_s5 + $0xeac] sm:$0xf0] }
 0x2bc   :  { %v6138_v26 = vld [vmem:[%s11656_s5 + $0x850] sm:$0xf]  ;;  %v6939_v1 = vor.u32 %v7607_v62, %v6938_v44  ;;  %v4947_v62 = vadd.f32 %v10133_v32, %v4931_v12  ;;  %4265 = vmatpush.bf16.msrb.mxu2 %v6683_v54  ;;  %v5308_v32 = vld [vmem:[%s11656_s5 + $0x1f0] sm:$0xf0]  ;;  %v3927_v54 = vpop.f32.mrf.mxu3 }
 0x2bd   :  { %v7407_v39 = vld [vmem:[%s11656_s5 + $0x86c] sm:$0xf0]  ;;  %v5311_v10 = vor.u32 %v7195_v52, %v5308_v32 }
 0x2be   :  { %v6394_v24 = vld [vmem:[%s11656_s5 + $0xa50] sm:$0xf]  ;;  %v6139_v25 = vor.u32 %v7407_v39, %v6138_v26  ;;  %4283 = vmatpush.bf16.msrb.mxu3 %v6939_v1  ;;  %v5564_v39 = vld [vmem:[%s11656_s5 + $0x3f0] sm:$0xf0] }
 0x2bf   :  { %v7471_v60 = vld [vmem:[%s11656_s5 + $0xa6c] sm:$0xf0]  ;;  %v5567_v50 = vor.u32 %v7259_v30, %v5564_v39 }
 0x2c0   :  { %v6650_v5 = vld [vmem:[%s11656_s5 + $0xc50] sm:$0xf]  ;;  %v6395_v7 = vor.u32 %v7471_v60, %v6394_v24  ;;  %v4948_v24 = vrot.slane %v4947_v62, 4  ;;  %4230 = vmatpush.bf16.msrb.mxu0 %v6139_v25  ;;  %v7387_v25 = vld [vmem:[%s11656_s5 + $0x7d4] sm:$0xf] }
 0x2c1   :  { %v7535_v48 = vld [vmem:[%s11656_s5 + $0xc6c] sm:$0xf0] }
 0x2c2   :  { %v6906_v11 = vld [vmem:[%s11656_s5 + $0xe50] sm:$0xf]  ;;  %v6651_v26 = vor.u32 %v7535_v48, %v6650_v5  ;;  %4248 = vmatpush.bf16.msrb.mxu1 %v6395_v7  ;;  %v7323_v5 = vld [vmem:[%s11656_s5 + $0x5d4] sm:$0xf]  ;;  %v3910_v48 = vadd.f32 %v3909_v17, %v3892_v46  ;;  %v4943_v46 = vadd.f32 %v4942_v19, %v10158_v3 }
 0x2c3   :  { %v7599_v0 = vld [vmem:[%s11656_s5 + $0xe6c] sm:$0xf0]  ;;  %v6076_v7 = vld [vmem:[%s11656_s5 + $0x7f0] sm:$0xf0] }
 0x2c4   :  { %v6106_v6 = vld [vmem:[%s11656_s5 + $0x810] sm:$0xf]  ;;  %v6907_v9 = vor.u32 %v7599_v0, %v6906_v11  ;;  %v3875_v11 = vpop.f32.mrf.mxu0  ;;  %v3893_v0 = vpop.f32.mrf.mxu1  ;;  %4266 = vmatpush.bf16.msrb.mxu2 %v6651_v26  ;;  %v7187_v19 = vld [vmem:[%s11656_s5 + $0x194] sm:$0xf] }
 0x2c5   :  { %v7399_v43 = vld [vmem:[%s11656_s5 + $0x82c] sm:$0xf0]  ;;  %v3929_v3 = vpop.f32.mrf.mxu3  ;;  %v5532_v17 = vld [vmem:[%s11656_s5 + $0x3b0] sm:$0xf0] }
 0x2c6   :  { %v6362_v42 = vld [vmem:[%s11656_s5 + $0xa10] sm:$0xf]  ;;  %v6107_v1 = vor.u32 %v7399_v43, %v6106_v6  ;;  %v4949_v6 = vadd.f32 %v4948_v24, %v4947_v62  ;;  %v3876_v43 = vadd.f32 %v3875_v11, %v10055_v14  ;;  %4284 = vmatpush.bf16.msrb.mxu3 %v6907_v9  ;;  %v4944_v62 = vrot.slane %v4943_v46, 1  ;;  %v3911_v9 = vpop.f32.mrf.mxu2  ;;  %v7251_v24 = vld [vmem:[%s11656_s5 + $0x394] sm:$0xf] }
 0x2c7   :  { %v7463_v31 = vld [vmem:[%s11656_s5 + $0xa2c] sm:$0xf0]  ;;  %v6044_v11 = vld [vmem:[%s11656_s5 + $0x7b0] sm:$0xf0] }
 0x2c8   :  { %v6618_v49 = vld [vmem:[%s11656_s5 + $0xc10] sm:$0xf]  ;;  %v6363_v60 = vor.u32 %v7463_v31, %v6362_v42  ;;  %v10266_v31 = vadd.f32 %v3927_v54, %v3910_v48  ;;  %v4950_v52 = vrot.slane %v4949_v6, 2  ;;  %v3894_v32 = vadd.f32 %v3893_v0, %v3876_v43  ;;  %4231 = vmatpush.bf16.msrb.mxu0 %v6107_v1  ;;  %v7315_v54 = vld [vmem:[%s11656_s5 + $0x594] sm:$0xf] }
 0x2c9   :  { %v7527_v44 = vld [vmem:[%s11656_s5 + $0xc2c] sm:$0xf0]  ;;  %v7379_v48 = vld [vmem:[%s11656_s5 + $0x794] sm:$0xf]  ;;  %v4945_v43 = vadd.f32 %v4944_v62, %v4943_v46 }
 0x2ca   :  { %v6874_v21 = vld [vmem:[%s11656_s5 + $0xe10] sm:$0xf]  ;;  %v6619_v12 = vor.u32 %v7527_v44, %v6618_v49  ;;  %v5823_v49 = vor.u32 %v7323_v5, %v5820_v13  ;;  %v6079_v44 = vor.u32 %v7387_v25, %v6076_v7  ;;  %4249 = vmatpush.bf16.msrb.mxu1 %v6363_v60  ;;  %v4951_v30 = vadd.f32 %v4950_v52, %v4949_v6  ;;  %v5788_v13 = vld [vmem:[%s11656_s5 + $0x5b0] sm:$0xf0] }
 0x2cb   :  { %v7591_v53 = vld [vmem:[%s11656_s5 + $0xe2c] sm:$0xf0]  ;;  %v5535_v5 = vor.u32 %v7251_v24, %v5532_v17  ;;  %v7179_v25 = vld [vmem:[%s11656_s5 + $0x154] sm:$0xf]  ;;  %4232 = vmatmul.bf16.vlgmr.msrb.gmra.mxu0 %v8626_v4 }
 0x2cc   :  { %v6875_v42 = vor.u32 %v7591_v53, %v6874_v21  ;;  %4296 = vmatpush.bf16.msra.mxu0 %v5311_v10  ;;  %4267 = vmatpush.bf16.msrb.mxu2 %v6619_v12  ;;  %v4952_v26 = vrot.slane %v4951_v30, 1  ;;  %v5276_v21 = vld [vmem:[%s11656_s5 + $0x1b0] sm:$0xf0]  ;;  %v3912_v10 = vadd.f32 %v3911_v9, %v3894_v32  ;;  %v3896_v53 = vpop.f32.mrf.mxu1  ;;  %v6047_v12 = vor.u32 %v7379_v48, %v6044_v11 }
 0x2cd   :  { %v5279_v39 = vor.u32 %v7187_v19, %v5276_v21  ;;  %v5244_v7 = vld [vmem:[%s11656_s5 + $0x170] sm:$0xf0]  ;;  %4250 = vmatmul.bf16.vlgmr.msrb.gmra.mxu1 %v8628_v45 }
 0x2ce   :  { %4314 = vmatpush.bf16.msra.mxu1 %v5567_v50  ;;  %4285 = vmatpush.bf16.msrb.mxu3 %v6875_v42  ;;  %v3878_v50 = vpop.f32.mrf.mxu0  ;;  %v4953_v1 = vadd.f32 %v4952_v26, %v4951_v30  ;;  %v10293_v0 = vadd.f32 %v3929_v3, %v3912_v10  ;;  %v7243_v6 = vld [vmem:[%s11656_s5 + $0x354] sm:$0xf]  ;;  %v3914_v21 = vpop.f32.mrf.mxu2 }
 0x2cf   :  { %v3879_v60 = vadd.f32 %v3878_v50, %v10055_v14  ;;  %v5791_v14 = vor.u32 %v7315_v54, %v5788_v13  ;;  %v5500_v52 = vld [vmem:[%s11656_s5 + $0x370] sm:$0xf0]  ;;  %v3932_v10 = vpop.f32.mrf.mxu3  ;;  %4268 = vmatmul.bf16.vlgmr.msrb.gmra.mxu2 %v8652_v35 }
 0x2d0   :  { %4332 = vmatpush.bf16.msra.mxu2 %v5823_v49  ;;  %v5010_v42 = vrot.slane %v4953_v1, 7  ;;  %4297 = vmatpush.bf16.msra.mxu0 %v5279_v39  ;;  %v7307_v32 = vld [vmem:[%s11656_s5 + $0x554] sm:$0xf]  ;;  %v5503_v30 = vor.u32 %v7243_v6, %v5500_v52 }
 0x2d1   :  { %v3897_v49 = vadd.f32 %v3896_v53, %v3879_v60  ;;  %v5756_v46 = vld [vmem:[%s11656_s5 + $0x570] sm:$0xf0]  ;;  %4286 = vmatmul.bf16.vlgmr.msrb.gmra.mxu3 %v8654_v59 }
 0x2d2   :  { %4350 = vmatpush.bf16.msra.mxu3 %v6079_v44  ;;  %4315 = vmatpush.bf16.msra.mxu1 %v5535_v5  ;;  %v5247_v44 = vor.u32 %v7179_v25, %v5244_v7  ;;  %v7371_v62 = vld [vmem:[%s11656_s5 + $0x754] sm:$0xf]  ;;  %v10324_v9 = vsel %vm5017_vm11, %v4945_v43, %v5010_v42  ;;  %v5759_v3 = vor.u32 %v7307_v32, %v5756_v46 }
 0x2d3   :  { %v6012_v26 = vld [vmem:[%s11656_s5 + $0x770] sm:$0xf0]  ;;  %v3915_v24 = vadd.f32 %v3914_v21, %v3897_v49 }
 0x2d4   :  { %4333 = vmatpush.bf16.msra.mxu2 %v5791_v14  ;;  %v6015_v19 = vor.u32 %v7371_v62, %v6012_v26  ;;  %4298 = vmatpush.bf16.msra.mxu0 %v5247_v44  ;;  %v7171_v50 = vld [vmem:[%s11656_s5 + $0x114] sm:$0xf]  ;;  %v3898_v54 = vpop.f32.mrf.mxu1 }
 0x2d5   :  { %v5212_v53 = vld [vmem:[%s11656_s5 + $0x130] sm:$0xf0]  ;;  %v10350_v25 = vadd.f32 %v3932_v10, %v3915_v24 }
 0x2d6   :  { %4351 = vmatpush.bf16.msra.mxu3 %v6047_v12  ;;  %4316 = vmatpush.bf16.msra.mxu1 %v5503_v30  ;;  %v7235_v39 = vld [vmem:[%s11656_s5 + $0x314] sm:$0xf]  ;;  %v3880_v17 = vpop.f32.mrf.mxu0  ;;  %v5215_v1 = vor.u32 %v7171_v50, %v5212_v53 }
 0x2d7   :  { %v5468_v60 = vld [vmem:[%s11656_s5 + $0x330] sm:$0xf0]  ;;  %v3934_v21 = vpop.f32.mrf.mxu3 }
 0x2d8   :  { %v7299_v5 = vld [vmem:[%s11656_s5 + $0x514] sm:$0xf]  ;;  %4334 = vmatpush.bf16.msra.mxu2 %v5759_v3  ;;  %v5471_v48 = vor.u32 %v7235_v39, %v5468_v60  ;;  %4299 = vmatpush.bf16.msra.mxu0 %v5215_v1 }
 0x2d9   :  { %v5724_v13 = vld [vmem:[%s11656_s5 + $0x530] sm:$0xf0] }
 0x2da   :  { %4352 = vmatpush.bf16.msra.mxu3 %v6015_v19  ;;  %v5727_v11 = vor.u32 %v7299_v5, %v5724_v13  ;;  %v7363_v14 = vld [vmem:[%s11656_s5 + $0x714] sm:$0xf]  ;;  %4317 = vmatpush.bf16.msra.mxu1 %v5471_v48  ;;  %v3916_v19 = vpop.f32.mrf.mxu2 }
 0x2db   :  { %v5980_v12 = vld [vmem:[%s11656_s5 + $0x730] sm:$0xf0]  ;;  %4237 = vmatmul.bf16.gmra.mxu0 %v8778_v51 }
 0x2dc   :  { %v5983_v7 = vor.u32 %v7363_v14, %v5980_v12  ;;  %v7163_v6 = vld [vmem:[%s11656_s5 + $0xd4] sm:$0xf]  ;;  %4335 = vmatpush.bf16.msra.mxu2 %v5727_v11  ;;  %v3963_v24 = vpop.f32.mrf.mxu1 }
 0x2dd   :  { %v5180_v43 = vld [vmem:[%s11656_s5 + $0xf0] sm:$0xf0]  ;;  %4255 = vmatmul.bf16.gmra.mxu1 %v8780_v33 }
 0x2de   :  { %v7227_v42 = vld [vmem:[%s11656_s5 + $0x2d4] sm:$0xf]  ;;  %v5183_v49 = vor.u32 %v7163_v6, %v5180_v43  ;;  %4353 = vmatpush.bf16.msra.mxu3 %v5983_v7  ;;  %v3945_v39 = vpop.f32.mrf.mxu0 }
 0x2df   :  { %v5436_v44 = vld [vmem:[%s11656_s5 + $0x2f0] sm:$0xf0]  ;;  %v3946_v5 = vadd.f32 %v3945_v39, %v10266_v31  ;;  %v3999_v19 = vpop.f32.mrf.mxu3  ;;  %4273 = vmatmul.bf16.gmra.mxu2 %v8794_v36 }
 0x2e0   :  { %v7291_v52 = vld [vmem:[%s11656_s5 + $0x4d4] sm:$0xf]  ;;  %v5439_v30 = vor.u32 %v7227_v42, %v5436_v44  ;;  %4300 = vmatpush.bf16.msra.mxu0 %v5183_v49 }
 0x2e1   :  { %v5692_v32 = vld [vmem:[%s11656_s5 + $0x4f0] sm:$0xf0]  ;;  %v3964_v7 = vadd.f32 %v3963_v24, %v3946_v5  ;;  %4291 = vmatmul.bf16.gmra.mxu3 %v8796_v34 }
 0x2e2   :  { %v5695_v46 = vor.u32 %v7291_v52, %v5692_v32  ;;  %v7355_v62 = vld [vmem:[%s11656_s5 + $0x6d4] sm:$0xf]  ;;  %4318 = vmatpush.bf16.msra.mxu1 %v5439_v30 }
 0x2e3   :  { %v5948_v26 = vld [vmem:[%s11656_s5 + $0x6f0] sm:$0xf0] }
 0x2e4   :  { %v5951_v3 = vor.u32 %v7355_v62, %v5948_v26  ;;  %v7155_v10 = vld [vmem:[%s11656_s5 + $0x94] sm:$0xf]  ;;  %4336 = vmatpush.bf16.msra.mxu2 %v5695_v46  ;;  %v3965_v24 = vpop.f32.mrf.mxu1 }
 0x2e5   :  { %v5148_v50 = vld [vmem:[%s11656_s5 + $0xb0] sm:$0xf0] }
 0x2e6   :  { %v7219_v53 = vld [vmem:[%s11656_s5 + $0x294] sm:$0xf]  ;;  %v5151_v17 = vor.u32 %v7155_v10, %v5148_v50  ;;  %4354 = vmatpush.bf16.msra.mxu3 %v5951_v3  ;;  %v3981_v3 = vpop.f32.mrf.mxu2  ;;  %v3947_v39 = vpop.f32.mrf.mxu0 }
 0x2e7   :  { %v5404_v54 = vld [vmem:[%s11656_s5 + $0x2b0] sm:$0xf0]  ;;  %v3948_v5 = vadd.f32 %v3947_v39, %v10293_v0 }
 0x2e8   :  { %v7283_v1 = vld [vmem:[%s11656_s5 + $0x494] sm:$0xf]  ;;  %v5407_v13 = vor.u32 %v7219_v53, %v5404_v54  ;;  %4301 = vmatpush.bf16.msra.mxu0 %v5151_v17  ;;  %v3982_v53 = vadd.f32 %v3981_v3, %v3964_v7 }
 0x2e9   :  { %v5660_v60 = vld [vmem:[%s11656_s5 + $0x4b0] sm:$0xf0] }
 0x2ea   :  { %v5663_v48 = vor.u32 %v7283_v1, %v5660_v60  ;;  %v7347_v11 = vld [vmem:[%s11656_s5 + $0x694] sm:$0xf]  ;;  %4319 = vmatpush.bf16.msra.mxu1 %v5407_v13 }
 0x2eb   :  { %v5916_v14 = vld [vmem:[%s11656_s5 + $0x6b0] sm:$0xf0] }
 0x2ec   :  { %v5919_v12 = vor.u32 %v7347_v11, %v5916_v14  ;;  %v7147_v31 = vld [vmem:[%s11656_s5 + $0x54] sm:$0xf]  ;;  %4337 = vmatpush.bf16.msra.mxu2 %v5663_v48 }
 0x2ed   :  { %v5116_v6 = vld [vmem:[%s11656_s5 + $0x70] sm:$0xf0] }
 0x2ee   :  { %v7211_v43 = vld [vmem:[%s11656_s5 + $0x254] sm:$0xf]  ;;  %v5119_v42 = vor.u32 %v7147_v31, %v5116_v6  ;;  %4355 = vmatpush.bf16.msra.mxu3 %v5919_v12  ;;  %v4000_v12 = vadd.f32 %v3999_v19, %v3982_v53  ;;  %v3966_v31 = vadd.f32 %v3965_v24, %v3948_v5 }
 0x2ef   :  { %v5372_v49 = vld [vmem:[%s11656_s5 + $0x270] sm:$0xf0] }
 0x2f0   :  { %v7275_v44 = vld [vmem:[%s11656_s5 + $0x454] sm:$0xf]  ;;  %v5375_v32 = vor.u32 %v7211_v43, %v5372_v49  ;;  %4302 = vmatpush.bf16.msra.mxu0 %v5119_v42  ;;  %v11704_v42 = vunpack.c.l.bf16 %v8130_v8 }
 0x2f1   :  { %v5628_v52 = vld [vmem:[%s11656_s5 + $0x470] sm:$0xf0] }
 0x2f2   :  { %v5631_v30 = vor.u32 %v7275_v44, %v5628_v52  ;;  %v7339_v46 = vld [vmem:[%s11656_s5 + $0x654] sm:$0xf]  ;;  %4320 = vmatpush.bf16.msra.mxu1 %v5375_v32  ;;  %v4730_v49 = vsub.f32 %v11704_v42, %v4000_v12 }
 0x2f3   :  { %v5884_v62 = vld [vmem:[%s11656_s5 + $0x670] sm:$0xf0] }
 0x2f4   :  { %v5887_v26 = vor.u32 %v7339_v46, %v5884_v62  ;;  %v7139_v21 = vld [vmem:[%s11656_s5 + $0x14] sm:$0xf]  ;;  %4338 = vmatpush.bf16.msra.mxu2 %v5631_v30  ;;  %v4754_v19 = vand.u32 2147483647, %v4730_v49 }
 0x2f5   :  { %v5084_v10 = vld [vmem:[%s11656_s5 + $0x30] sm:$0xf0] }
 0x2f6   :  { %v7203_v50 = vld [vmem:[%s11656_s5 + $0x214] sm:$0xf]  ;;  %v5087_v17 = vor.u32 %v7139_v21, %v5084_v10  ;;  %4356 = vmatpush.bf16.msra.mxu3 %v5887_v26  ;;  %v3983_v10 = vpop.f32.mrf.mxu2  ;;  %vm10505_vm12 = vcmp.lt.f32.partialorder %v4754_v19, 1.0 }
 0x2f7   :  { %v5340_v54 = vld [vmem:[%s11656_s5 + $0x230] sm:$0xf0] }
 0x2f8   :  { %v7267_v1 = vld [vmem:[%s11656_s5 + $0x414] sm:$0xf]  ;;  %v5343_v13 = vor.u32 %v7203_v50, %v5340_v54  ;;  %4303 = vmatpush.bf16.msra.mxu0 %v5087_v17  ;;  %v4001_v50 = vpop.f32.mrf.mxu3  ;;  %v4802_v17 = vmul.f32 0.5, %v4730_v49  ;;  %v3984_v54 = vadd.f32 %v3983_v10, %v3966_v31 }
 0x2f9   :  { %v5596_v60 = vld [vmem:[%s11656_s5 + $0x430] sm:$0xf0] }
 0x2fa   :  { %v5599_v48 = vor.u32 %v7267_v1, %v5596_v60  ;;  %v7331_v11 = vld [vmem:[%s11656_s5 + $0x614] sm:$0xf]  ;;  %4321 = vmatpush.bf16.msra.mxu1 %v5343_v13  ;;  %v3950_v1 = vpop.f32.mrf.mxu0  ;;  %v3968_v60 = vpop.f32.mrf.mxu1  ;;  %v4826_v10 = vmul.f32 %v4802_v17, %v4730_v49 }
 0x2fb   :  { %v5852_v14 = vld [vmem:[%s11656_s5 + $0x630] sm:$0xf0]  ;;  %4304 = vmatmul.bf16.vlgmr.msra.gmra.mxu0 %v8239_v38 }
 0x2fc   :  { %v5855_v7 = vor.u32 %v7331_v11, %v5852_v14  ;;  %v7451_v0 = vld [vmem:[%s11656_s5 + $0x9d4] sm:$0xf]  ;;  %4339 = vmatpush.bf16.msra.mxu2 %v5599_v48  ;;  %v3951_v48 = vadd.f32 %v3950_v1, %v10350_v25  ;;  %v10512_v25 = vperm.slane %v10052_v47, 3  ;;  %v11707_v47 = vunpack.c.l.bf16 %v8120_v2 }
 0x2fd   :  { %v6332_v6 = vld [vmem:[%s11656_s5 + $0x9f0] sm:$0xf0]  ;;  %v7114_v1 = vadd.f32 -0.5, %v4754_v19  ;;  %4322 = vmatmul.bf16.vlgmr.msra.gmra.mxu1 %v8241_v41 }
 0x2fe   :  { %v7515_v43 = vld [vmem:[%s11656_s5 + $0xbd4] sm:$0xf]  ;;  %v6335_v44 = vor.u32 %v7451_v0, %v6332_v6  ;;  %4357 = vmatpush.bf16.msra.mxu3 %v5855_v7  ;;  %v4002_v6 = vadd.f32 %v4001_v50, %v3984_v54  ;;  %v3969_v42 = vadd.f32 %v3968_v60, %v3951_v48 }
 0x2ff   :  { %v6588_v52 = vld [vmem:[%s11656_s5 + $0xbf0] sm:$0xf0]  ;;  %4340 = vmatmul.bf16.vlgmr.msra.gmra.mxu2 %v8267_v57 }
 0x300   :  { %v7579_v32 = vld [vmem:[%s11656_s5 + $0xdd4] sm:$0xf]  ;;  %v6591_v46 = vor.u32 %v7515_v43, %v6588_v52  ;;  %4368 = vmatpush.bf16.msrb.mxu0 %v6335_v44  ;;  %v4004_v48 = vpop.f32.mrf.mxu3 }
 0x301   :  { %v6844_v30 = vld [vmem:[%s11656_s5 + $0xdf0] sm:$0xf0]  ;;  %4358 = vmatmul.bf16.vlgmr.msra.gmra.mxu3 %v8269_v58 }
 0x302   :  { %v6847_v62 = vor.u32 %v7579_v32, %v6844_v30  ;;  %v7643_v26 = vld [vmem:[%s11656_s5 + $0xfd4] sm:$0xf]  ;;  %4386 = vmatpush.bf16.msrb.mxu1 %v6591_v46  ;;  %v4738_v46 = vsub.f32 %v11707_v47, %v4002_v6 }
 0x303   :  { %v7100_v3 = vld [vmem:[%s11656_s5 + $0xff0] sm:$0xf0] }
 0x304   :  { %v7103_v21 = vor.u32 %v7643_v26, %v7100_v3  ;;  %4404 = vmatpush.bf16.msrb.mxu2 %v6847_v62  ;;  %v7443_v53 = vld [vmem:[%s11656_s5 + $0x994] sm:$0xf]  ;;  %v4762_v60 = vand.u32 2147483647, %v4738_v46 }
 0x305   :  { %v6300_v39 = vld [vmem:[%s11656_s5 + $0x9b0] sm:$0xf0] }
 0x306   :  { %v7507_v24 = vld [vmem:[%s11656_s5 + $0xb94] sm:$0xf]  ;;  %4422 = vmatpush.bf16.msrb.mxu3 %v7103_v21  ;;  %v6303_v11 = vor.u32 %v7443_v53, %v6300_v39  ;;  %vm10557_vm13 = vcmp.lt.f32.partialorder %v4762_v60, 1.0  ;;  %v7122_v6 = vadd.f32 -0.5, %v4762_v60 }
 0x307   :  { %v6556_v5 = vld [vmem:[%s11656_s5 + $0xbb0] sm:$0xf0] }
 0x308   :  { %v7571_v13 = vld [vmem:[%s11656_s5 + $0xd94] sm:$0xf]  ;;  %v6559_v14 = vor.u32 %v7507_v24, %v6556_v5  ;;  %4369 = vmatpush.bf16.msrb.mxu0 %v6303_v11  ;;  %v4810_v5 = vmul.f32 0.5, %v4738_v46 }
 0x309   :  { %v6812_v12 = vld [vmem:[%s11656_s5 + $0xdb0] sm:$0xf0] }
 0x30a   :  { %v7635_v7 = vld [vmem:[%s11656_s5 + $0xf94] sm:$0xf]  ;;  %v6815_v43 = vor.u32 %v7571_v13, %v6812_v12  ;;  %4387 = vmatpush.bf16.msrb.mxu1 %v6559_v14  ;;  %v3986_v13 = vpop.f32.mrf.mxu2 }
 0x30b   :  { %v7068_v31 = vld [vmem:[%s11656_s5 + $0xfb0] sm:$0xf0]  ;;  %4309 = vmatmul.bf16.gmra.mxu0 %v8443_v15 }
 0x30c   :  { %v7071_v44 = vor.u32 %v7635_v7, %v7068_v31  ;;  %v7435_v52 = vld [vmem:[%s11656_s5 + $0x954] sm:$0xf]  ;;  %4405 = vmatpush.bf16.msrb.mxu2 %v6815_v43  ;;  %v4834_v31 = vmul.f32 %v4810_v5, %v4738_v46  ;;  %v3987_v43 = vadd.f32 %v3986_v13, %v3969_v42 }
 0x30d   :  { %v6268_v32 = vld [vmem:[%s11656_s5 + $0x970] sm:$0xf0]  ;;  %4327 = vmatmul.bf16.gmra.mxu1 %v8445_v16 }
 0x30e   :  { %v7499_v30 = vld [vmem:[%s11656_s5 + $0xb54] sm:$0xf]  ;;  %v6271_v62 = vor.u32 %v7435_v52, %v6268_v32  ;;  %4423 = vmatpush.bf16.msrb.mxu3 %v7071_v44  ;;  %v3952_v44 = vpop.f32.mrf.mxu0  ;;  %v3970_v52 = vpop.f32.mrf.mxu1 }
 0x30f   :  { %v6524_v26 = vld [vmem:[%s11656_s5 + $0xb70] sm:$0xf0]  ;;  %4345 = vmatmul.bf16.gmra.mxu2 %v8447_v27 }
 0x310   :  { %v7563_v3 = vld [vmem:[%s11656_s5 + $0xd54] sm:$0xf]  ;;  %v6527_v50 = vor.u32 %v7499_v30, %v6524_v26  ;;  %4370 = vmatpush.bf16.msrb.mxu0 %v6271_v62 }
 0x311   :  { %v6780_v21 = vld [vmem:[%s11656_s5 + $0xd70] sm:$0xf0]  ;;  %4363 = vmatmul.bf16.gmra.mxu3 %v8449_v56 }
 0x312   :  { %v6783_v53 = vor.u32 %v7563_v3, %v6780_v21  ;;  %v7627_v39 = vld [vmem:[%s11656_s5 + $0xf54] sm:$0xf]  ;;  %4388 = vmatpush.bf16.msrb.mxu1 %v6527_v50  ;;  %v4874_v3 = vsel %vm10505_vm12, %v4826_v10, %v7114_v1  ;;  %v4882_v21 = vsel %vm10557_vm13, %v4834_v31, %v7122_v6  ;;  %v4005_v50 = vadd.f32 %v4004_v48, %v3987_v43 }
 0x313   :  { %v7036_v24 = vld [vmem:[%s11656_s5 + $0xf70] sm:$0xf0]  ;;  %v10589_v60 = vadd.f32 %v4882_v21, %v4874_v3  ;;  %v7264_v3 = vld [vmem:[%s11656_s5 + $0x3f4] sm:$0xf0] }
 0x314   :  { %v7427_v54 = vld [vmem:[%s11656_s5 + $0x914] sm:$0xf]  ;;  %v7039_v49 = vor.u32 %v7627_v39, %v7036_v24  ;;  %4406 = vmatpush.bf16.msrb.mxu2 %v6783_v53 }
 0x315   :  { %v6236_v17 = vld [vmem:[%s11656_s5 + $0x930] sm:$0xf0] }
 0x316   :  { %v6239_v11 = vor.u32 %v7427_v54, %v6236_v17  ;;  %v7491_v14 = vld [vmem:[%s11656_s5 + $0xb14] sm:$0xf]  ;;  %4424 = vmatpush.bf16.msrb.mxu3 %v7039_v49  ;;  %v11710_v17 = vunpack.c.l.bf16 %v8285_v63 }
 0x317   :  { %v6492_v19 = vld [vmem:[%s11656_s5 + $0xb30] sm:$0xf0] }
 0x318   :  { %v7555_v12 = vld [vmem:[%s11656_s5 + $0xd14] sm:$0xf]  ;;  %v6495_v47 = vor.u32 %v7491_v14, %v6492_v19  ;;  %4371 = vmatpush.bf16.msrb.mxu0 %v6239_v11  ;;  %v4746_v13 = vsub.f32 %v11710_v17, %v4005_v50 }
 0x319   :  { %v6748_v32 = vld [vmem:[%s11656_s5 + $0xd30] sm:$0xf0] }
 0x31a   :  { %v7619_v30 = vld [vmem:[%s11656_s5 + $0xf14] sm:$0xf]  ;;  %v6751_v62 = vor.u32 %v7555_v12, %v6748_v32  ;;  %4389 = vmatpush.bf16.msrb.mxu1 %v6495_v47  ;;  %v4770_v43 = vand.u32 2147483647, %v4746_v13  ;;  %v4818_v44 = vmul.f32 0.5, %v4746_v13  ;;  %v3988_v32 = vpop.f32.mrf.mxu2 }
 0x31b   :  { %v7004_v46 = vld [vmem:[%s11656_s5 + $0xf30] sm:$0xf0] }
 0x31c   :  { %v7419_v42 = vld [vmem:[%s11656_s5 + $0x8d4] sm:$0xf]  ;;  %v7007_v53 = vor.u32 %v7619_v30, %v7004_v46  ;;  %4407 = vmatpush.bf16.msrb.mxu2 %v6751_v62  ;;  %v4006_v30 = vpop.f32.mrf.mxu3  ;;  %vm10632_vm14 = vcmp.lt.f32.partialorder %v4770_v43, 1.0  ;;  %v4842_v21 = vmul.f32 %v4818_v44, %v4746_v13  ;;  %v7130_v50 = vadd.f32 -0.5, %v4770_v43 }
 0x31d   :  { %v6204_v26 = vld [vmem:[%s11656_s5 + $0x8f0] sm:$0xf0] }
 0x31e   :  { %v7483_v39 = vld [vmem:[%s11656_s5 + $0xad4] sm:$0xf]  ;;  %v6207_v0 = vor.u32 %v7419_v42, %v6204_v26  ;;  %4425 = vmatpush.bf16.msrb.mxu3 %v7007_v53  ;;  %v4017_v53 = vpop.f32.mrf.mxu0 }
 0x31f   :  { %v6460_v24 = vld [vmem:[%s11656_s5 + $0xaf0] sm:$0xf0] }
 0x320   :  { %v7547_v54 = vld [vmem:[%s11656_s5 + $0xcd4] sm:$0xf]  ;;  %v6463_v10 = vor.u32 %v7483_v39, %v6460_v24  ;;  %4372 = vmatpush.bf16.msrb.mxu0 %v6207_v0  ;;  %v4035_v39 = vpop.f32.mrf.mxu1  ;;  %v4018_v0 = vadd.f32 %v4017_v53, %v10512_v25 }
 0x321   :  { %v6716_v1 = vld [vmem:[%s11656_s5 + $0xcf0] sm:$0xf0] }
 0x322   :  { %v7611_v5 = vld [vmem:[%s11656_s5 + $0xed4] sm:$0xf]  ;;  %v6719_v19 = vor.u32 %v7547_v54, %v6716_v1  ;;  %4390 = vmatpush.bf16.msrb.mxu1 %v6463_v10 }
 0x323   :  { %v6972_v49 = vld [vmem:[%s11656_s5 + $0xef0] sm:$0xf0] }
 0x324   :  { %v7411_v48 = vld [vmem:[%s11656_s5 + $0x894] sm:$0xf]  ;;  %v6975_v12 = vor.u32 %v7611_v5, %v6972_v49  ;;  %4408 = vmatpush.bf16.msrb.mxu2 %v6719_v19  ;;  %v4890_v49 = vsel %vm10632_vm14, %v4842_v21, %v7130_v50  ;;  %v4036_v19 = vadd.f32 %v4035_v39, %v4018_v0  ;;  %v4053_v21 = vpop.f32.mrf.mxu2  ;;  %v4071_v50 = vpop.f32.mrf.mxu3 }
 0x325   :  { %v6172_v11 = vld [vmem:[%s11656_s5 + $0x8b0] sm:$0xf0] }
 0x326   :  { %v7475_v14 = vld [vmem:[%s11656_s5 + $0xa94] sm:$0xf]  ;;  %v6175_v47 = vor.u32 %v7411_v48, %v6172_v11  ;;  %4426 = vmatpush.bf16.msrb.mxu3 %v6975_v12  ;;  %v4054_v0 = vadd.f32 %v4053_v21, %v4036_v19 }
 0x327   :  { %v6428_v7 = vld [vmem:[%s11656_s5 + $0xab0] sm:$0xf0] }
 0x328   :  { %v7539_v31 = vld [vmem:[%s11656_s5 + $0xc94] sm:$0xf]  ;;  %v6431_v62 = vor.u32 %v7475_v14, %v6428_v7  ;;  %v4932_v14 = vmul.f32 %v9720_v61, %v4890_v49  ;;  %4373 = vmatpush.bf16.msrb.mxu0 %v6175_v47 }
 0x329   :  { %v6684_v6 = vld [vmem:[%s11656_s5 + $0xcb0] sm:$0xf0] }
 0x32a   :  { %v7603_v52 = vld [vmem:[%s11656_s5 + $0xe94] sm:$0xf]  ;;  %v6687_v10 = vor.u32 %v7539_v31, %v6684_v6  ;;  %4391 = vmatpush.bf16.msrb.mxu1 %v6431_v62  ;;  %v10681_v32 = vadd.f32 %v10589_v60, %v4932_v14  ;;  %v7200_v60 = vld [vmem:[%s11656_s5 + $0x1f4] sm:$0xf0] }
 0x32b   :  { %v6940_v46 = vld [vmem:[%s11656_s5 + $0xeb0] sm:$0xf0] }
 0x32c   :  { %v7403_v42 = vld [vmem:[%s11656_s5 + $0x854] sm:$0xf]  ;;  %v6943_v1 = vor.u32 %v7603_v52, %v6940_v46  ;;  %4409 = vmatpush.bf16.msrb.mxu2 %v6687_v10  ;;  %v4019_v10 = vpop.f32.mrf.mxu0 }
 0x32d   :  { %v6140_v26 = vld [vmem:[%s11656_s5 + $0x870] sm:$0xf0] }
 0x32e   :  { %v7467_v24 = vld [vmem:[%s11656_s5 + $0xa54] sm:$0xf]  ;;  %v6143_v17 = vor.u32 %v7403_v42, %v6140_v26  ;;  %4427 = vmatpush.bf16.msrb.mxu3 %v6943_v1  ;;  %v5314_v42 = vld [vmem:[%s11656_s5 + $0x1d8] sm:$0xf]  ;;  %v4037_v1 = vpop.f32.mrf.mxu1 }
 0x32f   :  { %v6396_v54 = vld [vmem:[%s11656_s5 + $0xa70] sm:$0xf0]  ;;  %v5570_v26 = vld [vmem:[%s11656_s5 + $0x3d8] sm:$0xf] }
 0x330   :  { %v7531_v5 = vld [vmem:[%s11656_s5 + $0xc54] sm:$0xf]  ;;  %v6399_v12 = vor.u32 %v7467_v24, %v6396_v54  ;;  %4374 = vmatpush.bf16.msrb.mxu0 %v6143_v17  ;;  %v5826_v24 = vld [vmem:[%s11656_s5 + $0x5d8] sm:$0xf]  ;;  %v5571_v49 = vor.u32 %v7264_v3, %v5570_v26 }
 0x331   :  { %v6652_v13 = vld [vmem:[%s11656_s5 + $0xc70] sm:$0xf0]  ;;  %v7328_v54 = vld [vmem:[%s11656_s5 + $0x5f4] sm:$0xf0] }
 0x332   :  { %v7595_v48 = vld [vmem:[%s11656_s5 + $0xe54] sm:$0xf]  ;;  %v6655_v30 = vor.u32 %v7531_v5, %v6652_v13  ;;  %4392 = vmatpush.bf16.msrb.mxu1 %v6399_v12  ;;  %v5315_v5 = vor.u32 %v7200_v60, %v5314_v42  ;;  %v6082_v17 = vld [vmem:[%s11656_s5 + $0x7d8] sm:$0xf]  ;;  %v10714_v12 = vadd.f32 %v4071_v50, %v4054_v0  ;;  %v5827_v19 = vor.u32 %v7328_v54, %v5826_v24 }
 0x333   :  { %v6908_v11 = vld [vmem:[%s11656_s5 + $0xe70] sm:$0xf0]  ;;  %v7392_v13 = vld [vmem:[%s11656_s5 + $0x7f4] sm:$0xf0] }
 0x334   :  { %v7395_v7 = vld [vmem:[%s11656_s5 + $0x814] sm:$0xf]  ;;  %v6911_v47 = vor.u32 %v7595_v48, %v6908_v11  ;;  %v4020_v48 = vadd.f32 %v4019_v10, %v10512_v25  ;;  %4410 = vmatpush.bf16.msrb.mxu2 %v6655_v30  ;;  %v5538_v42 = vld [vmem:[%s11656_s5 + $0x398] sm:$0xf] }
 0x335   :  { %v6108_v31 = vld [vmem:[%s11656_s5 + $0x830] sm:$0xf0]  ;;  %v7256_v60 = vld [vmem:[%s11656_s5 + $0x3b4] sm:$0xf0] }
 0x336   :  { %v7459_v6 = vld [vmem:[%s11656_s5 + $0xa14] sm:$0xf]  ;;  %v6111_v53 = vor.u32 %v7395_v7, %v6108_v31  ;;  %4428 = vmatpush.bf16.msrb.mxu3 %v6911_v47  ;;  %v6083_v7 = vor.u32 %v7392_v13, %v6082_v17  ;;  %v4038_v31 = vadd.f32 %v4037_v1, %v4020_v48  ;;  %v4022_v47 = vpop.f32.mrf.mxu0  ;;  %v5794_v26 = vld [vmem:[%s11656_s5 + $0x598] sm:$0xf]  ;;  %v5539_v21 = vor.u32 %v7256_v60, %v5538_v42 }
 0x337   :  { %v6364_v43 = vld [vmem:[%s11656_s5 + $0xa30] sm:$0xf0]  ;;  %v4023_v3 = vadd.f32 %v4022_v47, %v10512_v25  ;;  %v7320_v50 = vld [vmem:[%s11656_s5 + $0x5b4] sm:$0xf0] }
 0x338   :  { %v7523_v44 = vld [vmem:[%s11656_s5 + $0xc14] sm:$0xf]  ;;  %v6367_v39 = vor.u32 %v7459_v6, %v6364_v43  ;;  %4375 = vmatpush.bf16.msrb.mxu0 %v6111_v53  ;;  %v4055_v6 = vpop.f32.mrf.mxu2  ;;  %v4073_v43 = vpop.f32.mrf.mxu3  ;;  %v6050_v53 = vld [vmem:[%s11656_s5 + $0x798] sm:$0xf]  ;;  %v5795_v25 = vor.u32 %v7320_v50, %v5794_v26 }
 0x339   :  { %v6620_v52 = vld [vmem:[%s11656_s5 + $0xc30] sm:$0xf0]  ;;  %v4056_v30 = vadd.f32 %v4055_v6, %v4038_v31  ;;  %v5250_v0 = vld [vmem:[%s11656_s5 + $0x158] sm:$0xf] }
 0x33a   :  { %v7587_v62 = vld [vmem:[%s11656_s5 + $0xe14] sm:$0xf]  ;;  %v6623_v11 = vor.u32 %v7523_v44, %v6620_v52  ;;  %4393 = vmatpush.bf16.msrb.mxu1 %v6367_v39  ;;  %v5282_v44 = vld [vmem:[%s11656_s5 + $0x198] sm:$0xf] }
 0x33b   :  { %v6876_v46 = vld [vmem:[%s11656_s5 + $0xe30] sm:$0xf0]  ;;  %v7192_v52 = vld [vmem:[%s11656_s5 + $0x1b4] sm:$0xf0]  ;;  %v10741_v24 = vadd.f32 %v4073_v43, %v4056_v30  ;;  %4376 = vmatmul.bf16.vlgmr.msrb.gmra.mxu0 %v8626_v4 }
 0x33c   :  { %v6879_v14 = vor.u32 %v7587_v62, %v6876_v46  ;;  %4440 = vmatpush.bf16.msra.mxu0 %v5315_v5  ;;  %4411 = vmatpush.bf16.msrb.mxu2 %v6623_v11  ;;  %v4040_v62 = vpop.f32.mrf.mxu1  ;;  %v5283_v46 = vor.u32 %v7192_v52, %v5282_v44  ;;  %v7384_v39 = vld [vmem:[%s11656_s5 + $0x7b4] sm:$0xf0] }
 0x33d   :  { %v6051_v54 = vor.u32 %v7384_v39, %v6050_v53  ;;  %v7184_v10 = vld [vmem:[%s11656_s5 + $0x174] sm:$0xf0]  ;;  %v4041_v5 = vadd.f32 %v4040_v62, %v4023_v3  ;;  %4394 = vmatmul.bf16.vlgmr.msrb.gmra.mxu1 %v8628_v45 }
 0x33e   :  { %4458 = vmatpush.bf16.msra.mxu1 %v5571_v49  ;;  %4429 = vmatpush.bf16.msrb.mxu3 %v6879_v14  ;;  %v5506_v1 = vld [vmem:[%s11656_s5 + $0x358] sm:$0xf]  ;;  %v5251_v49 = vor.u32 %v7184_v10, %v5250_v0  ;;  %v4024_v62 = vpop.f32.mrf.mxu0 }
 0x33f   :  { %v7248_v17 = vld [vmem:[%s11656_s5 + $0x374] sm:$0xf0]  ;;  %4412 = vmatmul.bf16.vlgmr.msrb.gmra.mxu2 %v8652_v35 }
 0x340   :  { %4476 = vmatpush.bf16.msra.mxu2 %v5827_v19  ;;  %4441 = vmatpush.bf16.msra.mxu0 %v5283_v46  ;;  %v5762_v13 = vld [vmem:[%s11656_s5 + $0x558] sm:$0xf]  ;;  %v5507_v48 = vor.u32 %v7248_v17, %v5506_v1  ;;  %v4058_v6 = vpop.f32.mrf.mxu2  ;;  %v4076_v43 = vpop.f32.mrf.mxu3 }
 0x341   :  { %v7312_v11 = vld [vmem:[%s11656_s5 + $0x574] sm:$0xf0]  ;;  %v4059_v47 = vadd.f32 %v4058_v6, %v4041_v5  ;;  %4430 = vmatmul.bf16.vlgmr.msrb.gmra.mxu3 %v8654_v59 }
 0x342   :  { %4494 = vmatpush.bf16.msra.mxu3 %v6083_v7  ;;  %4459 = vmatpush.bf16.msra.mxu1 %v5539_v21  ;;  %v6018_v14 = vld [vmem:[%s11656_s5 + $0x758] sm:$0xf]  ;;  %v5763_v7 = vor.u32 %v7312_v11, %v5762_v13 }
 0x343   :  { %v7376_v19 = vld [vmem:[%s11656_s5 + $0x774] sm:$0xf0] }
 0x344   :  { %4477 = vmatpush.bf16.msra.mxu2 %v5795_v25  ;;  %v6019_v31 = vor.u32 %v7376_v19, %v6018_v14  ;;  %4442 = vmatpush.bf16.msra.mxu0 %v5251_v49  ;;  %v5218_v44 = vld [vmem:[%s11656_s5 + $0x118] sm:$0xf]  ;;  %v4042_v46 = vpop.f32.mrf.mxu1  ;;  %v10795_v25 = vadd.f32 %v4076_v43, %v4059_v47 }
 0x345   :  { %v7176_v52 = vld [vmem:[%s11656_s5 + $0x134] sm:$0xf0] }
 0x346   :  { %4495 = vmatpush.bf16.msra.mxu3 %v6051_v54  ;;  %4460 = vmatpush.bf16.msra.mxu1 %v5507_v48  ;;  %v5474_v30 = vld [vmem:[%s11656_s5 + $0x318] sm:$0xf]  ;;  %v5219_v42 = vor.u32 %v7176_v52, %v5218_v44 }
 0x347   :  { %v7240_v60 = vld [vmem:[%s11656_s5 + $0x334] sm:$0xf0] }
 0x348   :  { %v5730_v26 = vld [vmem:[%s11656_s5 + $0x518] sm:$0xf]  ;;  %4478 = vmatpush.bf16.msra.mxu2 %v5763_v7  ;;  %v5475_v21 = vor.u32 %v7240_v60, %v5474_v30  ;;  %4443 = vmatpush.bf16.msra.mxu0 %v5219_v42  ;;  %v4078_v6 = vpop.f32.mrf.mxu3  ;;  %v4089_v30 = vpop.f32.mrf.mxu0 }
 0x349   :  { %v7304_v3 = vld [vmem:[%s11656_s5 + $0x534] sm:$0xf0] }
 0x34a   :  { %4496 = vmatpush.bf16.msra.mxu3 %v6019_v31  ;;  %v5731_v50 = vor.u32 %v7304_v3, %v5730_v26  ;;  %v5986_v53 = vld [vmem:[%s11656_s5 + $0x718] sm:$0xf]  ;;  %4461 = vmatpush.bf16.msra.mxu1 %v5475_v21  ;;  %v4060_v31 = vpop.f32.mrf.mxu2  ;;  %v4090_v26 = vadd.f32 %v4089_v30, %v10714_v12 }
 0x34b   :  { %v7368_v39 = vld [vmem:[%s11656_s5 + $0x734] sm:$0xf0]  ;;  %4381 = vmatmul.bf16.gmra.mxu0 %v8778_v51 }
 0x34c   :  { %v5987_v54 = vor.u32 %v7368_v39, %v5986_v53  ;;  %v5186_v0 = vld [vmem:[%s11656_s5 + $0xd8] sm:$0xf]  ;;  %4479 = vmatpush.bf16.msra.mxu2 %v5731_v50  ;;  %v4107_v47 = vpop.f32.mrf.mxu1 }
 0x34d   :  { %v7168_v10 = vld [vmem:[%s11656_s5 + $0xf4] sm:$0xf0]  ;;  %4399 = vmatmul.bf16.gmra.mxu1 %v8780_v33 }
 0x34e   :  { %v5442_v1 = vld [vmem:[%s11656_s5 + $0x2d8] sm:$0xf]  ;;  %v5187_v5 = vor.u32 %v7168_v10, %v5186_v0  ;;  %4497 = vmatpush.bf16.msra.mxu3 %v5987_v54  ;;  %v4108_v54 = vadd.f32 %v4107_v47, %v4090_v26 }
 0x34f   :  { %v7232_v49 = vld [vmem:[%s11656_s5 + $0x2f4] sm:$0xf0]  ;;  %4417 = vmatmul.bf16.gmra.mxu2 %v8794_v36 }
 0x350   :  { %v5698_v17 = vld [vmem:[%s11656_s5 + $0x4d8] sm:$0xf]  ;;  %v5443_v48 = vor.u32 %v7232_v49, %v5442_v1  ;;  %4444 = vmatpush.bf16.msra.mxu0 %v5187_v5  ;;  %v4143_v31 = vpop.f32.mrf.mxu3  ;;  %v4091_v30 = vpop.f32.mrf.mxu0 }
 0x351   :  { %v7296_v13 = vld [vmem:[%s11656_s5 + $0x4f4] sm:$0xf0]  ;;  %v4092_v26 = vadd.f32 %v4091_v30, %v10741_v24  ;;  %4435 = vmatmul.bf16.gmra.mxu3 %v8796_v34 }
 0x352   :  { %v5699_v11 = vor.u32 %v7296_v13, %v5698_v17  ;;  %v5954_v14 = vld [vmem:[%s11656_s5 + $0x6d8] sm:$0xf]  ;;  %4462 = vmatpush.bf16.msra.mxu1 %v5443_v48 }
 0x353   :  { %v7360_v19 = vld [vmem:[%s11656_s5 + $0x6f4] sm:$0xf0] }
 0x354   :  { %v5955_v7 = vor.u32 %v7360_v19, %v5954_v14  ;;  %v5154_v43 = vld [vmem:[%s11656_s5 + $0x98] sm:$0xf]  ;;  %4480 = vmatpush.bf16.msra.mxu2 %v5699_v11  ;;  %v4109_v47 = vpop.f32.mrf.mxu1 }
 0x355   :  { %v7160_v44 = vld [vmem:[%s11656_s5 + $0xb4] sm:$0xf0] }
 0x356   :  { %v5410_v52 = vld [vmem:[%s11656_s5 + $0x298] sm:$0xf]  ;;  %v5155_v62 = vor.u32 %v7160_v44, %v5154_v43  ;;  %4498 = vmatpush.bf16.msra.mxu3 %v5955_v7  ;;  %v4125_v7 = vpop.f32.mrf.mxu2 }
 0x357   :  { %v7224_v46 = vld [vmem:[%s11656_s5 + $0x2b4] sm:$0xf0] }
 0x358   :  { %v5666_v42 = vld [vmem:[%s11656_s5 + $0x498] sm:$0xf]  ;;  %v5411_v3 = vor.u32 %v7224_v46, %v5410_v52  ;;  %4445 = vmatpush.bf16.msra.mxu0 %v5155_v62  ;;  %v4126_v52 = vadd.f32 %v4125_v7, %v4108_v54 }
 0x359   :  { %v7288_v60 = vld [vmem:[%s11656_s5 + $0x4b4] sm:$0xf0] }
 0x35a   :  { %v5667_v21 = vor.u32 %v7288_v60, %v5666_v42  ;;  %v5922_v50 = vld [vmem:[%s11656_s5 + $0x698] sm:$0xf]  ;;  %4463 = vmatpush.bf16.msra.mxu1 %v5411_v3  ;;  %v4144_v54 = vadd.f32 %v4143_v31, %v4126_v52  ;;  %v4145_v52 = vpop.f32.mrf.mxu3 }
 0x35b   :  { %v7352_v53 = vld [vmem:[%s11656_s5 + $0x6b4] sm:$0xf0] }
 0x35c   :  { %v5923_v39 = vor.u32 %v7352_v53, %v5922_v50  ;;  %v5122_v12 = vld [vmem:[%s11656_s5 + $0x58] sm:$0xf]  ;;  %4481 = vmatpush.bf16.msra.mxu2 %v5667_v21 }
 0x35d   :  { %v7152_v0 = vld [vmem:[%s11656_s5 + $0x74] sm:$0xf0] }
 0x35e   :  { %v5378_v10 = vld [vmem:[%s11656_s5 + $0x258] sm:$0xf]  ;;  %v5123_v1 = vor.u32 %v7152_v0, %v5122_v12  ;;  %4499 = vmatpush.bf16.msra.mxu3 %v5923_v39  ;;  %v4956_v39 = vrot.slane %v10681_v32, 4  ;;  %v4110_v0 = vadd.f32 %v4109_v47, %v4092_v26 }
 0x35f   :  { %v7216_v5 = vld [vmem:[%s11656_s5 + $0x274] sm:$0xf0] }
 0x360   :  { %v5634_v49 = vld [vmem:[%s11656_s5 + $0x458] sm:$0xf]  ;;  %v5379_v13 = vor.u32 %v7216_v5, %v5378_v10  ;;  %4446 = vmatpush.bf16.msra.mxu0 %v5123_v1  ;;  %v11713_v5 = vunpack.c.h.bf16 %v8130_v8 }
 0x361   :  { %v7280_v17 = vld [vmem:[%s11656_s5 + $0x474] sm:$0xf0] }
 0x362   :  { %v5635_v48 = vor.u32 %v7280_v17, %v5634_v49  ;;  %v5890_v11 = vld [vmem:[%s11656_s5 + $0x658] sm:$0xf]  ;;  %4464 = vmatpush.bf16.msra.mxu1 %v5379_v13  ;;  %v4731_v49 = vsub.f32 %v11713_v5, %v4144_v54 }
 0x363   :  { %v7344_v14 = vld [vmem:[%s11656_s5 + $0x674] sm:$0xf0] }
 0x364   :  { %v5891_v19 = vor.u32 %v7344_v14, %v5890_v11  ;;  %v5090_v6 = vld [vmem:[%s11656_s5 + $0x18] sm:$0xf]  ;;  %4482 = vmatpush.bf16.msra.mxu2 %v5635_v48  ;;  %v4755_v31 = vand.u32 2147483647, %v4731_v49 }
 0x365   :  { %v7144_v43 = vld [vmem:[%s11656_s5 + $0x34] sm:$0xf0] }
 0x366   :  { %v5346_v44 = vld [vmem:[%s11656_s5 + $0x218] sm:$0xf]  ;;  %v5091_v62 = vor.u32 %v7144_v43, %v5090_v6  ;;  %4500 = vmatpush.bf16.msra.mxu3 %v5891_v19  ;;  %v4957_v43 = vadd.f32 %v4956_v39, %v10681_v32  ;;  %v4112_v32 = vpop.f32.mrf.mxu1  ;;  %vm10987_vm15 = vcmp.lt.f32.partialorder %v4755_v31, 1.0 }
 0x367   :  { %v7208_v46 = vld [vmem:[%s11656_s5 + $0x234] sm:$0xf0] }
 0x368   :  { %v5602_v42 = vld [vmem:[%s11656_s5 + $0x418] sm:$0xf]  ;;  %v5347_v3 = vor.u32 %v7208_v46, %v5346_v44  ;;  %4447 = vmatpush.bf16.msra.mxu0 %v5091_v62  ;;  %v4127_v44 = vpop.f32.mrf.mxu2  ;;  %v4803_v46 = vmul.f32 0.5, %v4731_v49 }
 0x369   :  { %v7272_v60 = vld [vmem:[%s11656_s5 + $0x434] sm:$0xf0] }
 0x36a   :  { %v5603_v21 = vor.u32 %v7272_v60, %v5602_v42  ;;  %v5858_v50 = vld [vmem:[%s11656_s5 + $0x618] sm:$0xf]  ;;  %4465 = vmatpush.bf16.msra.mxu1 %v5347_v3  ;;  %v4128_v42 = vadd.f32 %v4127_v44, %v4110_v0  ;;  %v4094_v60 = vpop.f32.mrf.mxu0 }
 0x36b   :  { %v7336_v53 = vld [vmem:[%s11656_s5 + $0x634] sm:$0xf0]  ;;  %4448 = vmatmul.bf16.vlgmr.msra.gmra.mxu0 %v8239_v38 }
 0x36c   :  { %v5859_v12 = vor.u32 %v7336_v53, %v5858_v50  ;;  %v6338_v24 = vld [vmem:[%s11656_s5 + $0x9d8] sm:$0xf]  ;;  %4483 = vmatpush.bf16.msra.mxu2 %v5603_v21  ;;  %v4095_v21 = vadd.f32 %v4094_v60, %v10795_v25  ;;  %v4146_v0 = vadd.f32 %v4145_v52, %v4128_v42 }
 0x36d   :  { %v7456_v10 = vld [vmem:[%s11656_s5 + $0x9f4] sm:$0xf0]  ;;  %4466 = vmatmul.bf16.vlgmr.msra.gmra.mxu1 %v8241_v41 }
 0x36e   :  { %v6594_v1 = vld [vmem:[%s11656_s5 + $0xbd8] sm:$0xf]  ;;  %v6339_v17 = vor.u32 %v7456_v10, %v6338_v24  ;;  %4501 = vmatpush.bf16.msra.mxu3 %v5859_v12  ;;  %v4958_v24 = vrot.slane %v4957_v43, 2  ;;  %v4113_v10 = vadd.f32 %v4112_v32, %v4095_v21 }
 0x36f   :  { %v7520_v13 = vld [vmem:[%s11656_s5 + $0xbf4] sm:$0xf0]  ;;  %4484 = vmatmul.bf16.vlgmr.msra.gmra.mxu2 %v8267_v57 }
 0x370   :  { %v6850_v48 = vld [vmem:[%s11656_s5 + $0xdd8] sm:$0xf]  ;;  %v6595_v14 = vor.u32 %v7520_v13, %v6594_v1  ;;  %4512 = vmatpush.bf16.msrb.mxu0 %v6339_v17  ;;  %v11714_v13 = vunpack.c.h.bf16 %v8120_v2  ;;  %v7115_v2 = vadd.f32 -0.5, %v4755_v31  ;;  %v10994_v32 = vadd.f32 %v4958_v24, %v4957_v43 }
 0x371   :  { %v7584_v11 = vld [vmem:[%s11656_s5 + $0xdf4] sm:$0xf0]  ;;  %4502 = vmatmul.bf16.vlgmr.msra.gmra.mxu3 %v8269_v58 }
 0x372   :  { %v6851_v19 = vor.u32 %v7584_v11, %v6850_v48  ;;  %v7106_v8 = vld [vmem:[%s11656_s5 + $0xfd8] sm:$0xf]  ;;  %4530 = vmatpush.bf16.msrb.mxu1 %v6595_v14  ;;  %v4739_v48 = vsub.f32 %v11714_v13, %v4146_v0  ;;  %v4096_v0 = vpop.f32.mrf.mxu0 }
 0x373   :  { %v7648_v7 = vld [vmem:[%s11656_s5 + $0xff4] sm:$0xf0] }
 0x374   :  { %v7107_v6 = vor.u32 %v7648_v7, %v7106_v8  ;;  %4548 = vmatpush.bf16.msrb.mxu2 %v6851_v19  ;;  %v6306_v30 = vld [vmem:[%s11656_s5 + $0x998] sm:$0xf]  ;;  %v4827_v7 = vmul.f32 %v4803_v46, %v4731_v49  ;;  %v4811_v46 = vmul.f32 0.5, %v4739_v48 }
 0x375   :  { %v7448_v47 = vld [vmem:[%s11656_s5 + $0x9b4] sm:$0xf0] }
 0x376   :  { %v6562_v62 = vld [vmem:[%s11656_s5 + $0xb98] sm:$0xf]  ;;  %4566 = vmatpush.bf16.msrb.mxu3 %v7107_v6  ;;  %v6307_v50 = vor.u32 %v7448_v47, %v6306_v30  ;;  %v10976_v6 = vld [vmem:[%s11659_s6] sm:$0xff] }
 0x377   :  { %v7512_v26 = vld [vmem:[%s11656_s5 + $0xbb4] sm:$0xf0]  ;;  %v10979_v44 = vperm.slane %v10976_v6, 4 }
 0x378   :  { %v6818_v3 = vld [vmem:[%s11656_s5 + $0xd98] sm:$0xf]  ;;  %v6563_v53 = vor.u32 %v7512_v26, %v6562_v62  ;;  %4513 = vmatpush.bf16.msrb.mxu0 %v6307_v50  ;;  %v4763_v62 = vand.u32 2147483647, %v4739_v48  ;;  %v4130_v26 = vpop.f32.mrf.mxu2 }
 0x379   :  { %v7576_v39 = vld [vmem:[%s11656_s5 + $0xdb4] sm:$0xf0] }
 0x37a   :  { %v7074_v54 = vld [vmem:[%s11656_s5 + $0xf98] sm:$0xf]  ;;  %v6819_v25 = vor.u32 %v7576_v39, %v6818_v3  ;;  %4531 = vmatpush.bf16.msrb.mxu1 %v6563_v53  ;;  %v4148_v3 = vpop.f32.mrf.mxu3  ;;  %vm11005_vm0 = vcmp.lt.f32.partialorder %v4763_v62, 1.0  ;;  %v4835_v39 = vmul.f32 %v4811_v46, %v4739_v48 }
 0x37b   :  { %v7640_v12 = vld [vmem:[%s11656_s5 + $0xfb4] sm:$0xf0]  ;;  %4453 = vmatmul.bf16.gmra.mxu0 %v8443_v15 }
 0x37c   :  { %v7075_v1 = vor.u32 %v7640_v12, %v7074_v54  ;;  %v6274_v5 = vld [vmem:[%s11656_s5 + $0x958] sm:$0xf]  ;;  %4549 = vmatpush.bf16.msrb.mxu2 %v6819_v25  ;;  %v7123_v54 = vadd.f32 -0.5, %v4763_v62  ;;  %v4131_v12 = vadd.f32 %v4130_v26, %v4113_v10  ;;  %v4114_v25 = vpop.f32.mrf.mxu1 }
 0x37d   :  { %v7440_v17 = vld [vmem:[%s11656_s5 + $0x974] sm:$0xf0]  ;;  %4471 = vmatmul.bf16.gmra.mxu1 %v8445_v16 }
 0x37e   :  { %v6275_v11 = vor.u32 %v7440_v17, %v6274_v5  ;;  %v6530_v14 = vld [vmem:[%s11656_s5 + $0xb58] sm:$0xf]  ;;  %4567 = vmatpush.bf16.msrb.mxu3 %v7075_v1  ;;  %v4875_v5 = vsel %vm10987_vm15, %v4827_v7, %v7115_v2 }
 0x37f   :  { %v7504_v19 = vld [vmem:[%s11656_s5 + $0xb74] sm:$0xf0]  ;;  %4489 = vmatmul.bf16.gmra.mxu2 %v8447_v27 }
 0x380   :  { %v6786_v8 = vld [vmem:[%s11656_s5 + $0xd58] sm:$0xf]  ;;  %v6531_v52 = vor.u32 %v7504_v19, %v6530_v14  ;;  %4514 = vmatpush.bf16.msrb.mxu0 %v6275_v11  ;;  %v4883_v14 = vsel %vm11005_vm0, %v4835_v39, %v7123_v54  ;;  %v4149_v19 = vadd.f32 %v4148_v3, %v4131_v12  ;;  %v4960_v12 = vrot.slane %v10994_v32, 1 }
 0x381   :  { %v7568_v30 = vld [vmem:[%s11656_s5 + $0xd74] sm:$0xf0]  ;;  %4507 = vmatmul.bf16.gmra.mxu3 %v8449_v56 }
 0x382   :  { %v7042_v49 = vld [vmem:[%s11656_s5 + $0xf58] sm:$0xf]  ;;  %v6787_v42 = vor.u32 %v7568_v30, %v6786_v8  ;;  %4532 = vmatpush.bf16.msrb.mxu1 %v6531_v52 }
 0x383   :  { %v7632_v60 = vld [vmem:[%s11656_s5 + $0xf74] sm:$0xf0] }
 0x384   :  { %v7043_v21 = vor.u32 %v7632_v60, %v7042_v49  ;;  %v6242_v31 = vld [vmem:[%s11656_s5 + $0x918] sm:$0xf]  ;;  %4550 = vmatpush.bf16.msrb.mxu2 %v6787_v42  ;;  %v11037_v49 = vadd.f32 %v4883_v14, %v4875_v5  ;;  %v11719_v60 = vunpack.c.h.bf16 %v8285_v63  ;;  %v4150_v5 = vpop.f32.mrf.mxu3  ;;  %v7196_v14 = vld [vmem:[%s11656_s5 + $0x1dc] sm:$0xf] }
 0x385   :  { %v7432_v50 = vld [vmem:[%s11656_s5 + $0x934] sm:$0xf0] }
 0x386   :  { %v6498_v53 = vld [vmem:[%s11656_s5 + $0xb18] sm:$0xf]  ;;  %4568 = vmatpush.bf16.msrb.mxu3 %v7043_v21  ;;  %v6243_v17 = vor.u32 %v7432_v50, %v6242_v31  ;;  %v4747_v26 = vsub.f32 %v11719_v60, %v4149_v19 }
 0x387   :  { %v7496_v24 = vld [vmem:[%s11656_s5 + $0xb34] sm:$0xf0] }
 0x388   :  { %v6754_v1 = vld [vmem:[%s11656_s5 + $0xd18] sm:$0xf]  ;;  %v6499_v13 = vor.u32 %v7496_v24, %v6498_v53  ;;  %4515 = vmatpush.bf16.msrb.mxu0 %v6243_v17  ;;  %v4771_v0 = vand.u32 2147483647, %v4747_v26  ;;  %v4819_v25 = vmul.f32 0.5, %v4747_v26 }
 0x389   :  { %v7560_v10 = vld [vmem:[%s11656_s5 + $0xd34] sm:$0xf0] }
 0x38a   :  { %v7010_v48 = vld [vmem:[%s11656_s5 + $0xf18] sm:$0xf]  ;;  %v6755_v8 = vor.u32 %v7560_v10, %v6754_v1  ;;  %4533 = vmatpush.bf16.msrb.mxu1 %v6499_v13  ;;  %v4132_v1 = vpop.f32.mrf.mxu2  ;;  %vm11081_vm1 = vcmp.lt.f32.partialorder %v4771_v0, 1.0  ;;  %v4843_v19 = vmul.f32 %v4819_v25, %v4747_v26 }
 0x38b   :  { %v7624_v11 = vld [vmem:[%s11656_s5 + $0xf34] sm:$0xf0] }
 0x38c   :  { %v7011_v7 = vor.u32 %v7624_v11, %v7010_v48  ;;  %v6210_v2 = vld [vmem:[%s11656_s5 + $0x8d8] sm:$0xf]  ;;  %4551 = vmatpush.bf16.msrb.mxu2 %v6755_v8  ;;  %v7131_v8 = vadd.f32 -0.5, %v4771_v0 }
 0x38d   :  { %v7424_v52 = vld [vmem:[%s11656_s5 + $0x8f4] sm:$0xf0] }
 0x38e   :  { %v6466_v30 = vld [vmem:[%s11656_s5 + $0xad8] sm:$0xf]  ;;  %v6211_v47 = vor.u32 %v7424_v52, %v6210_v2  ;;  %4569 = vmatpush.bf16.msrb.mxu3 %v7011_v7  ;;  %v4161_v7 = vpop.f32.mrf.mxu0  ;;  %v4179_v2 = vpop.f32.mrf.mxu1 }
 0x38f   :  { %v7488_v62 = vld [vmem:[%s11656_s5 + $0xaf4] sm:$0xf0] }
 0x390   :  { %v6722_v46 = vld [vmem:[%s11656_s5 + $0xcd8] sm:$0xf]  ;;  %v6467_v3 = vor.u32 %v7488_v62, %v6466_v30  ;;  %4516 = vmatpush.bf16.msrb.mxu0 %v6211_v47  ;;  %v4162_v47 = vadd.f32 %v4161_v7, %v10979_v44 }
 0x391   :  { %v7552_v42 = vld [vmem:[%s11656_s5 + $0xcf4] sm:$0xf0] }
 0x392   :  { %v6978_v21 = vld [vmem:[%s11656_s5 + $0xed8] sm:$0xf]  ;;  %v6723_v53 = vor.u32 %v7552_v42, %v6722_v46  ;;  %4534 = vmatpush.bf16.msrb.mxu1 %v6467_v3  ;;  %v4891_v3 = vsel %vm11081_vm1, %v4843_v19, %v7131_v8  ;;  %v7260_v19 = vld [vmem:[%s11656_s5 + $0x3dc] sm:$0xf]  ;;  %vm5025_vm1 = vcmask 1046534  }
 0x393   :  { %v7616_v31 = vld [vmem:[%s11656_s5 + $0xef4] sm:$0xf0]  ;;  %v5572_v8 = vld [vmem:[%s11656_s5 + $0x3f8] sm:$0xf0] }
 0x394   :  { %v6178_v50 = vld [vmem:[%s11656_s5 + $0x898] sm:$0xf]  ;;  %v6979_v43 = vor.u32 %v7616_v31, %v6978_v21  ;;  %4552 = vmatpush.bf16.msrb.mxu2 %v6723_v53 }
 0x395   :  { %v7416_v63 = vld [vmem:[%s11656_s5 + $0x8b4] sm:$0xf0] }
 0x396   :  { %v6434_v39 = vld [vmem:[%s11656_s5 + $0xa98] sm:$0xf]  ;;  %v6179_v17 = vor.u32 %v7416_v63, %v6178_v50  ;;  %4570 = vmatpush.bf16.msrb.mxu3 %v6979_v43  ;;  %v4933_v43 = vmul.f32 %v9720_v61, %v4891_v3  ;;  %v4180_v63 = vadd.f32 %v4179_v2, %v4162_v47  ;;  %v4197_v2 = vpop.f32.mrf.mxu2 }
 0x397   :  { %v7480_v54 = vld [vmem:[%s11656_s5 + $0xab4] sm:$0xf0] }
 0x398   :  { %v6690_v24 = vld [vmem:[%s11656_s5 + $0xc98] sm:$0xf]  ;;  %v6435_v13 = vor.u32 %v7480_v54, %v6434_v39  ;;  %4517 = vmatpush.bf16.msrb.mxu0 %v6179_v17  ;;  %v4963_v17 = vadd.f32 %v11037_v49, %v4933_v43  ;;  %v5316_v49 = vld [vmem:[%s11656_s5 + $0x1f8] sm:$0xf0] }
 0x399   :  { %v7544_v10 = vld [vmem:[%s11656_s5 + $0xcb4] sm:$0xf0] }
 0x39a   :  { %v6946_v48 = vld [vmem:[%s11656_s5 + $0xe98] sm:$0xf]  ;;  %v6691_v62 = vor.u32 %v7544_v10, %v6690_v24  ;;  %4535 = vmatpush.bf16.msrb.mxu1 %v6435_v13  ;;  %v4964_v7 = vrot.slane %v4963_v17, 4 }
 0x39b   :  { %v7608_v11 = vld [vmem:[%s11656_s5 + $0xeb4] sm:$0xf0] }
 0x39c   :  { %v6146_v52 = vld [vmem:[%s11656_s5 + $0x858] sm:$0xf]  ;;  %v6947_v46 = vor.u32 %v7608_v11, %v6946_v48  ;;  %4553 = vmatpush.bf16.msrb.mxu2 %v6691_v62  ;;  %v7324_v62 = vld [vmem:[%s11656_s5 + $0x5dc] sm:$0xf]  ;;  %v4965_v43 = vadd.f32 %v4964_v7, %v4963_v17 }
 0x39d   :  { %v7408_v30 = vld [vmem:[%s11656_s5 + $0x874] sm:$0xf0]  ;;  %v7252_v7 = vld [vmem:[%s11656_s5 + $0x39c] sm:$0xf] }
 0x39e   :  { %v6402_v42 = vld [vmem:[%s11656_s5 + $0xa58] sm:$0xf]  ;;  %v6147_v21 = vor.u32 %v7408_v30, %v6146_v52  ;;  %4571 = vmatpush.bf16.msrb.mxu3 %v6947_v46  ;;  %v4215_v52 = vpop.f32.mrf.mxu3  ;;  %v5828_v46 = vld [vmem:[%s11656_s5 + $0x5f8] sm:$0xf0] }
 0x39f   :  { %v7472_v60 = vld [vmem:[%s11656_s5 + $0xa74] sm:$0xf0] }
 0x3a0   :  { %v6658_v26 = vld [vmem:[%s11656_s5 + $0xc58] sm:$0xf]  ;;  %v6403_v39 = vor.u32 %v7472_v60, %v6402_v42  ;;  %4518 = vmatpush.bf16.msrb.mxu0 %v6147_v21  ;;  %v4198_v42 = vadd.f32 %v4197_v2, %v4180_v63  ;;  %v4163_v60 = vpop.f32.mrf.mxu0  ;;  %v7388_v21 = vld [vmem:[%s11656_s5 + $0x7dc] sm:$0xf]  ;;  %v4961_v63 = vadd.f32 %v4960_v12, %v10994_v32 }
 0x3a1   :  { %v7536_v31 = vld [vmem:[%s11656_s5 + $0xc74] sm:$0xf0]  ;;  %v7188_v12 = vld [vmem:[%s11656_s5 + $0x19c] sm:$0xf] }
 0x3a2   :  { %v6914_v50 = vld [vmem:[%s11656_s5 + $0xe58] sm:$0xf]  ;;  %v6659_v13 = vor.u32 %v7536_v31, %v6658_v26  ;;  %4536 = vmatpush.bf16.msrb.mxu1 %v6403_v39  ;;  %v4181_v26 = vpop.f32.mrf.mxu1  ;;  %v5319_v31 = vor.u32 %v7196_v14, %v5316_v49  ;;  %v4164_v39 = vadd.f32 %v4163_v60, %v10979_v44  ;;  %v5540_v2 = vld [vmem:[%s11656_s5 + $0x3b8] sm:$0xf0] }
 0x3a3   :  { %v7600_v53 = vld [vmem:[%s11656_s5 + $0xe74] sm:$0xf0]  ;;  %v6052_v60 = vld [vmem:[%s11656_s5 + $0x7b8] sm:$0xf0] }
 0x3a4   :  { %v6114_v54 = vld [vmem:[%s11656_s5 + $0x818] sm:$0xf]  ;;  %v6915_v10 = vor.u32 %v7600_v53, %v6914_v50  ;;  %v5575_v50 = vor.u32 %v7260_v19, %v5572_v8  ;;  %v6084_v53 = vld [vmem:[%s11656_s5 + $0x7f8] sm:$0xf0]  ;;  %4554 = vmatpush.bf16.msrb.mxu2 %v6659_v13  ;;  %v5011_v13 = vrot.slane %v4961_v63, 6 }
 0x3a5   :  { %v7400_v0 = vld [vmem:[%s11656_s5 + $0x834] sm:$0xf0]  ;;  %v7308_v63 = vld [vmem:[%s11656_s5 + $0x55c] sm:$0xf] }
 0x3a6   :  { %v6370_v25 = vld [vmem:[%s11656_s5 + $0xa18] sm:$0xf]  ;;  %v6115_v30 = vor.u32 %v7400_v0, %v6114_v54  ;;  %4572 = vmatpush.bf16.msrb.mxu3 %v6915_v10  ;;  %v11170_v0 = vadd.f32 %v4215_v52, %v4198_v42  ;;  %v4217_v32 = vpop.f32.mrf.mxu3  ;;  %v7316_v52 = vld [vmem:[%s11656_s5 + $0x59c] sm:$0xf] }
 0x3a7   :  { %v7464_v24 = vld [vmem:[%s11656_s5 + $0xa34] sm:$0xf0]  ;;  %v7380_v42 = vld [vmem:[%s11656_s5 + $0x79c] sm:$0xf] }
 0x3a8   :  { %v6626_v1 = vld [vmem:[%s11656_s5 + $0xc18] sm:$0xf]  ;;  %v6371_v47 = vor.u32 %v7464_v24, %v6370_v25  ;;  %v5831_v25 = vor.u32 %v7324_v62, %v5828_v46  ;;  %v6087_v24 = vor.u32 %v7388_v21, %v6084_v53  ;;  %4519 = vmatpush.bf16.msrb.mxu0 %v6115_v30  ;;  %v4166_v49 = vpop.f32.mrf.mxu0  ;;  %v5543_v62 = vor.u32 %v7252_v7, %v5540_v2  ;;  %v5796_v46 = vld [vmem:[%s11656_s5 + $0x5b8] sm:$0xf0] }
 0x3a9   :  { %v7528_v5 = vld [vmem:[%s11656_s5 + $0xc34] sm:$0xf0]  ;;  %v7244_v21 = vld [vmem:[%s11656_s5 + $0x35c] sm:$0xf] }
 0x3aa   :  { %v6882_v48 = vld [vmem:[%s11656_s5 + $0xe18] sm:$0xf]  ;;  %v6627_v3 = vor.u32 %v7528_v5, %v6626_v1  ;;  %v4966_v1 = vrot.slane %v4965_v43, 2  ;;  %v4182_v5 = vadd.f32 %v4181_v26, %v4164_v39  ;;  %4537 = vmatpush.bf16.msrb.mxu1 %v6371_v47  ;;  %v4184_v19 = vpop.f32.mrf.mxu1  ;;  %v4167_v47 = vadd.f32 %v4166_v49, %v10979_v44  ;;  %v7236_v49 = vld [vmem:[%s11656_s5 + $0x31c] sm:$0xf] }
 0x3ab   :  { %v7592_v11 = vld [vmem:[%s11656_s5 + $0xe34] sm:$0xf0]  ;;  %v5799_v44 = vor.u32 %v7316_v52, %v5796_v46  ;;  %v5476_v2 = vld [vmem:[%s11656_s5 + $0x338] sm:$0xf0]  ;;  %4520 = vmatmul.bf16.vlgmr.msrb.gmra.mxu0 %v8626_v4 }
 0x3ac   :  { %v6883_v54 = vor.u32 %v7592_v11, %v6882_v48  ;;  %4584 = vmatpush.bf16.msra.mxu0 %v5319_v31  ;;  %v4967_v17 = vadd.f32 %v4966_v1, %v4965_v43  ;;  %4555 = vmatpush.bf16.msrb.mxu2 %v6627_v3  ;;  %v4199_v48 = vpop.f32.mrf.mxu2  ;;  %v5284_v11 = vld [vmem:[%s11656_s5 + $0x1b8] sm:$0xf0]  ;;  %v6055_v3 = vor.u32 %v7380_v42, %v6052_v60 }
 0x3ad   :  { %v4200_v14 = vadd.f32 %v4199_v48, %v4182_v5  ;;  %v5287_v8 = vor.u32 %v7188_v12, %v5284_v11  ;;  %v7180_v31 = vld [vmem:[%s11656_s5 + $0x15c] sm:$0xf]  ;;  %v4185_v43 = vadd.f32 %v4184_v19, %v4167_v47  ;;  %v5479_v47 = vor.u32 %v7236_v49, %v5476_v2  ;;  %4538 = vmatmul.bf16.vlgmr.msrb.gmra.mxu1 %v8628_v45 }
 0x3ae   :  { %4602 = vmatpush.bf16.msra.mxu1 %v5575_v50  ;;  %4573 = vmatpush.bf16.msrb.mxu3 %v6883_v54  ;;  %v4968_v10 = vrot.slane %v4967_v17, 1  ;;  %v5252_v50 = vld [vmem:[%s11656_s5 + $0x178] sm:$0xf0]  ;;  %v4220_v11 = vpop.f32.mrf.mxu3 }
 0x3af   :  { %v11197_v26 = vadd.f32 %v4217_v32, %v4200_v14  ;;  %v5255_v39 = vor.u32 %v7180_v31, %v5252_v50  ;;  %v5508_v54 = vld [vmem:[%s11656_s5 + $0x378] sm:$0xf0]  ;;  %4556 = vmatmul.bf16.vlgmr.msrb.gmra.mxu2 %v8652_v35 }
 0x3b0   :  { %4620 = vmatpush.bf16.msra.mxu2 %v5831_v25  ;;  %v4969_v30 = vadd.f32 %v4968_v10, %v4967_v17  ;;  %4585 = vmatpush.bf16.msra.mxu0 %v5287_v8  ;;  %v5511_v25 = vor.u32 %v7244_v21, %v5508_v54  ;;  %v7372_v1 = vld [vmem:[%s11656_s5 + $0x75c] sm:$0xf]  ;;  %v4168_v8 = vpop.f32.mrf.mxu0 }
 0x3b1   :  { %v6020_v5 = vld [vmem:[%s11656_s5 + $0x778] sm:$0xf0]  ;;  %4574 = vmatmul.bf16.vlgmr.msrb.gmra.mxu3 %v8654_v59 }
 0x3b2   :  { %4638 = vmatpush.bf16.msra.mxu3 %v6087_v24  ;;  %v5012_v53 = vrot.slane %v4969_v30, 5  ;;  %4603 = vmatpush.bf16.msra.mxu1 %v5543_v62  ;;  %v5764_v24 = vld [vmem:[%s11656_s5 + $0x578] sm:$0xf0]  ;;  %v6023_v48 = vor.u32 %v7372_v1, %v6020_v5 }
 0x3b3   :  { %v5767_v10 = vor.u32 %v7308_v63, %v5764_v24  ;;  %v7172_v14 = vld [vmem:[%s11656_s5 + $0x11c] sm:$0xf] }
 0x3b4   :  { %v5020_v17 = vsel %vm5019_vm2, %v5011_v13, %v5012_v53  ;;  %4621 = vmatpush.bf16.msra.mxu2 %v5799_v44  ;;  %v4202_v12 = vpop.f32.mrf.mxu2  ;;  %4586 = vmatpush.bf16.msra.mxu0 %v5255_v39  ;;  %v5220_v13 = vld [vmem:[%s11656_s5 + $0x138] sm:$0xf0]  ;;  %vm5027_vm2 = vcmask 1045508  }
 0x3b5   :  { %v11230_v32 = vsel %vm5021_vm3, %v10324_v9, %v5020_v17  ;;  %v4203_v19 = vadd.f32 %v4202_v12, %v4185_v43  ;;  %v4186_v9 = vpop.f32.mrf.mxu1  ;;  %v5223_v7 = vor.u32 %v7172_v14, %v5220_v13  ;;  %v7300_v52 = vld [vmem:[%s11656_s5 + $0x51c] sm:$0xf]  ;;  %vm5029_vm3 = vcmask 1043456  }
 0x3b6   :  { %4639 = vmatpush.bf16.msra.mxu3 %v6055_v3  ;;  %4604 = vmatpush.bf16.msra.mxu1 %v5511_v25  ;;  %v5732_v30 = vld [vmem:[%s11656_s5 + $0x538] sm:$0xf0]  ;;  %v4222_v17 = vpop.f32.mrf.mxu3 }
 0x3b7   :  { %v5735_v62 = vor.u32 %v7300_v52, %v5732_v30  ;;  %v7364_v46 = vld [vmem:[%s11656_s5 + $0x71c] sm:$0xf]  ;;  %v11256_v60 = vadd.f32 %v4220_v11, %v4203_v19 }
 0x3b8   :  { %4622 = vmatpush.bf16.msra.mxu2 %v5767_v10  ;;  %v5988_v42 = vld [vmem:[%s11656_s5 + $0x738] sm:$0xf0]  ;;  %4587 = vmatpush.bf16.msra.mxu0 %v5223_v7  ;;  %v4233_v11 = vpop.f32.mrf.mxu0 }
 0x3b9   :  { %v5991_v44 = vor.u32 %v7364_v46, %v5988_v42  ;;  %v7164_v3 = vld [vmem:[%s11656_s5 + $0xdc] sm:$0xf]  ;;  %v4234_v9 = vadd.f32 %v4233_v11, %v11170_v0 }
 0x3ba   :  { %4640 = vmatpush.bf16.msra.mxu3 %v6023_v48  ;;  %4605 = vmatpush.bf16.msra.mxu1 %v5479_v47  ;;  %v5188_v31 = vld [vmem:[%s11656_s5 + $0xf8] sm:$0xf0] }
 0x3bb   :  { %v7228_v50 = vld [vmem:[%s11656_s5 + $0x2dc] sm:$0xf]  ;;  %v5191_v21 = vor.u32 %v7164_v3, %v5188_v31  ;;  %4525 = vmatmul.bf16.gmra.mxu0 %v8778_v51 }
 0x3bc   :  { %v5444_v53 = vld [vmem:[%s11656_s5 + $0x2f8] sm:$0xf0]  ;;  %4623 = vmatpush.bf16.msra.mxu2 %v5735_v62  ;;  %v4204_v5 = vpop.f32.mrf.mxu2 }
 0x3bd   :  { %v7292_v43 = vld [vmem:[%s11656_s5 + $0x4dc] sm:$0xf]  ;;  %v5447_v54 = vor.u32 %v7228_v50, %v5444_v53  ;;  %4588 = vmatpush.bf16.msra.mxu0 %v5191_v21  ;;  %v4251_v14 = vpop.f32.mrf.mxu1  ;;  %4543 = vmatmul.bf16.gmra.mxu1 %v8780_v33 }
 0x3be   :  { %v5700_v39 = vld [vmem:[%s11656_s5 + $0x4f8] sm:$0xf0]  ;;  %4641 = vmatpush.bf16.msra.mxu3 %v5991_v44  ;;  %v4252_v62 = vadd.f32 %v4251_v14, %v4234_v9 }
 0x3bf   :  { %v5703_v63 = vor.u32 %v7292_v43, %v5700_v39  ;;  %v7356_v25 = vld [vmem:[%s11656_s5 + $0x6dc] sm:$0xf]  ;;  %4606 = vmatpush.bf16.msra.mxu1 %v5447_v54  ;;  %4561 = vmatmul.bf16.gmra.mxu2 %v8794_v36 }
 0x3c0   :  { %v5956_v24 = vld [vmem:[%s11656_s5 + $0x6f8] sm:$0xf0] }
 0x3c1   :  { %v5959_v1 = vor.u32 %v7356_v25, %v5956_v24  ;;  %v7156_v10 = vld [vmem:[%s11656_s5 + $0x9c] sm:$0xf]  ;;  %4624 = vmatpush.bf16.msra.mxu2 %v5703_v63  ;;  %v4287_v25 = vpop.f32.mrf.mxu3  ;;  %4579 = vmatmul.bf16.gmra.mxu3 %v8796_v34 }
 0x3c2   :  { %v5156_v48 = vld [vmem:[%s11656_s5 + $0xb8] sm:$0xf0] }
 0x3c3   :  { %v7220_v12 = vld [vmem:[%s11656_s5 + $0x29c] sm:$0xf]  ;;  %v5159_v13 = vor.u32 %v7156_v10, %v5156_v48  ;;  %4642 = vmatpush.bf16.msra.mxu3 %v5959_v1  ;;  %v4235_v10 = vpop.f32.mrf.mxu0 }
 0x3c4   :  { %v5412_v49 = vld [vmem:[%s11656_s5 + $0x2b8] sm:$0xf0]  ;;  %v4269_v63 = vpop.f32.mrf.mxu2 }
 0x3c5   :  { %v7284_v19 = vld [vmem:[%s11656_s5 + $0x49c] sm:$0xf]  ;;  %v5415_v7 = vor.u32 %v7220_v12, %v5412_v49  ;;  %4589 = vmatpush.bf16.msra.mxu0 %v5159_v13  ;;  %v4270_v17 = vadd.f32 %v4269_v63, %v4252_v62  ;;  %v4253_v48 = vpop.f32.mrf.mxu1  ;;  %v4236_v49 = vadd.f32 %v4235_v10, %v11197_v26 }
 0x3c6   :  { %v5668_v8 = vld [vmem:[%s11656_s5 + $0x4b8] sm:$0xf0] }
 0x3c7   :  { %v5671_v2 = vor.u32 %v7284_v19, %v5668_v8  ;;  %v7348_v52 = vld [vmem:[%s11656_s5 + $0x69c] sm:$0xf]  ;;  %4607 = vmatpush.bf16.msra.mxu1 %v5415_v7 }
 0x3c8   :  { %v5924_v30 = vld [vmem:[%s11656_s5 + $0x6b8] sm:$0xf0] }
 0x3c9   :  { %v5927_v47 = vor.u32 %v7348_v52, %v5924_v30  ;;  %v7148_v0 = vld [vmem:[%s11656_s5 + $0x5c] sm:$0xf]  ;;  %4625 = vmatpush.bf16.msra.mxu2 %v5671_v2  ;;  %v4288_v2 = vadd.f32 %v4287_v25, %v4270_v17  ;;  %v4254_v30 = vadd.f32 %v4253_v48, %v4236_v49  ;;  %v4289_v25 = vpop.f32.mrf.mxu3 }
 0x3ca   :  { %v5124_v46 = vld [vmem:[%s11656_s5 + $0x78] sm:$0xf0] }
 0x3cb   :  { %v7212_v42 = vld [vmem:[%s11656_s5 + $0x25c] sm:$0xf]  ;;  %v5127_v44 = vor.u32 %v7148_v0, %v5124_v46  ;;  %4643 = vmatpush.bf16.msra.mxu3 %v5927_v47  ;;  %v11722_v0 = vunpack.c.l.bf16 %v8427_v18  ;;  %v4238_v48 = vpop.f32.mrf.mxu0 }
 0x3cc   :  { %v5380_v3 = vld [vmem:[%s11656_s5 + $0x278] sm:$0xf0]  ;;  %v4271_v63 = vpop.f32.mrf.mxu2 }
 0x3cd   :  { %v7276_v31 = vld [vmem:[%s11656_s5 + $0x45c] sm:$0xf]  ;;  %v5383_v21 = vor.u32 %v7212_v42, %v5380_v3  ;;  %4590 = vmatpush.bf16.msra.mxu0 %v5127_v44  ;;  %v4732_v46 = vsub.f32 %v11722_v0, %v4288_v2  ;;  %v4272_v10 = vadd.f32 %v4271_v63, %v4254_v30 }
 0x3ce   :  { %v5636_v50 = vld [vmem:[%s11656_s5 + $0x478] sm:$0xf0] }
 0x3cf   :  { %v5639_v53 = vor.u32 %v7276_v31, %v5636_v50  ;;  %v7340_v43 = vld [vmem:[%s11656_s5 + $0x65c] sm:$0xf]  ;;  %4608 = vmatpush.bf16.msra.mxu1 %v5383_v21  ;;  %v4804_v17 = vmul.f32 0.5, %v4732_v46 }
 0x3d0   :  { %v5892_v39 = vld [vmem:[%s11656_s5 + $0x678] sm:$0xf0] }
 0x3d1   :  { %v5895_v54 = vor.u32 %v7340_v43, %v5892_v39  ;;  %v7140_v24 = vld [vmem:[%s11656_s5 + $0x1c] sm:$0xf]  ;;  %4626 = vmatpush.bf16.msra.mxu2 %v5639_v53  ;;  %v4756_v39 = vand.u32 2147483647, %v4732_v46 }
 0x3d2   :  { %v5092_v1 = vld [vmem:[%s11656_s5 + $0x38] sm:$0xf0] }
 0x3d3   :  { %v7204_v5 = vld [vmem:[%s11656_s5 + $0x21c] sm:$0xf]  ;;  %v5095_v12 = vor.u32 %v7140_v24, %v5092_v1  ;;  %4644 = vmatpush.bf16.msra.mxu3 %v5895_v54  ;;  %vm11411_vm4 = vcmp.lt.f32.partialorder %v4756_v39, 1.0 }
 0x3d4   :  { %v5348_v11 = vld [vmem:[%s11656_s5 + $0x238] sm:$0xf0] }
 0x3d5   :  { %v7268_v14 = vld [vmem:[%s11656_s5 + $0x41c] sm:$0xf]  ;;  %v5351_v19 = vor.u32 %v7204_v5, %v5348_v11  ;;  %4591 = vmatpush.bf16.msra.mxu0 %v5095_v12  ;;  %v4256_v12 = vpop.f32.mrf.mxu1 }
 0x3d6   :  { %v5604_v13 = vld [vmem:[%s11656_s5 + $0x438] sm:$0xf0] }
 0x3d7   :  { %v5607_v8 = vor.u32 %v7268_v14, %v5604_v13  ;;  %v7332_v9 = vld [vmem:[%s11656_s5 + $0x61c] sm:$0xf]  ;;  %4609 = vmatpush.bf16.msra.mxu1 %v5351_v19  ;;  %v4239_v13 = vadd.f32 %v4238_v48, %v11256_v60  ;;  %v11418_v60 = vperm.slane %v10976_v6, 5  ;;  %v11725_v6 = vunpack.c.l.bf16 %v8384_v28  ;;  %v4274_v48 = vpop.f32.mrf.mxu2 }
 0x3d8   :  { %v5860_v7 = vld [vmem:[%s11656_s5 + $0x638] sm:$0xf0]  ;;  %4592 = vmatmul.bf16.vlgmr.msra.gmra.mxu0 %v8239_v38 }
 0x3d9   :  { %v5863_v52 = vor.u32 %v7332_v9, %v5860_v7  ;;  %v7452_v26 = vld [vmem:[%s11656_s5 + $0x9dc] sm:$0xf]  ;;  %4627 = vmatpush.bf16.msra.mxu2 %v5607_v8 }
 0x3da   :  { %v6340_v47 = vld [vmem:[%s11656_s5 + $0x9f8] sm:$0xf0]  ;;  %4610 = vmatmul.bf16.vlgmr.msra.gmra.mxu1 %v8241_v41 }
 0x3db   :  { %v7516_v62 = vld [vmem:[%s11656_s5 + $0xbdc] sm:$0xf]  ;;  %v6343_v42 = vor.u32 %v7452_v26, %v6340_v47  ;;  %4645 = vmatpush.bf16.msra.mxu3 %v5863_v52  ;;  %v4290_v52 = vadd.f32 %v4289_v25, %v4272_v10  ;;  %v4257_v26 = vadd.f32 %v4256_v12, %v4239_v13  ;;  %v4292_v12 = vpop.f32.mrf.mxu3 }
 0x3dc   :  { %v6596_v44 = vld [vmem:[%s11656_s5 + $0xbf8] sm:$0xf0]  ;;  %4628 = vmatmul.bf16.vlgmr.msra.gmra.mxu2 %v8267_v57 }
 0x3dd   :  { %v7580_v3 = vld [vmem:[%s11656_s5 + $0xddc] sm:$0xf]  ;;  %v6599_v50 = vor.u32 %v7516_v62, %v6596_v44  ;;  %4656 = vmatpush.bf16.msrb.mxu0 %v6343_v42  ;;  %v4740_v44 = vsub.f32 %v11725_v6, %v4290_v52  ;;  %v4258_v52 = vpop.f32.mrf.mxu1 }
 0x3de   :  { %v6852_v31 = vld [vmem:[%s11656_s5 + $0xdf8] sm:$0xf0]  ;;  %4646 = vmatmul.bf16.vlgmr.msra.gmra.mxu3 %v8269_v58 }
 0x3df   :  { %v6855_v21 = vor.u32 %v7580_v3, %v6852_v31  ;;  %v7644_v53 = vld [vmem:[%s11656_s5 + $0xfdc] sm:$0xf]  ;;  %4674 = vmatpush.bf16.msrb.mxu1 %v6599_v50  ;;  %v4812_v10 = vmul.f32 0.5, %v4740_v44 }
 0x3e0   :  { %v7108_v43 = vld [vmem:[%s11656_s5 + $0xff8] sm:$0xf0] }
 0x3e1   :  { %v7111_v54 = vor.u32 %v7644_v53, %v7108_v43  ;;  %4692 = vmatpush.bf16.msrb.mxu2 %v6855_v21  ;;  %v7444_v24 = vld [vmem:[%s11656_s5 + $0x99c] sm:$0xf]  ;;  %v4828_v53 = vmul.f32 %v4804_v17, %v4732_v46 }
 0x3e2   :  { %v6308_v1 = vld [vmem:[%s11656_s5 + $0x9b8] sm:$0xf0] }
 0x3e3   :  { %v7508_v5 = vld [vmem:[%s11656_s5 + $0xb9c] sm:$0xf]  ;;  %4710 = vmatpush.bf16.msrb.mxu3 %v7111_v54  ;;  %v6311_v49 = vor.u32 %v7444_v24, %v6308_v1  ;;  %v7116_v1 = vadd.f32 -0.5, %v4756_v39 }
 0x3e4   :  { %v6564_v11 = vld [vmem:[%s11656_s5 + $0xbb8] sm:$0xf0] }
 0x3e5   :  { %v7572_v14 = vld [vmem:[%s11656_s5 + $0xd9c] sm:$0xf]  ;;  %v6567_v19 = vor.u32 %v7508_v5, %v6564_v11  ;;  %4657 = vmatpush.bf16.msrb.mxu0 %v6311_v49  ;;  %v4764_v5 = vand.u32 2147483647, %v4740_v44 }
 0x3e6   :  { %v6820_v8 = vld [vmem:[%s11656_s5 + $0xdb8] sm:$0xf0] }
 0x3e7   :  { %v7636_v9 = vld [vmem:[%s11656_s5 + $0xf9c] sm:$0xf]  ;;  %v6823_v30 = vor.u32 %v7572_v14, %v6820_v8  ;;  %4675 = vmatpush.bf16.msrb.mxu1 %v6567_v19  ;;  %vm11463_vm5 = vcmp.lt.f32.partialorder %v4764_v5, 1.0  ;;  %v4836_v19 = vmul.f32 %v4812_v10, %v4740_v44  ;;  %v7124_v8 = vadd.f32 -0.5, %v4764_v5 }
 0x3e8   :  { %v7076_v7 = vld [vmem:[%s11656_s5 + $0xfb8] sm:$0xf0]  ;;  %v4876_v44 = vsel %vm11411_vm4, %v4828_v53, %v7116_v1  ;;  %4597 = vmatmul.bf16.gmra.mxu0 %v8443_v15 }
 0x3e9   :  { %v7079_v47 = vor.u32 %v7636_v9, %v7076_v7  ;;  %v7436_v62 = vld [vmem:[%s11656_s5 + $0x95c] sm:$0xf]  ;;  %4693 = vmatpush.bf16.msrb.mxu2 %v6823_v30  ;;  %v4275_v9 = vadd.f32 %v4274_v48, %v4257_v26  ;;  %v4240_v7 = vpop.f32.mrf.mxu0 }
 0x3ea   :  { %v6276_v0 = vld [vmem:[%s11656_s5 + $0x978] sm:$0xf0]  ;;  %4615 = vmatmul.bf16.gmra.mxu1 %v8445_v16 }
 0x3eb   :  { %v7500_v42 = vld [vmem:[%s11656_s5 + $0xb5c] sm:$0xf]  ;;  %v6279_v3 = vor.u32 %v7436_v62, %v6276_v0  ;;  %4711 = vmatpush.bf16.msrb.mxu3 %v7079_v47 }
 0x3ec   :  { %v6532_v31 = vld [vmem:[%s11656_s5 + $0xb78] sm:$0xf0]  ;;  %4633 = vmatmul.bf16.gmra.mxu2 %v8447_v27 }
 0x3ed   :  { %v7564_v50 = vld [vmem:[%s11656_s5 + $0xd5c] sm:$0xf]  ;;  %v6535_v43 = vor.u32 %v7500_v42, %v6532_v31  ;;  %4658 = vmatpush.bf16.msrb.mxu0 %v6279_v3  ;;  %v4884_v3 = vsel %vm11463_vm5, %v4836_v19, %v7124_v8  ;;  %v4293_v31 = vadd.f32 %v4292_v12, %v4275_v9  ;;  %v4276_v19 = vpop.f32.mrf.mxu2  ;;  %v4294_v8 = vpop.f32.mrf.mxu3 }
 0x3ee   :  { %v6788_v21 = vld [vmem:[%s11656_s5 + $0xd78] sm:$0xf0]  ;;  %4651 = vmatmul.bf16.gmra.mxu3 %v8449_v56 }
 0x3ef   :  { %v6791_v54 = vor.u32 %v7564_v50, %v6788_v21  ;;  %v7628_v63 = vld [vmem:[%s11656_s5 + $0xf5c] sm:$0xf]  ;;  %4676 = vmatpush.bf16.msrb.mxu1 %v6535_v43  ;;  %v4748_v5 = vsub.f32 %v94_v55, %v4293_v31 }
 0x3f0   :  { %v7044_v25 = vld [vmem:[%s11656_s5 + $0xf78] sm:$0xf0] }
 0x3f1   :  { %v7428_v24 = vld [vmem:[%s11656_s5 + $0x91c] sm:$0xf]  ;;  %v7047_v46 = vor.u32 %v7628_v63, %v7044_v25  ;;  %4694 = vmatpush.bf16.msrb.mxu2 %v6791_v54  ;;  %v4970_v63 = vadd.f32 %v4884_v3, %v4876_v44 }
 0x3f2   :  { %v6244_v17 = vld [vmem:[%s11656_s5 + $0x938] sm:$0xf0] }
 0x3f3   :  { %v6247_v11 = vor.u32 %v7428_v24, %v6244_v17  ;;  %v7492_v14 = vld [vmem:[%s11656_s5 + $0xb1c] sm:$0xf]  ;;  %4712 = vmatpush.bf16.msrb.mxu3 %v7047_v46 }
 0x3f4   :  { %v6500_v39 = vld [vmem:[%s11656_s5 + $0xb38] sm:$0xf0] }
 0x3f5   :  { %v7556_v13 = vld [vmem:[%s11656_s5 + $0xd1c] sm:$0xf]  ;;  %v6503_v62 = vor.u32 %v7492_v14, %v6500_v39  ;;  %4659 = vmatpush.bf16.msrb.mxu0 %v6247_v11  ;;  %v4772_v39 = vand.u32 2147483647, %v4748_v5 }
 0x3f6   :  { %v6756_v30 = vld [vmem:[%s11656_s5 + $0xd38] sm:$0xf0] }
 0x3f7   :  { %v7620_v47 = vld [vmem:[%s11656_s5 + $0xf1c] sm:$0xf]  ;;  %v6759_v0 = vor.u32 %v7556_v13, %v6756_v30  ;;  %4677 = vmatpush.bf16.msrb.mxu1 %v6503_v62  ;;  %v4820_v13 = vmul.f32 0.5, %v4748_v5  ;;  %vm11536_vm6 = vcmp.lt.f32.partialorder %v4772_v39, 1.0 }
 0x3f8   :  { %v7012_v42 = vld [vmem:[%s11656_s5 + $0xf38] sm:$0xf0] }
 0x3f9   :  { %v7420_v26 = vld [vmem:[%s11656_s5 + $0x8dc] sm:$0xf]  ;;  %v7015_v50 = vor.u32 %v7620_v47, %v7012_v42  ;;  %4695 = vmatpush.bf16.msrb.mxu2 %v6759_v0  ;;  %v4844_v0 = vmul.f32 %v4820_v13, %v4748_v5  ;;  %v7132_v42 = vadd.f32 -0.5, %v4772_v39  ;;  %v4359_v39 = vpop.f32.mrf.mxu3 }
 0x3fa   :  { %v6212_v6 = vld [vmem:[%s11656_s5 + $0x8f8] sm:$0xf0] }
 0x3fb   :  { %v7484_v21 = vld [vmem:[%s11656_s5 + $0xadc] sm:$0xf]  ;;  %v6215_v2 = vor.u32 %v7420_v26, %v6212_v6  ;;  %4713 = vmatpush.bf16.msrb.mxu3 %v7015_v50  ;;  %v4305_v26 = vpop.f32.mrf.mxu0  ;;  %v4323_v6 = vpop.f32.mrf.mxu1 }
 0x3fc   :  { %v6468_v43 = vld [vmem:[%s11656_s5 + $0xaf8] sm:$0xf0]  ;;  %v4306_v31 = vadd.f32 %v4305_v26, %v11418_v60 }
 0x3fd   :  { %v7548_v54 = vld [vmem:[%s11656_s5 + $0xcdc] sm:$0xf]  ;;  %v6471_v53 = vor.u32 %v7484_v21, %v6468_v43  ;;  %4660 = vmatpush.bf16.msrb.mxu0 %v6215_v2 }
 0x3fe   :  { %v6724_v25 = vld [vmem:[%s11656_s5 + $0xcf8] sm:$0xf0]  ;;  %v4324_v5 = vadd.f32 %v4323_v6, %v4306_v31 }
 0x3ff   :  { %v7612_v24 = vld [vmem:[%s11656_s5 + $0xedc] sm:$0xf]  ;;  %v6727_v48 = vor.u32 %v7548_v54, %v6724_v25  ;;  %4678 = vmatpush.bf16.msrb.mxu1 %v6471_v53  ;;  %v4892_v54 = vsel %vm11536_vm6, %v4844_v0, %v7132_v42 }
 0x400   :  { %v6980_v1 = vld [vmem:[%s11656_s5 + $0xef8] sm:$0xf0] }
 0x401   :  { %v7412_v10 = vld [vmem:[%s11656_s5 + $0x89c] sm:$0xf]  ;;  %v6983_v12 = vor.u32 %v7612_v24, %v6980_v1  ;;  %4696 = vmatpush.bf16.msrb.mxu2 %v6727_v48  ;;  %v4934_v1 = vmul.f32 %v9720_v61, %v4892_v54  ;;  %v4361_v42 = vpop.f32.mrf.mxu3 }
 0x402   :  { %v6180_v46 = vld [vmem:[%s11656_s5 + $0x8b8] sm:$0xf0] }
 0x403   :  { %v7476_v17 = vld [vmem:[%s11656_s5 + $0xa9c] sm:$0xf]  ;;  %v6183_v9 = vor.u32 %v7412_v10, %v6180_v46  ;;  %4714 = vmatpush.bf16.msrb.mxu3 %v6983_v12  ;;  %v11578_v48 = vadd.f32 %v4970_v63, %v4934_v1  ;;  %v4307_v8 = vpop.f32.mrf.mxu0 }
 0x404   :  { %v6436_v55 = vld [vmem:[%s11656_s5 + $0xab8] sm:$0xf0] }
 0x405   :  { %v7540_v11 = vld [vmem:[%s11656_s5 + $0xc9c] sm:$0xf]  ;;  %v6439_v7 = vor.u32 %v7476_v17, %v6436_v55  ;;  %4661 = vmatpush.bf16.msrb.mxu0 %v6183_v9  ;;  %v4325_v9 = vpop.f32.mrf.mxu1 }
 0x406   :  { %v6692_v14 = vld [vmem:[%s11656_s5 + $0xcb8] sm:$0xf0] }
 0x407   :  { %v7604_v49 = vld [vmem:[%s11656_s5 + $0xe9c] sm:$0xf]  ;;  %v6695_v50 = vor.u32 %v7540_v11, %v6692_v14  ;;  %4679 = vmatpush.bf16.msrb.mxu1 %v6439_v7  ;;  %v4341_v14 = vpop.f32.mrf.mxu2  ;;  %v4308_v7 = vadd.f32 %v4307_v8, %v11418_v60 }
 0x408   :  { %v6948_v52 = vld [vmem:[%s11656_s5 + $0xeb8] sm:$0xf0]  ;;  %v4342_v19 = vadd.f32 %v4341_v14, %v4324_v5 }
 0x409   :  { %v7404_v30 = vld [vmem:[%s11656_s5 + $0x85c] sm:$0xf]  ;;  %v6951_v21 = vor.u32 %v7604_v49, %v6948_v52  ;;  %4697 = vmatpush.bf16.msrb.mxu2 %v6695_v50  ;;  %v4326_v62 = vadd.f32 %v4325_v9, %v4308_v7 }
 0x40a   :  { %v6148_v47 = vld [vmem:[%s11656_s5 + $0x878] sm:$0xf0] }
 0x40b   :  { %v7468_v44 = vld [vmem:[%s11656_s5 + $0xa5c] sm:$0xf]  ;;  %v6151_v2 = vor.u32 %v7404_v30, %v6148_v47  ;;  %4715 = vmatpush.bf16.msrb.mxu3 %v6951_v21  ;;  %v4360_v47 = vadd.f32 %v4359_v39, %v4342_v19  ;;  %v4310_v6 = vpop.f32.mrf.mxu0 }
 0x40c   :  { %v6404_v3 = vld [vmem:[%s11656_s5 + $0xa78] sm:$0xf0] }
 0x40d   :  { %v7532_v43 = vld [vmem:[%s11656_s5 + $0xc5c] sm:$0xf]  ;;  %v6407_v38 = vor.u32 %v7468_v44, %v6404_v3  ;;  %4662 = vmatpush.bf16.msrb.mxu0 %v6151_v2  ;;  %v4328_v44 = vpop.f32.mrf.mxu1  ;;  %v4311_v3 = vadd.f32 %v4310_v6, %v11418_v60 }
 0x40e   :  { %v6660_v53 = vld [vmem:[%s11656_s5 + $0xc78] sm:$0xf0] }
 0x40f   :  { %v7596_v25 = vld [vmem:[%s11656_s5 + $0xe5c] sm:$0xf]  ;;  %v6663_v12 = vor.u32 %v7532_v43, %v6660_v53  ;;  %4680 = vmatpush.bf16.msrb.mxu1 %v6407_v38  ;;  %v4343_v0 = vpop.f32.mrf.mxu2  ;;  %v4329_v50 = vadd.f32 %v4328_v44, %v4311_v3  ;;  %v4364_v43 = vpop.f32.mrf.mxu3  ;;  %v11616_v44 = vld [vmem:[%s11659_s6] sm:$0xff] }
 0x410   :  { %v6916_v24 = vld [vmem:[%s11656_s5 + $0xe78] sm:$0xf0]  ;;  %v4344_v26 = vadd.f32 %v4343_v0, %v4326_v62  ;;  %v1006_v3 = vperm.slane %v11616_v44, 6 }
 0x411   :  { %v7396_v41 = vld [vmem:[%s11656_s5 + $0x81c] sm:$0xf]  ;;  %v6919_v57 = vor.u32 %v7596_v25, %v6916_v24  ;;  %4698 = vmatpush.bf16.msrb.mxu2 %v6663_v12 }
 0x412   :  { %v6116_v10 = vld [vmem:[%s11656_s5 + $0x838] sm:$0xf0]  ;;  %v4362_v31 = vadd.f32 %v4361_v42, %v4344_v26 }
 0x413   :  { %v7460_v46 = vld [vmem:[%s11656_s5 + $0xa1c] sm:$0xf]  ;;  %v6119_v13 = vor.u32 %v7396_v41, %v6116_v10  ;;  %4716 = vmatpush.bf16.msrb.mxu3 %v6919_v57  ;;  %v4312_v2 = vpop.f32.mrf.mxu0  ;;  %v11730_v57 = vunpack.c.h.bf16 %v8427_v18 }
 0x414   :  { %v6372_v17 = vld [vmem:[%s11656_s5 + $0xa38] sm:$0xf0] }
 0x415   :  { %v7524_v58 = vld [vmem:[%s11656_s5 + $0xc1c] sm:$0xf]  ;;  %v6375_v49 = vor.u32 %v7460_v46, %v6372_v17  ;;  %4663 = vmatpush.bf16.msrb.mxu0 %v6119_v13  ;;  %v4330_v53 = vpop.f32.mrf.mxu1 }
 0x416   :  { %v6628_v55 = vld [vmem:[%s11656_s5 + $0xc38] sm:$0xf0] }
 0x417   :  { %v7588_v11 = vld [vmem:[%s11656_s5 + $0xe1c] sm:$0xf]  ;;  %v6631_v52 = vor.u32 %v7524_v58, %v6628_v55  ;;  %4681 = vmatpush.bf16.msrb.mxu1 %v6375_v49  ;;  %v4346_v21 = vpop.f32.mrf.mxu2  ;;  %v4366_v1 = vpop.f32.mrf.mxu3  ;;  %v11731_v49 = vunpack.c.h.bf16 %v8384_v28 }
 0x418   :  { %v6884_v63 = vld [vmem:[%s11656_s5 + $0xe38] sm:$0xf0]  ;;  %v4347_v54 = vadd.f32 %v4346_v21, %v4329_v50  ;;  %4664 = vmatmul.bf16.vlgmr.msrb.gmra.mxu0 %v8626_v4 }
 0x419   :  { %v6887_v30 = vor.u32 %v7588_v11, %v6884_v63  ;;  %4699 = vmatpush.bf16.msrb.mxu2 %v6631_v52 }
 0x41a   :  { %v4365_v25 = vadd.f32 %v4364_v43, %v4347_v54  ;;  %4682 = vmatmul.bf16.vlgmr.msrb.gmra.mxu1 %v8628_v45 }
 0x41b   :  { %4717 = vmatpush.bf16.msrb.mxu3 %v6887_v30  ;;  %v4377_v5 = vpop.f32.mrf.mxu0 }
 0x41c   :  { %v4378_v38 = vadd.f32 %v4377_v5, %v4360_v47  ;;  %4700 = vmatmul.bf16.vlgmr.msrb.gmra.mxu2 %v8652_v35 }
 0x41d   :  { %v4395_v60 = vpop.f32.mrf.mxu1 }
 0x41e   :  { %v4396_v15 = vadd.f32 %v4395_v60, %v4378_v38  ;;  %4718 = vmatmul.bf16.vlgmr.msrb.gmra.mxu3 %v8654_v59 }
 0x41f   :  { %v4348_v24 = vpop.f32.mrf.mxu2  ;;  %v4431_v27 = vpop.f32.mrf.mxu3 }
 0x423   :  { %v4379_v41 = vpop.f32.mrf.mxu0 }
 0x424   :  { %v4380_v46 = vadd.f32 %v4379_v41, %v4362_v31 }
 0x425   :  { %v4397_v10 = vpop.f32.mrf.mxu1 }
 0x426   :  { %v4398_v12 = vadd.f32 %v4397_v10, %v4380_v46 }
 0x427   :  { %v4413_v16 = vpop.f32.mrf.mxu2  ;;  %v4433_v4 = vpop.f32.mrf.mxu3 }
 0x428   :  { %v4414_v56 = vadd.f32 %v4413_v16, %v4396_v15  ;;  %4669 = vmatmul.bf16.gmra.mxu0 %v8778_v51 }
 0x42a   :  { %v4432_v17 = vadd.f32 %v4431_v27, %v4414_v56  ;;  %4687 = vmatmul.bf16.gmra.mxu1 %v8780_v33 }
 0x42b   :  { %v4382_v45 = vpop.f32.mrf.mxu0 }
 0x42c   :  { %v4733_v58 = vsub.f32 %v11730_v57, %v4432_v17  ;;  %v4383_v14 = vadd.f32 %v4382_v45, %v4365_v25  ;;  %4705 = vmatmul.bf16.gmra.mxu2 %v8794_v36  ;;  %v4972_v36 = vrot.slane %v11578_v48, 4 }
 0x42d   :  { %v4400_v63 = vpop.f32.mrf.mxu1 }
 0x42e   :  { %v4757_v35 = vand.u32 2147483647, %v4733_v58  ;;  %v4805_v39 = vmul.f32 0.5, %v4733_v58  ;;  %v4401_v13 = vadd.f32 %v4400_v63, %v4383_v14  ;;  %4723 = vmatmul.bf16.gmra.mxu3 %v8796_v34  ;;  %v4973_v21 = vadd.f32 %v4972_v36, %v11578_v48 }
 0x42f   :  { %v4415_v55 = vpop.f32.mrf.mxu2  ;;  %v4436_v30 = vpop.f32.mrf.mxu3 }
 0x430   :  { %v4416_v11 = vadd.f32 %v4415_v55, %v4398_v12  ;;  %v4829_v18 = vmul.f32 %v4805_v39, %v4733_v58  ;;  %v7117_v8 = vadd.f32 -0.5, %v4757_v35  ;;  %vm4781_vm7 = vcmp.lt.f32.partialorder %v4757_v35, 1.0 }
 0x431   :  { %v4974_v1 = vrot.slane %v4973_v21, 2 }
 0x432   :  { %v4434_v59 = vadd.f32 %v4433_v4, %v4416_v11  ;;  %v4877_v42 = vsel %vm4781_vm7, %v4829_v18, %v7117_v8 }
 0x433   :  { %v4384_v33 = vpop.f32.mrf.mxu0  ;;  %v4975_v15 = vadd.f32 %v4974_v1, %v4973_v21 }
 0x434   :  { %v4741_v19 = vsub.f32 %v11731_v49, %v4434_v59 }
 0x435   :  { %v4402_v0 = vpop.f32.mrf.mxu1  ;;  %v4976_v57 = vrot.slane %v4975_v15, 1 }
 0x436   :  { %v4765_v9 = vand.u32 2147483647, %v4741_v19  ;;  %v4813_v7 = vmul.f32 0.5, %v4741_v19 }
 0x437   :  { %v4418_v52 = vpop.f32.mrf.mxu2  ;;  %v4438_v54 = vpop.f32.mrf.mxu3  ;;  %v4977_v11 = vadd.f32 %v4976_v57, %v4975_v15 }
 0x438   :  { %vm4789_vm8 = vcmp.lt.f32.partialorder %v4765_v9, 1.0  ;;  %v4837_v47 = vmul.f32 %v4813_v7, %v4741_v19  ;;  %v7125_v51 = vadd.f32 -0.5, %v4765_v9  ;;  %v4419_v62 = vadd.f32 %v4418_v52, %v4401_v13 }
 0x439   :  { %v5013_v18 = vrot.slane %v4977_v11, 4 }
 0x43a   :  { %v4885_v28 = vsel %vm4789_vm8, %v4837_v47, %v7125_v51  ;;  %v4437_v26 = vadd.f32 %v4436_v30, %v4419_v62 }
 0x43b   :  { %v4978_v6 = vadd.f32 %v4885_v28, %v4877_v42  ;;  %v4449_v25 = vpop.f32.mrf.mxu0 }
 0x43c   :  { %v4749_v34 = vsub.f32 %v95_v20, %v4437_v26  ;;  %v4450_v22 = vadd.f32 %v4449_v25, %v1006_v3 }
 0x43d   :  { %v4467_v24 = vpop.f32.mrf.mxu1 }
 0x43e   :  { %v4773_v31 = vand.u32 2147483647, %v4749_v34  ;;  %v4821_v50 = vmul.f32 0.5, %v4749_v34  ;;  %v4468_v60 = vadd.f32 %v4467_v24, %v4450_v22 }
 0x43f   :  { %v4420_v43 = vpop.f32.mrf.mxu2  ;;  %v4503_v56 = vpop.f32.mrf.mxu3 }
 0x440   :  { %vm4797_vm9 = vcmp.lt.f32.partialorder %v4773_v31, 1.0  ;;  %v4845_v2 = vmul.f32 %v4821_v50, %v4749_v34  ;;  %v7133_v53 = vadd.f32 -0.5, %v4773_v31 }
 0x442   :  { %v4893_v20 = vsel %vm4797_vm9, %v4845_v2, %v7133_v53  ;;  %v11732_v53 = vunpack.c.l.bf16 %v8463_v40 }
 0x443   :  { %v4935_v5 = vmul.f32 %v9720_v61, %v4893_v20  ;;  %v4451_v48 = vpop.f32.mrf.mxu0 }
 0x444   :  { %v4452_v17 = vadd.f32 %v4451_v48, %v1006_v3 }
 0x445   :  { %v4979_v38 = vadd.f32 %v4978_v6, %v4935_v5  ;;  %v4469_v10 = vpop.f32.mrf.mxu1 }
 0x446   :  { %v4470_v55 = vadd.f32 %v4469_v10, %v4452_v17 }
 0x447   :  { %v4980_v16 = vrot.slane %v4979_v38, 4  ;;  %v4485_v27 = vpop.f32.mrf.mxu2  ;;  %v4505_v14 = vpop.f32.mrf.mxu3 }
 0x448   :  { %v4486_v41 = vadd.f32 %v4485_v27, %v4468_v60 }
 0x449   :  { %v4981_v46 = vadd.f32 %v4980_v16, %v4979_v38 }
 0x44a   :  { %v4504_v12 = vadd.f32 %v4503_v56, %v4486_v41  ;;  %v11733_v56 = vunpack.c.l.bf16 %v8438_v37 }
 0x44b   :  { %v4982_v58 = vrot.slane %v4981_v46, 2  ;;  %v4454_v39 = vpop.f32.mrf.mxu0 }
 0x44c   :  { %v4455_v49 = vadd.f32 %v4454_v39, %v1006_v3 }
 0x44d   :  { %v4983_v4 = vadd.f32 %v4982_v58, %v4981_v46  ;;  %v4472_v59 = vpop.f32.mrf.mxu1 }
 0x44e   :  { %v4473_v9 = vadd.f32 %v4472_v59, %v4455_v49 }
 0x44f   :  { %v4984_v45 = vrot.slane %v4983_v4, 1  ;;  %v4487_v63 = vpop.f32.mrf.mxu2  ;;  %v4508_v30 = vpop.f32.mrf.mxu3 }
 0x450   :  { %v4488_v35 = vadd.f32 %v4487_v63, %v4470_v55 }
 0x451   :  { %v4985_v13 = vadd.f32 %v4984_v45, %v4983_v4 }
 0x452   :  { %v4506_v19 = vadd.f32 %v4505_v14, %v4488_v35 }
 0x453   :  { %v5014_v8 = vrot.slane %v4985_v13, 3  ;;  %v4456_v51 = vpop.f32.mrf.mxu0 }
 0x455   :  { %v11621_v7 = vsel %vm5023_vm10, %v5013_v18, %v5014_v8  ;;  %v4474_v62 = vpop.f32.mrf.mxu1 }
 0x457   :  { %v4490_v52 = vpop.f32.mrf.mxu2  ;;  %v4510_v42 = vpop.f32.mrf.mxu3 }
 0x458   :  { %v4491_v47 = vadd.f32 %v4490_v52, %v4473_v9 }
 0x45a   :  { %v4509_v33 = vadd.f32 %v4508_v30, %v4491_v47 }
 0x45b   :  { %v4521_v28 = vpop.f32.mrf.mxu0 }
 0x45c   :  { %v4522_v36 = vadd.f32 %v4521_v28, %v4504_v12 }
 0x45d   :  { %v4539_v26 = vpop.f32.mrf.mxu1 }
 0x45e   :  { %v4540_v6 = vadd.f32 %v4539_v26, %v4522_v36 }
 0x45f   :  { %v4492_v0 = vpop.f32.mrf.mxu2  ;;  %v4575_v3 = vpop.f32.mrf.mxu3 }
 0x463   :  { %v4523_v50 = vpop.f32.mrf.mxu0 }
 0x464   :  { %v4524_v43 = vadd.f32 %v4523_v50, %v4506_v19 }
 0x465   :  { %v4541_v21 = vpop.f32.mrf.mxu1 }
 0x466   :  { %v4542_v2 = vadd.f32 %v4541_v21, %v4524_v43 }
 0x467   :  { %v4557_v34 = vpop.f32.mrf.mxu2  ;;  %v4577_v22 = vpop.f32.mrf.mxu3 }
 0x468   :  { %v4558_v31 = vadd.f32 %v4557_v34, %v4540_v6 }
 0x46a   :  { %v4576_v54 = vadd.f32 %v4575_v3, %v4558_v31  ;;  %v1007_v31 = vperm.slane %v11616_v44, 7 }
 0x46b   :  { %v4526_v1 = vpop.f32.mrf.mxu0 }
 0x46c   :  { %v4734_v25 = vsub.f32 %v11732_v53, %v4576_v54  ;;  %v4527_v60 = vadd.f32 %v4526_v1, %v4509_v33 }
 0x46d   :  { %v4544_v5 = vpop.f32.mrf.mxu1 }
 0x46e   :  { %v4758_v38 = vand.u32 2147483647, %v4734_v25  ;;  %v4806_v15 = vmul.f32 0.5, %v4734_v25  ;;  %v4545_v27 = vadd.f32 %v4544_v5, %v4527_v60 }
 0x46f   :  { %v4559_v24 = vpop.f32.mrf.mxu2  ;;  %v4580_v57 = vpop.f32.mrf.mxu3 }
 0x470   :  { %v4560_v20 = vadd.f32 %v4559_v24, %v4542_v2  ;;  %v4830_v48 = vmul.f32 %v4806_v15, %v4734_v25  ;;  %v7118_v10 = vadd.f32 -0.5, %v4758_v38  ;;  %vm4782_vm11 = vcmp.lt.f32.partialorder %v4758_v38, 1.0 }
 0x472   :  { %v4578_v16 = vadd.f32 %v4577_v22, %v4560_v20  ;;  %v4878_v63 = vsel %vm4782_vm11, %v4830_v48, %v7118_v10 }
 0x473   :  { %v4528_v11 = vpop.f32.mrf.mxu0 }
 0x474   :  { %v4742_v41 = vsub.f32 %v11733_v56, %v4578_v16 }
 0x475   :  { %v4546_v45 = vpop.f32.mrf.mxu1 }
 0x476   :  { %v4766_v46 = vand.u32 2147483647, %v4742_v41  ;;  %v4814_v17 = vmul.f32 0.5, %v4742_v41 }
 0x477   :  { %v4562_v12 = vpop.f32.mrf.mxu2  ;;  %v4582_v18 = vpop.f32.mrf.mxu3 }
 0x478   :  { %vm4790_vm12 = vcmp.lt.f32.partialorder %v4766_v46, 1.0  ;;  %v4838_v58 = vmul.f32 %v4814_v17, %v4742_v41  ;;  %v7126_v55 = vadd.f32 -0.5, %v4766_v46  ;;  %v4563_v4 = vadd.f32 %v4562_v12, %v4545_v27 }
 0x47a   :  { %v4886_v14 = vsel %vm4790_vm12, %v4838_v58, %v7126_v55  ;;  %v4581_v35 = vadd.f32 %v4580_v57, %v4563_v4 }
 0x47b   :  { %v4986_v39 = vadd.f32 %v4886_v14, %v4878_v63  ;;  %v4593_v52 = vpop.f32.mrf.mxu0 }
 0x47c   :  { %v4750_v59 = vsub.f32 %v96_v29, %v4581_v35  ;;  %v4594_v43 = vadd.f32 %v4593_v52, %v1007_v31 }
 0x47d   :  { %v4611_v30 = vpop.f32.mrf.mxu1 }
 0x47e   :  { %v4774_v13 = vand.u32 2147483647, %v4750_v59  ;;  %v4822_v49 = vmul.f32 0.5, %v4750_v59  ;;  %v4612_v25 = vadd.f32 %v4611_v30, %v4594_v43 }
 0x47f   :  { %v4564_v19 = vpop.f32.mrf.mxu2  ;;  %v4647_v0 = vpop.f32.mrf.mxu3 }
 0x480   :  { %vm4798_vm13 = vcmp.lt.f32.partialorder %v4774_v13, 1.0  ;;  %v4846_v8 = vmul.f32 %v4822_v49, %v4750_v59  ;;  %v7134_v9 = vadd.f32 -0.5, %v4774_v13  ;;  %v11734_v59 = vunpack.c.h.bf16 %v8438_v37 }
 0x481   :  { %v11735_v49 = vunpack.c.h.bf16 %v8463_v40  ;;  %v11736_v37 = vunpack.c.h.bf16 %v8619_v23 }
 0x482   :  { %v4894_v47 = vsel %vm4798_vm13, %v4846_v8, %v7134_v9 }
 0x483   :  { %v4936_v51 = vmul.f32 %v9720_v61, %v4894_v47  ;;  %v4595_v42 = vpop.f32.mrf.mxu0 }
 0x484   :  { %v4596_v54 = vadd.f32 %v4595_v42, %v1007_v31 }
 0x485   :  { %v11630_v62 = vadd.f32 %v4986_v39, %v4936_v51  ;;  %v4613_v28 = vpop.f32.mrf.mxu1 }
 0x486   :  { %v4614_v1 = vadd.f32 %v4613_v28, %v4596_v54 }
 0x487   :  { %v4629_v33 = vpop.f32.mrf.mxu2  ;;  %v4649_v29 = vpop.f32.mrf.mxu3 }
 0x488   :  { %v4630_v20 = vadd.f32 %v4629_v33, %v4612_v25 }
 0x48a   :  { %v4648_v60 = vadd.f32 %v4647_v0, %v4630_v20 }
 0x48b   :  { %v4598_v36 = vpop.f32.mrf.mxu0 }
 0x48c   :  { %v4599_v38 = vadd.f32 %v4598_v36, %v1007_v31 }
 0x48d   :  { %v4616_v6 = vpop.f32.mrf.mxu1 }
 0x48e   :  { %v4617_v48 = vadd.f32 %v4616_v6, %v4599_v38 }
 0x48f   :  { %v4631_v26 = vpop.f32.mrf.mxu2  ;;  %v4652_v3 = vpop.f32.mrf.mxu3 }
 0x490   :  { %v4632_v5 = vadd.f32 %v4631_v26, %v4614_v1  ;;  %v4988_v26 = vrot.slane %v11630_v62, 4 }
 0x492   :  { %v4650_v27 = vadd.f32 %v4649_v29, %v4632_v5 }
 0x493   :  { %v4600_v50 = vpop.f32.mrf.mxu0 }
 0x495   :  { %v4618_v21 = vpop.f32.mrf.mxu1 }
 0x496   :  { %v4989_v21 = vadd.f32 %v4988_v26, %v11630_v62 }
 0x497   :  { %v4634_v34 = vpop.f32.mrf.mxu2  ;;  %v4654_v53 = vpop.f32.mrf.mxu3 }
 0x498   :  { %v4635_v46 = vadd.f32 %v4634_v34, %v4617_v48 }
 0x49a   :  { %v4653_v4 = vadd.f32 %v4652_v3, %v4635_v46 }
 0x49b   :  { %v4665_v24 = vpop.f32.mrf.mxu0 }
 0x49c   :  { %v4666_v56 = vadd.f32 %v4665_v24, %v4648_v60 }
 0x49d   :  { %v4683_v22 = vpop.f32.mrf.mxu1 }
 0x49e   :  { %v4684_v17 = vadd.f32 %v4683_v22, %v4666_v56  ;;  %v4990_v22 = vrot.slane %v4989_v21, 2 }
 0x49f   :  { %v4636_v2 = vpop.f32.mrf.mxu2 }
 0x4a0   :  { %v4991_v60 = vadd.f32 %v4990_v22, %v4989_v21 }
 0x4a1   :  { %v4719_v16 = vpop.f32.mrf.mxu3 }
 0x4a2   :  { %v4992_v62 = vrot.slane %v4991_v60, 1 }
 0x4a3   :  { %v4667_v41 = vpop.f32.mrf.mxu0 }
 0x4a4   :  { %v4668_v10 = vadd.f32 %v4667_v41, %v4650_v27  ;;  %v4993_v56 = vadd.f32 %v4992_v62, %v4991_v60 }
 0x4a5   :  { %v4685_v44 = vpop.f32.mrf.mxu1 }
 0x4a6   :  { %v4686_v57 = vadd.f32 %v4685_v44, %v4668_v10  ;;  %v5015_v48 = vrot.slane %v4993_v56, 2 }
 0x4a7   :  { %v4701_v15 = vpop.f32.mrf.mxu2 }
 0x4a8   :  { %v4702_v12 = vadd.f32 %v4701_v15, %v4684_v17 }
 0x4a9   :  { %v4721_v55 = vpop.f32.mrf.mxu3 }
 0x4aa   :  { %v4720_v14 = vadd.f32 %v4719_v16, %v4702_v12 }
 0x4ab   :  { %v4670_v45 = vpop.f32.mrf.mxu0 }
 0x4ac   :  { %v4671_v39 = vadd.f32 %v4670_v45, %v4653_v4  ;;  %v4735_v19 = vsub.f32 %v11735_v49, %v4720_v14 }
 0x4ad   :  { %v4688_v63 = vpop.f32.mrf.mxu1 }
 0x4ae   :  { %v4689_v18 = vadd.f32 %v4688_v63, %v4671_v39  ;;  %v4759_v0 = vand.u32 2147483647, %v4735_v19  ;;  %v4807_v42 = vmul.f32 0.5, %v4735_v19 }
 0x4af   :  { %v4703_v58 = vpop.f32.mrf.mxu2 }
 0x4b0   :  { %v4704_v11 = vadd.f32 %v4703_v58, %v4686_v57  ;;  %v4831_v34 = vmul.f32 %v4807_v42, %v4735_v19  ;;  %v7119_v3 = vadd.f32 -0.5, %v4759_v0  ;;  %vm4783_vm15 = vcmp.lt.f32.partialorder %v4759_v0, 1.0 }
 0x4b1   :  { %v4724_v9 = vpop.f32.mrf.mxu3 }
 0x4b2   :  { %v4722_v35 = vadd.f32 %v4721_v55, %v4704_v11  ;;  %v4879_v25 = vsel %vm4783_vm15, %v4831_v34, %v7119_v3 }
 0x4b3   :  { %v4672_v51 = vpop.f32.mrf.mxu0 }
 0x4b4   :  { %v4743_v13 = vsub.f32 %v11734_v59, %v4722_v35 }
 0x4b5   :  { %v4690_v33 = vpop.f32.mrf.mxu1 }
 0x4b6   :  { %v4767_v52 = vand.u32 2147483647, %v4743_v13  ;;  %v4815_v30 = vmul.f32 0.5, %v4743_v13 }
 0x4b7   :  { %v4706_v8 = vpop.f32.mrf.mxu2 }
 0x4b8   :  { %v4707_v47 = vadd.f32 %v4706_v8, %v4689_v18  ;;  %v4839_v29 = vmul.f32 %v4815_v30, %v4743_v13  ;;  %v7127_v36 = vadd.f32 -0.5, %v4767_v52  ;;  %vm11640_vm14 = vcmp.lt.f32.partialorder %v4767_v52, 1.0 }
 0x4b9   :  { %v4726_v54 = vpop.f32.mrf.mxu3 }
 0x4ba   :  { %v4725_v28 = vadd.f32 %v4724_v9, %v4707_v47  ;;  %v4887_v2 = vsel %vm11640_vm14, %v4839_v29, %v7127_v36 }
 0x4bb   :  { %v4994_v20 = vadd.f32 %v4887_v2, %v4879_v25 }
 0x4bc   :  { %v4751_v6 = vsub.f32 %v11736_v37, %v4725_v28 }
 0x4be   :  { %v4775_v31 = vand.u32 2147483647, %v4751_v6  ;;  %v4823_v50 = vmul.f32 0.5, %v4751_v6 }
 0x4bf   :  { %v4708_v43 = vpop.f32.mrf.mxu2 }
 0x4c0   :  { %vm4799_vm0 = vcmp.lt.f32.partialorder %v4775_v31, 1.0  ;;  %v4847_v53 = vmul.f32 %v4823_v50, %v4751_v6  ;;  %v7135_v23 = vadd.f32 -0.5, %v4775_v31 }
 0x4c2   :  { %v4895_v24 = vsel %vm4799_vm0, %v4847_v53, %v7135_v23 }
 0x4c3   :  { %v4937_v1 = vmul.f32 %v9720_v61, %v4895_v24 }
 0x4c5   :  { %v4995_v5 = vadd.f32 %v4994_v20, %v4937_v1 }
 0x4c7   :  { %v4996_v38 = vrot.slane %v4995_v5, 4 }
 0x4c9   :  { %v4997_v15 = vadd.f32 %v4996_v38, %v4995_v5 }
 0x4cb   :  { %v4998_v16 = vrot.slane %v4997_v15, 2 }
 0x4cd   :  { %v4999_v27 = vadd.f32 %v4998_v16, %v4997_v15 }
 0x4cf   :  { %v5000_v41 = vrot.slane %v4999_v27, 1 }
 0x4d1   :  { %v5001_v44 = vadd.f32 %v5000_v41, %v4999_v27 }
 0x4d3   :  { %v5016_v10 = vrot.slane %v5001_v44, 1 }
 0x4d5   :  { %v5026_v46 = vsel %vm5025_vm1, %v5015_v48, %v5016_v10 }
 0x4d6   :  { %v5028_v17 = vsel %vm5027_vm2, %v11621_v7, %v5026_v46 }
 0x4d7   :  { %v5030_v61 = vsel %vm5029_vm3, %v11230_v32, %v5028_v17 }
 0x4d8   :  { %5032 = vst [vmem:[%s11660_s7] sm:$0xff] %v5030_v61 }

</bundles_post_ra>
